<compile_context>
chip_gen: v5e
topology: v5e:2x2
jax: 0.10.0
libtpu: 0.0.40
codegen_flags: <defaults>
</compile_context>

<pallas_src>
import functools

import numpy as np

import jax
import jax.numpy as jnp
from jax import lax
from jax.experimental import pallas as pl
from jax.experimental.pallas import tpu as pltpu

_LANES = 128


def _round_up(x, m):
    return ((x + m - 1) // m) * m


def _cdiv(a, b):
    return (a + b - 1) // b


def _fw_kernel(beta_ref, kop_ref, out_ref, *, tol, max_iter, check_every,
               batch, tile_b):
    """Frank-Wolfe clique-potential solve for one batch-lane tile.

    beta_ref: (S, TB) f32   unary potentials; spatial on sublanes, batch on lanes
    kop_ref : (S, S)  f32   -alpha * (A (x) Bm - diag)  (dense pooling operator)
    out_ref : (S, TB) f32   -(beta + v*)
    """
    beta = beta_ref[...]                       # (S, TB)  loop invariant
    kop = kop_ref[...]                         # (S, S)   loop invariant
    tb = beta.shape[1]

    # Lanes >= `valid` in this tile are batch padding: they run the FW dynamics
    # on beta=0 but must not gate the early exit of this tile.
    valid = batch - pl.program_id(0) * tile_b
    lane_ids = lax.broadcasted_iota(jnp.int32, (1, tb), 1)
    lane_mask = lane_ids < valid               # (1, TB)

    def cond(carry):
        k, max_gap, _ = carry
        return jnp.logical_and(k < max_iter, max_gap >= tol)

    def chunk(carry):                          # `check_every` FW steps per trip
        k0, _, v = carry
        g = d = v                              # overwritten by the first step
        for j in range(check_every):           # statically unrolled
            x = v + beta
            g = 0.5 * jnp.tanh(0.5 * x) + 0.5                   # sigmoid: 1 EUP op
            s = jnp.dot(kop, g, preferred_element_type=jnp.float32)  # (S,S)@(S,TB)
            d = s - v
            gamma = 2.0 / (k0.astype(jnp.float32) + (j + 2.0))
            v = v + gamma * d
        # Per-plane duality gap <grad, v - s> at the chunk's last pre-update
        # iterate: sublane reduce -> (1, TB), mask padded lanes, one lane max.
        gap = -jnp.sum(g * d, axis=0, keepdims=True)
        gap = jnp.where(lane_mask, gap, 0.0)
        return k0 + check_every, jnp.max(gap), v

    v0 = jnp.zeros_like(beta)
    _, _, v = lax.while_loop(cond, chunk,
                             (jnp.int32(0), jnp.float32(jnp.inf), v0))
    out_ref[...] = -(beta + v)                 # full-width (128-lane) stores


@functools.partial(
    jax.jit,
    static_argnames=("tol", "max_iter", "check_every", "tile_b", "vmem_limit"))
def _forward(beta_nchw, kop, *, tol, max_iter, check_every, tile_b, vmem_limit):
    N, C, H, W = beta_nchw.shape
    B, S = N * C, H * W

    # Batch-on-lanes slab: (S, B) padded to (S, Bp), Bp a multiple of tile_b.
    beta2 = beta_nchw.astype(jnp.float32).reshape(B, S).T
    Bp = _round_up(B, tile_b)
    if Bp != B:
        beta2 = jnp.pad(beta2, ((0, 0), (0, Bp - B)))
    num_tiles = Bp // tile_b

    kern = functools.partial(_fw_kernel, tol=float(tol), max_iter=int(max_iter),
                             check_every=int(check_every), batch=int(B),
                             tile_b=int(tile_b))

    # Advisory cost hint (worst case: max_iter FW steps everywhere).
    flops = int(max_iter) * Bp * (2 * S * S + 10 * S)
    transcendentals = int(max_iter) * Bp * S
    bytes_accessed = 2 * S * Bp * 4 + num_tiles * S * S * 4
    cost = pl.CostEstimate(flops=int(flops),
                           transcendentals=int(transcendentals),
                           bytes_accessed=int(bytes_accessed))

    out2 = pl.pallas_call(
        kern,
        out_shape=jax.ShapeDtypeStruct((S, Bp), jnp.float32),
        grid=(num_tiles,),
        in_specs=[
            pl.BlockSpec((S, tile_b), lambda i: (0, i)),
            pl.BlockSpec((S, S), lambda i: (0, 0)),
        ],
        out_specs=pl.BlockSpec((S, tile_b), lambda i: (0, i)),
        input_output_aliases={0: 0},           # output has the beta slab's shape/dtype
        compiler_params=pltpu.CompilerParams(
            dimension_semantics=("parallel",),
            vmem_limit_bytes=int(vmem_limit)),
        cost_estimate=cost,
    )(beta2, kop)

    return out2[:, :B].T.reshape(N, C, H, W)


def _window_membership(size, k, s):
    """(size, num_windows) binary matrix: [i, t] = 1 iff window t covers i."""
    t = (size - k) // s + 1
    idx = np.arange(size)[:, None]
    starts = np.arange(t)[None, :] * s
    return ((idx >= starts) & (idx < starts + k)).astype(np.float32)


def _pooling_operator(H, W, kernel_size, stride, alpha):
    """Dense (H*W, H*W) operator: -alpha * energy_pool(g) == Kop @ vec(g)."""
    Mh = _window_membership(H, kernel_size, stride)
    Mw = _window_membership(W, kernel_size, stride)
    A = Mh @ Mh.T                              # (H, H) row-window overlap counts
    Bm = Mw @ Mw.T                             # (W, W) col-window overlap counts
    kron = np.kron(A, Bm)                      # diag == per-pixel clique count
    kop = -float(alpha) * (kron - np.diag(np.diag(kron)))
    return kop.astype(np.float32)


def clique_potentials_crf(beta_nchw, *, kernel_size, stride, alpha=1.0,
                          tol=1e-3, max_iter=100, check_every=4):
    N, C, H, W = beta_nchw.shape
    B, S = N * C, H * W

    # Gap checks happen every `check_every` FW steps; use a divisor of max_iter
    # so the loop never runs past max_iter.
    ce = max(1, min(int(check_every), int(max_iter)))
    while int(max_iter) % ce:
        ce -= 1

    # --- generation-aware tiling -------------------------------------------
    try:                                        # v7x: 64 MiB/TC, v5e/v6e: 128 MiB
        vmem_cap = int(pltpu.get_tpu_info().vmem_capacity_bytes)
    except Exception:
        vmem_cap = 64 * 1024 * 1024             # conservative fallback
    op_bytes = S * S * 4
    # Per-128-lane group: in + out (double buffered) + ~5 f32 FW temporaries.
    group_bytes = S * _LANES * 4 * 9
    budget = max(group_bytes, int(0.55 * vmem_cap) - 2 * op_bytes)
    groups_by_vmem = max(1, budget // group_bytes)
    b_groups = _cdiv(B, _LANES)
    groups_by_grid = max(1, _cdiv(b_groups, 4))  # >= ~4 tiles for v7x's 2 TCs
    tile_b = _LANES * int(max(1, min(groups_by_vmem, groups_by_grid, b_groups)))

    vmem_limit = int(min(max(2 * op_bytes + 10 * S * tile_b * 4, 32 << 20),
                         int(0.9 * vmem_cap)))

    kop = jnp.asarray(_pooling_operator(H, W, kernel_size, stride, alpha))
    return _forward(beta_nchw, kop, tol=float(tol), max_iter=int(max_iter),
                    check_every=int(ce), tile_b=int(tile_b),
                    vmem_limit=int(vmem_limit))


def _reference(beta_nchw, *, kernel_size, stride, alpha, tol, max_iter,
               check_every):
    """Pure-JAX mirror of the kernel (same chunked FW loop) for validation."""
    N, C, H, W = beta_nchw.shape
    B, S = N * C, H * W
    kop = jnp.asarray(_pooling_operator(H, W, kernel_size, stride, alpha))
    beta = beta_nchw.astype(jnp.float32).reshape(B, S)

    def cond(carry):
        k, max_gap, _ = carry
        return jnp.logical_and(k < max_iter, max_gap >= tol)

    def chunk(carry):
        k0, _, v = carry
        g = d = v
        for j in range(check_every):
            g = 0.5 * jnp.tanh(0.5 * (v + beta)) + 0.5
            s = jnp.dot(g, kop, precision=lax.Precision.HIGHEST)  # kop symmetric
            d = s - v
            v = v + (2.0 / (k0.astype(jnp.float32) + (j + 2.0))) * d
        gap = jnp.max(-jnp.sum(g * d, axis=1))
        return k0 + check_every, gap, v

    _, _, v = lax.while_loop(cond, chunk,
                             (jnp.int32(0), jnp.float32(jnp.inf),
                              jnp.zeros_like(beta)))
    return (-(beta + v)).reshape(N, C, H, W)


if __name__ == "__main__":
    key = jax.random.PRNGKey(0)
    N, C, H, W = 2, 4, 16, 16
    beta = jax.random.normal(key, (N, C, H, W), dtype=jnp.float32)

    # Validation: tol=-1 forces both kernel and reference through exactly
    # max_iter FW steps so the comparison is independent of the stopping test.
    out_fix = clique_potentials_crf(beta, kernel_size=4, stride=4, alpha=1.0,
                                    tol=-1.0, max_iter=24, check_every=4)
    ref_fix = _reference(beta, kernel_size=4, stride=4, alpha=1.0,
                         tol=-1.0, max_iter=24, check_every=4)
    err = float(jnp.max(jnp.abs(out_fix - ref_fix)))
    assert err < 1e-1, f"kernel vs reference mismatch: max abs err = {err}"

    # Demo run with the module's default settings.
    out = clique_potentials_crf(beta, kernel_size=4, stride=4, alpha=1.0,
                                tol=1e-3, max_iter=100)
    out = jax.block_until_ready(out)
    assert out.shape == (N, C, H, W) and out.dtype == jnp.float32
    assert bool(jnp.isfinite(out).all())
    print("KERNEL_OK")
</pallas_src>

<mosaic_0001>
module attributes {stable_mosaic.version = 11 : i64} {
  func.func @_fw_kernel(%arg0: i32, %arg1: memref<256x128xf32, #tpu.memory_space<vmem>>, %arg2: memref<256x256xf32, #tpu.memory_space<vmem>>, %arg3: memref<256x128xf32, #tpu.memory_space<vmem>>) attributes {dimension_semantics = [#tpu.dimension_semantics<parallel>], iteration_bounds = array<i64: 1>, scalar_prefetch = 0 : i64, scratch_operands = 0 : i64, tpu.core_type = #tpu.core_type<tc>, window_params = [{transform_indices = @transform_0, window_bounds = array<i64: 256, 128>}, {pipeline_mode = #tpu.pipeline_mode<synchronous>, transform_indices = @transform_1, window_bounds = array<i64: 256, 256>}, {transform_indices = @transform_2, window_bounds = array<i64: 256, 128>}]} {
    %c0 = arith.constant 0 : index
    %c0_0 = arith.constant 0 : index
    %0 = vector.load %arg1[%c0, %c0_0] : memref<256x128xf32, #tpu.memory_space<vmem>>, vector<256x128xf32>
    %c0_1 = arith.constant 0 : index
    %c0_2 = arith.constant 0 : index
    %1 = vector.load %arg2[%c0_1, %c0_2] : memref<256x256xf32, #tpu.memory_space<vmem>>, vector<256x256xf32>
    %c128_i32 = arith.constant 128 : i32
    %2 = arith.muli %arg0, %c128_i32 : i32
    %c8_i32 = arith.constant 8 : i32
    %3 = arith.subi %c8_i32, %2 : i32
    %4 = tpu.iota {dimensions = array<i32: 1>} : vector<1x128xi32>
    %5 = vector.broadcast %3 : i32 to vector<1x128xi32>
    %6 = arith.cmpi slt, %4, %5 : vector<1x128xi32>
    %cst = arith.constant 0.000000e+00 : f32
    %7 = vector.broadcast %cst : f32 to vector<256x128xf32>
    %c0_i32 = arith.constant 0 : i32
    %cst_3 = arith.constant 0x7F800000 : f32
    %8:3 = scf.while (%arg4 = %c0_i32, %arg5 = %cst_3, %arg6 = %7) : (i32, f32, vector<256x128xf32>) -> (i32, f32, vector<256x128xf32>) {
      %c24_i32 = arith.constant 24 : i32
      %13 = arith.cmpi slt, %arg4, %c24_i32 : i32
      %cst_7 = arith.constant -1.000000e+00 : f32
      %14 = arith.cmpf oge, %arg5, %cst_7 : f32
      %15 = arith.andi %13, %14 : i1
      scf.condition(%15) %arg4, %arg5, %arg6 : i32, f32, vector<256x128xf32>
    } do {
    ^bb0(%arg4: i32, %arg5: f32, %arg6: vector<256x128xf32>):
      %13 = arith.addf %arg6, %0 : vector<256x128xf32>
      %cst_7 = arith.constant 5.000000e-01 : f32
      %14 = vector.broadcast %cst_7 : f32 to vector<256x128xf32>
      %15 = arith.mulf %14, %13 : vector<256x128xf32>
      %16 = math.tanh %15 : vector<256x128xf32>
      %cst_8 = arith.constant 5.000000e-01 : f32
      %17 = vector.broadcast %cst_8 : f32 to vector<256x128xf32>
      %18 = arith.mulf %17, %16 : vector<256x128xf32>
      %cst_9 = arith.constant 5.000000e-01 : f32
      %19 = vector.broadcast %cst_9 : f32 to vector<256x128xf32>
      %20 = arith.addf %18, %19 : vector<256x128xf32>
      %cst_10 = arith.constant dense<0.000000e+00> : vector<256x128xf32>
      %21 = tpu.matmul %1, %20, %cst_10 {dimension_numbers = #tpu.dot_dimension_numbers<[1], [0], [0], [1], [0, 0, 1, 1], [], []>} : vector<256x256xf32>, vector<256x128xf32>, vector<256x128xf32> -> vector<256x128xf32>
      %22 = arith.subf %21, %arg6 : vector<256x128xf32>
      %23 = arith.sitofp %arg4 : i32 to f32
      %cst_11 = arith.constant 2.000000e+00 : f32
      %24 = arith.addf %23, %cst_11 : f32
      %cst_12 = arith.constant 2.000000e+00 : f32
      %25 = arith.divf %cst_12, %24 : f32
      %26 = vector.broadcast %25 : f32 to vector<256x128xf32>
      %27 = arith.mulf %26, %22 : vector<256x128xf32>
      %28 = arith.addf %arg6, %27 : vector<256x128xf32>
      %29 = arith.addf %28, %0 : vector<256x128xf32>
      %cst_13 = arith.constant 5.000000e-01 : f32
      %30 = vector.broadcast %cst_13 : f32 to vector<256x128xf32>
      %31 = arith.mulf %30, %29 : vector<256x128xf32>
      %32 = math.tanh %31 : vector<256x128xf32>
      %cst_14 = arith.constant 5.000000e-01 : f32
      %33 = vector.broadcast %cst_14 : f32 to vector<256x128xf32>
      %34 = arith.mulf %33, %32 : vector<256x128xf32>
      %cst_15 = arith.constant 5.000000e-01 : f32
      %35 = vector.broadcast %cst_15 : f32 to vector<256x128xf32>
      %36 = arith.addf %34, %35 : vector<256x128xf32>
      %cst_16 = arith.constant dense<0.000000e+00> : vector<256x128xf32>
      %37 = tpu.matmul %1, %36, %cst_16 {dimension_numbers = #tpu.dot_dimension_numbers<[1], [0], [0], [1], [0, 0, 1, 1], [], []>} : vector<256x256xf32>, vector<256x128xf32>, vector<256x128xf32> -> vector<256x128xf32>
      %38 = arith.subf %37, %28 : vector<256x128xf32>
      %39 = arith.sitofp %arg4 : i32 to f32
      %cst_17 = arith.constant 3.000000e+00 : f32
      %40 = arith.addf %39, %cst_17 : f32
      %cst_18 = arith.constant 2.000000e+00 : f32
      %41 = arith.divf %cst_18, %40 : f32
      %42 = vector.broadcast %41 : f32 to vector<256x128xf32>
      %43 = arith.mulf %42, %38 : vector<256x128xf32>
      %44 = arith.addf %28, %43 : vector<256x128xf32>
      %45 = arith.addf %44, %0 : vector<256x128xf32>
      %cst_19 = arith.constant 5.000000e-01 : f32
      %46 = vector.broadcast %cst_19 : f32 to vector<256x128xf32>
      %47 = arith.mulf %46, %45 : vector<256x128xf32>
      %48 = math.tanh %47 : vector<256x128xf32>
      %cst_20 = arith.constant 5.000000e-01 : f32
      %49 = vector.broadcast %cst_20 : f32 to vector<256x128xf32>
      %50 = arith.mulf %49, %48 : vector<256x128xf32>
      %cst_21 = arith.constant 5.000000e-01 : f32
      %51 = vector.broadcast %cst_21 : f32 to vector<256x128xf32>
      %52 = arith.addf %50, %51 : vector<256x128xf32>
      %cst_22 = arith.constant dense<0.000000e+00> : vector<256x128xf32>
      %53 = tpu.matmul %1, %52, %cst_22 {dimension_numbers = #tpu.dot_dimension_numbers<[1], [0], [0], [1], [0, 0, 1, 1], [], []>} : vector<256x256xf32>, vector<256x128xf32>, vector<256x128xf32> -> vector<256x128xf32>
      %54 = arith.subf %53, %44 : vector<256x128xf32>
      %55 = arith.sitofp %arg4 : i32 to f32
      %cst_23 = arith.constant 4.000000e+00 : f32
      %56 = arith.addf %55, %cst_23 : f32
      %cst_24 = arith.constant 2.000000e+00 : f32
      %57 = arith.divf %cst_24, %56 : f32
      %58 = vector.broadcast %57 : f32 to vector<256x128xf32>
      %59 = arith.mulf %58, %54 : vector<256x128xf32>
      %60 = arith.addf %44, %59 : vector<256x128xf32>
      %61 = arith.addf %60, %0 : vector<256x128xf32>
      %cst_25 = arith.constant 5.000000e-01 : f32
      %62 = vector.broadcast %cst_25 : f32 to vector<256x128xf32>
      %63 = arith.mulf %62, %61 : vector<256x128xf32>
      %64 = math.tanh %63 : vector<256x128xf32>
      %cst_26 = arith.constant 5.000000e-01 : f32
      %65 = vector.broadcast %cst_26 : f32 to vector<256x128xf32>
      %66 = arith.mulf %65, %64 : vector<256x128xf32>
      %cst_27 = arith.constant 5.000000e-01 : f32
      %67 = vector.broadcast %cst_27 : f32 to vector<256x128xf32>
      %68 = arith.addf %66, %67 : vector<256x128xf32>
      %cst_28 = arith.constant dense<0.000000e+00> : vector<256x128xf32>
      %69 = tpu.matmul %1, %68, %cst_28 {dimension_numbers = #tpu.dot_dimension_numbers<[1], [0], [0], [1], [0, 0, 1, 1], [], []>} : vector<256x256xf32>, vector<256x128xf32>, vector<256x128xf32> -> vector<256x128xf32>
      %70 = arith.subf %69, %60 : vector<256x128xf32>
      %71 = arith.sitofp %arg4 : i32 to f32
      %cst_29 = arith.constant 5.000000e+00 : f32
      %72 = arith.addf %71, %cst_29 : f32
      %cst_30 = arith.constant 2.000000e+00 : f32
      %73 = arith.divf %cst_30, %72 : f32
      %74 = vector.broadcast %73 : f32 to vector<256x128xf32>
      %75 = arith.mulf %74, %70 : vector<256x128xf32>
      %76 = arith.addf %60, %75 : vector<256x128xf32>
      %77 = arith.mulf %68, %70 : vector<256x128xf32>
      %cst_31 = arith.constant dense<0.000000e+00> : vector<128xf32>
      %78 = vector.multi_reduction <add>, %77, %cst_31 [0] : vector<256x128xf32> to vector<128xf32>
      %79 = vector.shape_cast %78 : vector<128xf32> to vector<1x128xf32>
      %cst_32 = arith.constant 0.000000e+00 : f32
      %80 = vector.broadcast %cst_32 : f32 to vector<1x128xf32>
      %81 = arith.subf %80, %79 : vector<1x128xf32>
      %cst_33 = arith.constant 0.000000e+00 : f32
      %82 = vector.broadcast %cst_33 : f32 to vector<1x128xf32>
      %83 = arith.select %6, %81, %82 : vector<1x128xi1>, vector<1x128xf32>
      %c4_i32 = arith.constant 4 : i32
      %84 = arith.addi %arg4, %c4_i32 : i32
      %85 = vector.shape_cast %83 : vector<1x128xf32> to vector<1x1x128xf32>
      %cst_34 = arith.constant dense<0xFF800000> : vector<1xf32>
      %86 = vector.multi_reduction <maximumf>, %85, %cst_34 [1, 2] : vector<1x1x128xf32> to vector<1xf32>
      %87 = vector.shape_cast %86 : vector<1xf32> to vector<1x1x1xf32>
      %88 = vector.extract %87[0, 0, 0] : f32 from vector<1x1x1xf32>
      scf.yield %84, %88, %76 : i32, f32, vector<256x128xf32>
    }
    %9 = arith.addf %0, %8#2 : vector<256x128xf32>
    %cst_4 = arith.constant 0.000000e+00 : f32
    %10 = vector.broadcast %cst_4 : f32 to vector<256x128xf32>
    %11 = arith.subf %10, %9 : vector<256x128xf32>
    %c0_5 = arith.constant 0 : index
    %c0_6 = arith.constant 0 : index
    %12 = vector.load %arg3[%c0_5, %c0_6] : memref<256x128xf32, #tpu.memory_space<vmem>>, vector<256x128xf32>
    tpu.vector_store %arg3[%c0_5, %c0_6], %11 {strides = array<i32>} : memref<256x128xf32, #tpu.memory_space<vmem>>, vector<256x128xf32>,
    return
  }
  func.func @transform_0(%arg0: i32) -> (i32, i32) {
    %c0_i32 = arith.constant 0 : i32
    %c0_i32_0 = arith.constant 0 : i32
    return %c0_i32, %arg0 : i32, i32
  }
  func.func @transform_1(%arg0: i32) -> (i32, i32) {
    %c0_i32 = arith.constant 0 : i32
    %c0_i32_0 = arith.constant 0 : i32
    %c0_i32_1 = arith.constant 0 : i32
    return %c0_i32, %c0_i32_0 : i32, i32
  }
  func.func @transform_2(%arg0: i32) -> (i32, i32) {
    %c0_i32 = arith.constant 0 : i32
    %c0_i32_0 = arith.constant 0 : i32
    return %c0_i32, %arg0 : i32, i32
  }
}

</mosaic_0001>

<bundles_post_ra>
// kernel: _forward.1
= control target key start
LH: loop header
LB: loop body
LE: loop exit
PB: predicated region body
PF: predicated region fallthrough
CT: control target
= control target key end

     0   :  { %v109_v0 = vlaneseq  ;;  %s5679_s0 = inlined_call_operand.vmem [shape: f32[256,128], index: 0, kind: input, shape index: {}, may-alias: {0,2}]   ;;  %s5680_s2 = inlined_call_operand.vmem [shape: f32[256,128], index: 2, kind: output, shape index: {}, may-alias: {0,2}]   ;;  %s5681_s1 = inlined_call_operand.vmem [shape: f32[256,256], index: 1, kind: input, shape index: {}]  }
   0x1   :  { %v3258_v1 = vld [vmem:[%s5679_s0] sm:$0xff]  ;;  %v3263_v2 = vld [vmem:[%s5679_s0 + $0x8] sm:$0xff]  ;;  %v3268_v3 = vld [vmem:[%s5679_s0 + $0x10] sm:$0xff] }
   0x2   :  { %5919 = vst [vmem:[#allocation2_spill] sm:$0xff] %v3258_v1  ;;  %v3273_v4 = vld [vmem:[%s5679_s0 + $0x18] sm:$0xff]  ;;  %v3278_v5 = vld [vmem:[%s5679_s0 + $0x20] sm:$0xff]  ;;  %v3283_v6 = vld [vmem:[%s5679_s0 + $0x28] sm:$0xff]  ;;  %v3285_v7 = vand.u32 127, %v109_v0 }
   0x3   :  { %5920 = vst [vmem:[#allocation3_spill] sm:$0xff] %v3263_v2  ;;  %v3290_v8 = vld [vmem:[%s5679_s0 + $0x30] sm:$0xff]  ;;  %v3295_v9 = vld [vmem:[%s5679_s0 + $0x38] sm:$0xff]  ;;  %v3300_v10 = vld [vmem:[%s5679_s0 + $0x40] sm:$0xff] }
   0x4   :  { %5921 = vst [vmem:[#allocation4_spill] sm:$0xff] %v3268_v3  ;;  %v3305_v11 = vld [vmem:[%s5679_s0 + $0x48] sm:$0xff]  ;;  %v3310_v12 = vld [vmem:[%s5679_s0 + $0x50] sm:$0xff]  ;;  %v3315_v13 = vld [vmem:[%s5679_s0 + $0x58] sm:$0xff]  ;;  %vm112_vm0 = vcmp.lt.s32.totalorder %v3285_v7, 8 }
   0x5   :  { %5922 = vst [vmem:[#allocation5_spill] sm:$0xff] %v3273_v4  ;;  %v3321_v14 = vld [vmem:[%s5679_s0 + $0x60] sm:$0xff]  ;;  %v3326_v15 = vld [vmem:[%s5679_s0 + $0x68] sm:$0xff]  ;;  %v3331_v16 = vld [vmem:[%s5679_s0 + $0x70] sm:$0xff] }
   0x6   :  { %5923 = vst [vmem:[#allocation6_spill] sm:$0xff] %v3278_v5  ;;  %v3336_v17 = vld [vmem:[%s5679_s0 + $0x78] sm:$0xff]  ;;  %v3341_v18 = vld [vmem:[%s5679_s0 + $0x80] sm:$0xff]  ;;  %v3346_v19 = vld [vmem:[%s5679_s0 + $0x88] sm:$0xff] }
   0x7   :  { %5924 = vst [vmem:[#allocation7_spill] sm:$0xff] %v3283_v6  ;;  %v3351_v20 = vld [vmem:[%s5679_s0 + $0x90] sm:$0xff]  ;;  %v3356_v21 = vld [vmem:[%s5679_s0 + $0x98] sm:$0xff]  ;;  %v3361_v22 = vld [vmem:[%s5679_s0 + $0xa0] sm:$0xff] }
   0x8   :  { %5925 = vst [vmem:[#allocation8_spill] sm:$0xff] %v3285_v7  ;;  %v3366_v23 = vld [vmem:[%s5679_s0 + $0xa8] sm:$0xff]  ;;  %v3371_v24 = vld [vmem:[%s5679_s0 + $0xb0] sm:$0xff]  ;;  %v3376_v25 = vld [vmem:[%s5679_s0 + $0xb8] sm:$0xff] }
   0x9   :  { %5926 = vst [vmem:[#allocation9_spill] sm:$0xff] %v3290_v8  ;;  %v3381_v26 = vld [vmem:[%s5679_s0 + $0xc0] sm:$0xff]  ;;  %v3386_v27 = vld [vmem:[%s5679_s0 + $0xc8] sm:$0xff]  ;;  %v3391_v28 = vld [vmem:[%s5679_s0 + $0xd0] sm:$0xff] }
   0xa   :  { %5927 = vst [vmem:[#allocation10_spill] sm:$0xff] %v3295_v9  ;;  %v3396_v29 = vld [vmem:[%s5679_s0 + $0xd8] sm:$0xff]  ;;  %v3401_v30 = vld [vmem:[%s5679_s0 + $0xe0] sm:$0xff]  ;;  %v3406_v31 = vld [vmem:[%s5679_s0 + $0xe8] sm:$0xff] }
   0xb   :  { %5928 = vst [vmem:[#allocation11_spill] sm:$0xff] %v3300_v10  ;;  %v3411_v32 = vld [vmem:[%s5679_s0 + $0xf0] sm:$0xff]  ;;  %v3416_v33 = vld [vmem:[%s5679_s0 + $0xf8] sm:$0xff]  ;;  %v3421_v34 = vld [vmem:[%s5681_s1] sm:$0xff] }
   0xc   :  { %5929 = vst [vmem:[#allocation12_spill] sm:$0xff] %v3305_v11  ;;  %v3426_v35 = vld [vmem:[%s5681_s1 + $0x8] sm:$0xff]  ;;  %v3431_v36 = vld [vmem:[%s5681_s1 + $0x10] sm:$0xff]  ;;  %v3436_v37 = vld [vmem:[%s5681_s1 + $0x18] sm:$0xff] }
   0xd   :  { %5930 = vst [vmem:[#allocation13_spill] sm:$0xff] %v3310_v12  ;;  %v3441_v38 = vld [vmem:[%s5681_s1 + $0x20] sm:$0xff]  ;;  %v3446_v39 = vld [vmem:[%s5681_s1 + $0x28] sm:$0xff]  ;;  %v3451_v40 = vld [vmem:[%s5681_s1 + $0x30] sm:$0xff] }
   0xe   :  { %5931 = vst [vmem:[#allocation14_spill] sm:$0xff] %v3315_v13  ;;  %v3456_v41 = vld [vmem:[%s5681_s1 + $0x38] sm:$0xff]  ;;  %v3461_v42 = vld [vmem:[%s5681_s1 + $0x40] sm:$0xff]  ;;  %v3466_v43 = vld [vmem:[%s5681_s1 + $0x48] sm:$0xff] }
   0xf   :  { %5932 = vst [vmem:[#allocation15_spill] sm:$0xff] %v3321_v14  ;;  %v3471_v44 = vld [vmem:[%s5681_s1 + $0x50] sm:$0xff]  ;;  %v3476_v45 = vld [vmem:[%s5681_s1 + $0x58] sm:$0xff]  ;;  %v3481_v46 = vld [vmem:[%s5681_s1 + $0x60] sm:$0xff] }
  0x10   :  { %5933 = vst [vmem:[#allocation16_spill] sm:$0xff] %v3326_v15  ;;  %v3486_v47 = vld [vmem:[%s5681_s1 + $0x68] sm:$0xff]  ;;  %v3491_v48 = vld [vmem:[%s5681_s1 + $0x70] sm:$0xff]  ;;  %v3496_v49 = vld [vmem:[%s5681_s1 + $0x78] sm:$0xff] }
  0x11   :  { %5934 = vst [vmem:[#allocation17_spill] sm:$0xff] %v3331_v16  ;;  %v3501_v50 = vld [vmem:[%s5681_s1 + $0x80] sm:$0xff]  ;;  %v3506_v51 = vld [vmem:[%s5681_s1 + $0x88] sm:$0xff]  ;;  %v3511_v52 = vld [vmem:[%s5681_s1 + $0x90] sm:$0xff] }
  0x12   :  { %5935 = vst [vmem:[#allocation18_spill] sm:$0xff] %v3336_v17  ;;  %v3516_v53 = vld [vmem:[%s5681_s1 + $0x98] sm:$0xff]  ;;  %v3521_v54 = vld [vmem:[%s5681_s1 + $0xa0] sm:$0xff]  ;;  %v3526_v55 = vld [vmem:[%s5681_s1 + $0xa8] sm:$0xff] }
  0x13   :  { %5936 = vst [vmem:[#allocation19_spill] sm:$0xff] %v3341_v18  ;;  %v3531_v56 = vld [vmem:[%s5681_s1 + $0xb0] sm:$0xff]  ;;  %v3536_v57 = vld [vmem:[%s5681_s1 + $0xb8] sm:$0xff]  ;;  %v3541_v58 = vld [vmem:[%s5681_s1 + $0xc0] sm:$0xff] }
  0x14   :  { %5937 = vst [vmem:[#allocation20_spill] sm:$0xff] %v3346_v19  ;;  %v3546_v59 = vld [vmem:[%s5681_s1 + $0xc8] sm:$0xff]  ;;  %v3551_v60 = vld [vmem:[%s5681_s1 + $0xd0] sm:$0xff]  ;;  %v3556_v61 = vld [vmem:[%s5681_s1 + $0xd8] sm:$0xff] }
  0x15   :  { %5938 = vst [vmem:[#allocation21_spill] sm:$0xff] %v3351_v20  ;;  %v3561_v62 = vld [vmem:[%s5681_s1 + $0xe0] sm:$0xff]  ;;  %v3566_v63 = vld [vmem:[%s5681_s1 + $0xe8] sm:$0xff]  ;;  %v3571_v0 = vld [vmem:[%s5681_s1 + $0xf0] sm:$0xff] }
  0x16   :  { %5939 = vst [vmem:[#allocation22_spill] sm:$0xff] %v3356_v21  ;;  %v3576_v7 = vld [vmem:[%s5681_s1 + $0xf8] sm:$0xff] }
  0x17   :  { %5940 = vst [vmem:[#allocation23_spill] sm:$0xff] %v3361_v22 }
  0x18   :  { %5941 = vst [vmem:[#allocation24_spill] sm:$0xff] %v3366_v23 }
  0x19   :  { %5942 = vst [vmem:[#allocation25_spill] sm:$0xff] %v3371_v24 }
  0x1a   :  { %5943 = vst [vmem:[#allocation26_spill] sm:$0xff] %v3376_v25 }
  0x1b   :  { %5944 = vst [vmem:[#allocation27_spill] sm:$0xff] %v3381_v26 }
  0x1c   :  { %5945 = vst [vmem:[#allocation28_spill] sm:$0xff] %v3386_v27 }
  0x1d   :  { %5946 = vst [vmem:[#allocation29_spill] sm:$0xff] %v3391_v28 }
  0x1e   :  { %5947 = vst [vmem:[#allocation30_spill] sm:$0xff] %v3396_v29 }
  0x1f   :  { %5948 = vst [vmem:[#allocation31_spill] sm:$0xff] %v3401_v30 }
  0x20   :  { %5949 = vst [vmem:[#allocation32_spill] sm:$0xff] %v3406_v31 }
  0x21   :  { %5950 = vst [vmem:[#allocation33_spill] sm:$0xff] %v3411_v32 }
  0x22   :  { %5951 = vst [vmem:[#allocation34_spill] sm:$0xff] %v3416_v33 }
  0x23   :  { %5952 = vst [vmem:[#allocation35_spill] sm:$0xff] %v3421_v34  ;;  %v3800_v34 = vmov 0.0  }
  0x24   :  { %5953 = vst [vmem:[#allocation36_spill] sm:$0xff] %v3426_v35  ;;  %v3798_v35 = vmov 0.0  }
  0x25   :  { %5954 = vst [vmem:[#allocation37_spill] sm:$0xff] %v3431_v36  ;;  %v3796_v36 = vmov 0.0  }
  0x26   :  { %5955 = vst [vmem:[#allocation38_spill] sm:$0xff] %v3436_v37  ;;  %v3794_v37 = vmov 0.0  }
  0x27   :  { %5956 = vst [vmem:[#allocation39_spill] sm:$0xff] %v3441_v38  ;;  %v3792_v38 = vmov 0.0  }
  0x28   :  { %5957 = vst [vmem:[#allocation40_spill] sm:$0xff] %v3446_v39  ;;  %v3790_v39 = vmov 0.0  }
  0x29   :  { %5958 = vst [vmem:[#allocation41_spill] sm:$0xff] %v3451_v40  ;;  %v3788_v40 = vmov 0.0  }
  0x2a   :  { %5959 = vst [vmem:[#allocation42_spill] sm:$0xff] %v3456_v41  ;;  %v3786_v41 = vmov 0.0  }
  0x2b   :  { %5960 = vst [vmem:[#allocation43_spill] sm:$0xff] %v3461_v42  ;;  %v3784_v42 = vmov 0.0  }
  0x2c   :  { %5961 = vst [vmem:[#allocation44_spill] sm:$0xff] %v3466_v43  ;;  %v3782_v43 = vmov 0.0  }
  0x2d   :  { %5962 = vst [vmem:[#allocation45_spill] sm:$0xff] %v3471_v44  ;;  %v3780_v44 = vmov 0.0  }
  0x2e   :  { %5963 = vst [vmem:[#allocation46_spill] sm:$0xff] %v3476_v45  ;;  %v3778_v45 = vmov 0.0  }
  0x2f   :  { %5964 = vst [vmem:[#allocation47_spill] sm:$0xff] %v3481_v46  ;;  %v3776_v46 = vmov 0.0  }
  0x30   :  { %5965 = vst [vmem:[#allocation48_spill] sm:$0xff] %v3486_v47  ;;  %v3774_v47 = vmov 0.0  }
  0x31   :  { %5966 = vst [vmem:[#allocation49_spill] sm:$0xff] %v3491_v48  ;;  %v3772_v48 = vmov 0.0  }
  0x32   :  { %5967 = vst [vmem:[#allocation50_spill] sm:$0xff] %v3496_v49  ;;  %v3770_v49 = vmov 0.0  }
  0x33   :  { %5968 = vst [vmem:[#allocation51_spill] sm:$0xff] %v3501_v50  ;;  %v3768_v50 = vmov 0.0  }
  0x34   :  { %5969 = vst [vmem:[#allocation52_spill] sm:$0xff] %v3506_v51  ;;  %v3766_v51 = vmov 0.0  }
  0x35   :  { %5970 = vst [vmem:[#allocation53_spill] sm:$0xff] %v3511_v52  ;;  %v3764_v52 = vmov 0.0  }
  0x36   :  { %5971 = vst [vmem:[#allocation54_spill] sm:$0xff] %v3516_v53  ;;  %v3762_v53 = vmov 0.0  }
  0x37   :  { %5972 = vst [vmem:[#allocation55_spill] sm:$0xff] %v3521_v54  ;;  %v3760_v54 = vmov 0.0  }
  0x38   :  { %5973 = vst [vmem:[#allocation56_spill] sm:$0xff] %v3526_v55  ;;  %v3756_v55 = vmov 0.0  }
  0x39   :  { %5974 = vst [vmem:[#allocation57_spill] sm:$0xff] %v3531_v56  ;;  %v3754_v56 = vmov 0.0  }
  0x3a   :  { %5975 = vst [vmem:[#allocation58_spill] sm:$0xff] %v3536_v57  ;;  %v3750_v57 = vmov 0.0  }
  0x3b   :  { %5976 = vst [vmem:[#allocation59_spill] sm:$0xff] %v3541_v58  ;;  %v3746_v58 = vmov 0.0  }
  0x3c   :  { %5977 = vst [vmem:[#allocation60_spill] sm:$0xff] %v3546_v59  ;;  %v3744_v59 = vmov 0.0  }
  0x3d   :  { %5978 = vst [vmem:[#allocation61_spill] sm:$0xff] %v3551_v60  ;;  %v3740_v60 = vmov 0.0  }
  0x3e   :  { %5979 = vst [vmem:[#allocation62_spill] sm:$0xff] %v3556_v61  ;;  %v3581_v61 = vld [vmem:[%s5681_s1 + $0x100] sm:$0xff] }
  0x3f   :  { %5980 = vst [vmem:[#allocation63_spill] sm:$0xff] %v3561_v62  ;;  %v3586_v62 = vld [vmem:[%s5681_s1 + $0x108] sm:$0xff] }
  0x40   :  { %5981 = vst [vmem:[#allocation64_spill] sm:$0xff] %v3566_v63  ;;  %v3591_v63 = vld [vmem:[%s5681_s1 + $0x110] sm:$0xff] }
  0x41   :  { %5982 = vst [vmem:[#allocation65_spill] sm:$0xff] %v3571_v0  ;;  %v3596_v0 = vld [vmem:[%s5681_s1 + $0x118] sm:$0xff] }
  0x42   :  { %5983 = vst [vmem:[#allocation66_spill] sm:$0xff] %v3576_v7  ;;  %v3601_v7 = vld [vmem:[%s5681_s1 + $0x120] sm:$0xff] }
  0x43   :  { %5984 = vst [vmem:[#allocation67_spill] sm:$0xff] %v3581_v61  ;;  %v3606_v61 = vld [vmem:[%s5681_s1 + $0x128] sm:$0xff] }
  0x44   :  { %5985 = vst [vmem:[#allocation68_spill] sm:$0xff] %v3586_v62  ;;  %v3611_v62 = vld [vmem:[%s5681_s1 + $0x130] sm:$0xff] }
  0x45   :  { %5986 = vst [vmem:[#allocation69_spill] sm:$0xff] %v3591_v63  ;;  %v3616_v63 = vld [vmem:[%s5681_s1 + $0x138] sm:$0xff] }
  0x46   :  { %5987 = vst [vmem:[#allocation70_spill] sm:$0xff] %v3596_v0  ;;  %v3621_v0 = vld [vmem:[%s5681_s1 + $0x140] sm:$0xff] }
  0x47   :  { %5988 = vst [vmem:[#allocation71_spill] sm:$0xff] %v3601_v7  ;;  %v3626_v7 = vld [vmem:[%s5681_s1 + $0x148] sm:$0xff] }
  0x48   :  { %5989 = vst [vmem:[#allocation72_spill] sm:$0xff] %v3606_v61  ;;  %v3631_v61 = vld [vmem:[%s5681_s1 + $0x150] sm:$0xff] }
  0x49   :  { %5990 = vst [vmem:[#allocation73_spill] sm:$0xff] %v3611_v62  ;;  %v3636_v62 = vld [vmem:[%s5681_s1 + $0x158] sm:$0xff] }
  0x4a   :  { %5991 = vst [vmem:[#allocation74_spill] sm:$0xff] %v3616_v63  ;;  %v3641_v63 = vld [vmem:[%s5681_s1 + $0x160] sm:$0xff] }
  0x4b   :  { %5992 = vst [vmem:[#allocation75_spill] sm:$0xff] %v3621_v0  ;;  %v3646_v0 = vld [vmem:[%s5681_s1 + $0x168] sm:$0xff] }
  0x4c   :  { %5993 = vst [vmem:[#allocation76_spill] sm:$0xff] %v3626_v7  ;;  %v3651_v7 = vld [vmem:[%s5681_s1 + $0x170] sm:$0xff] }
  0x4d   :  { %5994 = vst [vmem:[#allocation77_spill] sm:$0xff] %v3631_v61  ;;  %v3656_v61 = vld [vmem:[%s5681_s1 + $0x178] sm:$0xff] }
  0x4e   :  { %5995 = vst [vmem:[#allocation78_spill] sm:$0xff] %v3636_v62  ;;  %v3661_v62 = vld [vmem:[%s5681_s1 + $0x180] sm:$0xff] }
  0x4f   :  { %5996 = vst [vmem:[#allocation79_spill] sm:$0xff] %v3641_v63  ;;  %v3666_v63 = vld [vmem:[%s5681_s1 + $0x188] sm:$0xff] }
  0x50   :  { %5997 = vst [vmem:[#allocation80_spill] sm:$0xff] %v3646_v0  ;;  %v3671_v0 = vld [vmem:[%s5681_s1 + $0x190] sm:$0xff] }
  0x51   :  { %5998 = vst [vmem:[#allocation81_spill] sm:$0xff] %v3651_v7  ;;  %v3676_v7 = vld [vmem:[%s5681_s1 + $0x198] sm:$0xff] }
  0x52   :  { %5999 = vst [vmem:[#allocation82_spill] sm:$0xff] %v3656_v61  ;;  %v3681_v61 = vld [vmem:[%s5681_s1 + $0x1a0] sm:$0xff] }
  0x53   :  { %6000 = vst [vmem:[#allocation83_spill] sm:$0xff] %v3661_v62  ;;  %v3686_v62 = vld [vmem:[%s5681_s1 + $0x1a8] sm:$0xff] }
  0x54   :  { %6001 = vst [vmem:[#allocation84_spill] sm:$0xff] %v3666_v63  ;;  %v3691_v63 = vld [vmem:[%s5681_s1 + $0x1b0] sm:$0xff] }
  0x55   :  { %6002 = vst [vmem:[#allocation85_spill] sm:$0xff] %v3671_v0  ;;  %v3696_v0 = vld [vmem:[%s5681_s1 + $0x1b8] sm:$0xff] }
  0x56   :  { %6003 = vst [vmem:[#allocation86_spill] sm:$0xff] %v3676_v7  ;;  %v3701_v7 = vld [vmem:[%s5681_s1 + $0x1c0] sm:$0xff] }
  0x57   :  { %6004 = vst [vmem:[#allocation87_spill] sm:$0xff] %v3681_v61  ;;  %v3706_v61 = vld [vmem:[%s5681_s1 + $0x1c8] sm:$0xff] }
  0x58   :  { %6005 = vst [vmem:[#allocation88_spill] sm:$0xff] %v3686_v62  ;;  %v3711_v62 = vld [vmem:[%s5681_s1 + $0x1d0] sm:$0xff] }
  0x59   :  { %6006 = vst [vmem:[#allocation89_spill] sm:$0xff] %v3691_v63  ;;  %v3716_v63 = vld [vmem:[%s5681_s1 + $0x1d8] sm:$0xff] }
  0x5a   :  { %6007 = vst [vmem:[#allocation90_spill] sm:$0xff] %v3696_v0  ;;  %v3721_v0 = vld [vmem:[%s5681_s1 + $0x1e0] sm:$0xff] }
  0x5b   :  { %6008 = vst [vmem:[#allocation91_spill] sm:$0xff] %v3701_v7  ;;  %v3726_v7 = vld [vmem:[%s5681_s1 + $0x1e8] sm:$0xff] }
  0x5c   :  { %6009 = vst [vmem:[#allocation92_spill] sm:$0xff] %v3706_v61  ;;  %v3731_v61 = vld [vmem:[%s5681_s1 + $0x1f0] sm:$0xff] }
  0x5d   :  { %6010 = vst [vmem:[#allocation93_spill] sm:$0xff] %v3711_v62  ;;  %v3736_v62 = vld [vmem:[%s5681_s1 + $0x1f8] sm:$0xff]  ;;  %s3802_s1 = smov 0  }
  0x5e   :  { %6011 = vst [vmem:[#allocation94_spill] sm:$0xff] %v3716_v63  ;;  %v3738_v63 = vmov 0.0  }
  0x5f   :  { %6012 = vst [vmem:[#allocation95_spill] sm:$0xff] %v3721_v0  ;;  %v3742_v0 = vmov 0.0  }
  0x60   :  { %6013 = vst [vmem:[#allocation96_spill] sm:$0xff] %v3726_v7  ;;  %v3748_v7 = vmov 0.0  }
  0x61   :  { %6014 = vst [vmem:[#allocation97_spill] sm:$0xff] %v3731_v61  ;;  %v3752_v61 = vmov 0.0  }
  0x62   :  { %6015 = vst [vmem:[#allocation98_spill] sm:$0xff] %v3736_v62  ;;  %v3758_v62 = vmov 0.0  }
  0x63 LB: > { %v6016_v16 = vld [vmem:[#allocation17_spill] sm:$0xff]  ;;  %v6017_v15 = vld [vmem:[#allocation16_spill] sm:$0xff]  ;;  %v6018_v14 = vld [vmem:[#allocation15_spill] sm:$0xff]  ;;  %6024 = vst [vmem:[#allocation99_spill] sm:$0xff] %v3110_v63  ;;  %s2230_s28 = sadd.s32 4, %s3238_s1   ;;  %s3975_s29 = scvt.s32.f32 %s3238_s1  ;;  %v3138_v61 = vphi %v3752_v61, %v6566_v61   ;;  %v3134_v57 = vphi %v3750_v57, %v6565_v57   ;;  %v3130_v7 = vphi %v3748_v7, %v6564_v7   ;;  %v3126_v58 = vphi %v3746_v58, %v6563_v58   ;;  %v3122_v59 = vphi %v3744_v59, %v6562_v59   ;;  %v3118_v0 = vphi %v3742_v0, %v6561_v0   ;;  %v3114_v60 = vphi %v3740_v60, %v6560_v60   ;;  %v3110_v63 = vphi %v3738_v63, %v6559_v63   ;;  %s3238_s1 = sphi %s3802_s1, %s6591_s1   ;;  %v3234_v34 = vphi %v3800_v34, %v6590_v34   ;;  %v3230_v35 = vphi %v3798_v35, %v6589_v35   ;;  %v3226_v36 = vphi %v3796_v36, %v6588_v36   ;;  %v3222_v37 = vphi %v3794_v37, %v6587_v37   ;;  %v3218_v38 = vphi %v3792_v38, %v6586_v38   ;;  %v3214_v39 = vphi %v3790_v39, %v6585_v39   ;;  %v3210_v40 = vphi %v3788_v40, %v6584_v40   ;;  %v3206_v41 = vphi %v3786_v41, %v6583_v41   ;;  %v3202_v42 = vphi %v3784_v42, %v6582_v42   ;;  %v3198_v43 = vphi %v3782_v43, %v6581_v43   ;;  %v3194_v44 = vphi %v3780_v44, %v6580_v44   ;;  %v3190_v45 = vphi %v3778_v45, %v6579_v45   ;;  %v3186_v46 = vphi %v3776_v46, %v6578_v46   ;;  %v3182_v47 = vphi %v3774_v47, %v6577_v47   ;;  %v3178_v48 = vphi %v3772_v48, %v6576_v48   ;;  %v3174_v49 = vphi %v3770_v49, %v6575_v49   ;;  %v3170_v50 = vphi %v3768_v50, %v6574_v50   ;;  %v3166_v51 = vphi %v3766_v51, %v6573_v51   ;;  %v3162_v52 = vphi %v3764_v52, %v6572_v52   ;;  %v3158_v53 = vphi %v3762_v53, %v6571_v53   ;;  %v3154_v54 = vphi %v3760_v54, %v6570_v54   ;;  %v3150_v62 = vphi %v3758_v62, %v6569_v62   ;;  %v3146_v55 = vphi %v3756_v55, %v6568_v55   ;;  %v3142_v56 = vphi %v3754_v56, %v6567_v56  }
  0x64   : > { %v6019_v13 = vld [vmem:[#allocation14_spill] sm:$0xff]  ;;  %v6020_v12 = vld [vmem:[#allocation13_spill] sm:$0xff]  ;;  %v6021_v11 = vld [vmem:[#allocation12_spill] sm:$0xff]  ;;  %6025 = vst [vmem:[#allocation100_spill] sm:$0xff] %v3114_v60  ;;  %v168_v1 = vadd.f32 %v3178_v48, %v6016_v16  ;;  %p148_p0 = scmp.lt.s32.totalorder %s2230_s28, 24  ;;  %s6591_s1 = smov %s2230_s28 }
  0x65   : > { %v6022_v10 = vld [vmem:[#allocation11_spill] sm:$0xff]  ;;  %v6023_v9 = vld [vmem:[#allocation10_spill] sm:$0xff]  ;;  %6026 = vst [vmem:[#allocation101_spill] sm:$0xff] %v3118_v0  ;;  %v6044_v32 = vld [vmem:[#allocation33_spill] sm:$0xff]  ;;  %s573_s30 = sadd.f32 2.0, %s3975_s29 }
  0x66   : > { %6027 = vst [vmem:[#allocation102_spill] sm:$0xff] %v3122_v59  ;;  %v6042_v17 = vld [vmem:[#allocation18_spill] sm:$0xff]  ;;  %v6045_v31 = vld [vmem:[#allocation32_spill] sm:$0xff]  ;;  %v6046_v30 = vld [vmem:[#allocation31_spill] sm:$0xff]  ;;  %s1074_s5 = sadd.f32 3.0, %s3975_s29 }
  0x67   : > { %6028 = vst [vmem:[#allocation103_spill] sm:$0xff] %v3126_v58  ;;  %v6043_v33 = vld [vmem:[#allocation34_spill] sm:$0xff]  ;;  %v6048_v28 = vld [vmem:[#allocation29_spill] sm:$0xff]  ;;  %v6049_v27 = vld [vmem:[#allocation28_spill] sm:$0xff]  ;;  %s1575_s8 = sadd.f32 4.0, %s3975_s29 }
  0x68   : > { %6029 = vst [vmem:[#allocation104_spill] sm:$0xff] %v3130_v7  ;;  %v185_v18 = vadd.f32 %v3110_v63, %v6043_v33  ;;  %v166_v33 = vadd.f32 %v3186_v46, %v6018_v14  ;;  %v182_v63 = vadd.f32 %v3122_v59, %v6046_v30  ;;  %v6047_v29 = vld [vmem:[#allocation30_spill] sm:$0xff]  ;;  %v6050_v26 = vld [vmem:[#allocation27_spill] sm:$0xff]  ;;  %v6052_v8 = vld [vmem:[#allocation9_spill] sm:$0xff]  ;;  %s2076_s11 = sadd.f32 5.0, %s3975_s29 }
  0x69   : > { %6030 = vst [vmem:[#allocation105_spill] sm:$0xff] %v3134_v57  ;;  %v6051_v25 = vld [vmem:[#allocation26_spill] sm:$0xff]  ;;  %v6053_v24 = vld [vmem:[#allocation25_spill] sm:$0xff]  ;;  %v6054_v6 = vld [vmem:[#allocation7_spill] sm:$0xff] }
  0x6a   : > { %6031 = vst [vmem:[#allocation106_spill] sm:$0xff] %v3138_v61  ;;  %v217_v2 = vmul.f32 0.5, %v185_v18  ;;  %v6055_v23 = vld [vmem:[#allocation24_spill] sm:$0xff]  ;;  %v6056_v5 = vld [vmem:[#allocation6_spill] sm:$0xff]  ;;  %v6057_v22 = vld [vmem:[#allocation23_spill] sm:$0xff] }
  0x6b   : > { %6032 = vst [vmem:[#allocation107_spill] sm:$0xff] %v3142_v56  ;;  %v6058_v4 = vld [vmem:[#allocation5_spill] sm:$0xff]  ;;  %v6059_v21 = vld [vmem:[#allocation22_spill] sm:$0xff]  ;;  %v6060_v3 = vld [vmem:[#allocation4_spill] sm:$0xff] }
  0x6c   : > { %6033 = vst [vmem:[#allocation108_spill] sm:$0xff] %v3146_v55  ;;  %v6061_v20 = vld [vmem:[#allocation21_spill] sm:$0xff] }
  0x6d   : > { %6034 = vst [vmem:[#allocation109_spill] sm:$0xff] %v3150_v62 }
  0x6e   : > { %6035 = vst [vmem:[#allocation110_spill] sm:$0xff] %v3154_v54 }
  0x6f   : > { %6036 = vst [vmem:[#allocation111_spill] sm:$0xff] %v3158_v53 }
  0x70   : > { %6037 = vst [vmem:[#allocation112_spill] sm:$0xff] %v3162_v52 }
  0x71   : > { %6038 = vst [vmem:[#allocation113_spill] sm:$0xff] %v3166_v51  ;;  %v184_v51 = vadd.f32 %v3114_v60, %v6044_v32 }
  0x72   : > { %6039 = vst [vmem:[#allocation114_spill] sm:$0xff] %v3170_v50  ;;  %v169_v50 = vadd.f32 %v3174_v49, %v6042_v17  ;;  %v183_v17 = vadd.f32 %v3118_v0, %v6045_v31  ;;  %v181_v31 = vadd.f32 %v3126_v58, %v6047_v29  ;;  %v6123_v0 = vld [vmem:[#allocation87_spill] sm:$0xff] }
  0x73   : > { %6040 = vst [vmem:[#allocation115_spill] sm:$0xff] %v3230_v35  ;;  %v200_v35 = vmul.f32 0.5, %v168_v1  ;;  %v216_v52 = vmul.f32 0.5, %v184_v51  ;;  %v198_v1 = vmul.f32 0.5, %v166_v33  ;;  %v214_v51 = vmul.f32 0.5, %v182_v63 }
  0x74   : > { %6041 = vst [vmem:[#allocation116_spill] sm:$0xff] %v3234_v34  ;;  %v201_v19 = vmul.f32 0.5, %v169_v50  ;;  %v167_v34 = vadd.f32 %v3182_v47, %v6017_v15  ;;  %v215_v18 = vmul.f32 0.5, %v183_v17  ;;  %v213_v60 = vmul.f32 0.5, %v181_v31 }
  0x75   : > { %v163_v31 = vadd.f32 %v3198_v43, %v6021_v11 }
  0x76   : > { %2712 = vtanh.f32 %v201_v19  ;;  %v199_v50 = vmul.f32 0.5, %v167_v34  ;;  %v165_v19 = vadd.f32 %v3190_v45, %v6019_v13  ;;  %v164_v34 = vadd.f32 %v3194_v44, %v6020_v12 }
  0x77   : > { %2714 = vtanh.f32 %v217_v2 }
  0x78   : > { %2716 = vtanh.f32 %v200_v35  ;;  %v197_v2 = vmul.f32 0.5, %v165_v19  ;;  %v196_v63 = vmul.f32 0.5, %v164_v34  ;;  %v195_v34 = vmul.f32 0.5, %v163_v31 }
  0x79   : > { %2718 = vtanh.f32 %v216_v52 }
  0x7a   : > { %2720 = vtanh.f32 %v199_v50  ;;  %v180_v50 = vadd.f32 %v3130_v7, %v6048_v28 }
  0x7b   : > { %2722 = vtanh.f32 %v215_v18 }
  0x7c   : > { %v2713_v32 = vpop.eup %2712  ;;  %2724 = vtanh.f32 %v198_v1 }
  0x7d   : > { %v2715_v17 = vpop.eup %2714  ;;  %v265_v33 = vmul.f32 0.5, %v2713_v32  ;;  %2726 = vtanh.f32 %v214_v51  ;;  %v212_v32 = vmul.f32 0.5, %v180_v50 }
  0x7e   : > { %v2717_v35 = vpop.eup %2716  ;;  %v281_v52 = vmul.f32 0.5, %v2715_v17  ;;  %2728 = vtanh.f32 %v197_v2 }
  0x7f   : > { %v2719_v29 = vpop.eup %2718  ;;  %v297_v30 = vadd.f32 0.5, %v265_v33  ;;  %v264_v18 = vmul.f32 0.5, %v2717_v35  ;;  %2730 = vtanh.f32 %v213_v60 }
  0x80   : > { %v2721_v1 = vpop.eup %2720  ;;  %v313_v19 = vadd.f32 0.5, %v281_v52  ;;  %v280_v58 = vmul.f32 0.5, %v2719_v29  ;;  %2732 = vtanh.f32 %v196_v63  ;;  %v179_v29 = vadd.f32 %v3134_v57, %v6049_v27  ;;  %v6121_v57 = vld [vmem:[#allocation85_spill] sm:$0xff] }
  0x81   : > { %v2723_v51 = vpop.eup %2722  ;;  %314 = vmatpush.msra.mxu0 %v297_v30  ;;  %v296_v17 = vadd.f32 0.5, %v264_v18  ;;  %v263_v2 = vmul.f32 0.5, %v2721_v1  ;;  %2734 = vtanh.f32 %v212_v32 }
  0x82   : > { %v2725_v59 = vpop.eup %2724  ;;  %427 = vmatpush.msra.mxu1 %v313_v19  ;;  %v312_v28 = vadd.f32 0.5, %v280_v58  ;;  %v279_v7 = vmul.f32 0.5, %v2723_v51  ;;  %2736 = vtanh.f32 %v195_v34  ;;  %v211_v1 = vmul.f32 0.5, %v179_v29 }
  0x83   : > { %v2727_v33 = vpop.eup %2726  ;;  %315 = vmatpush.msra.mxu0 %v296_v17  ;;  %v295_v60 = vadd.f32 0.5, %v263_v2  ;;  %v262_v35 = vmul.f32 0.5, %v2725_v59  ;;  %v162_v59 = vadd.f32 %v3202_v42, %v6022_v10 }
  0x84   : > { %v2729_v52 = vpop.eup %2728  ;;  %428 = vmatpush.msra.mxu1 %v312_v28  ;;  %v311_v63 = vadd.f32 0.5, %v279_v7  ;;  %v278_v30 = vmul.f32 0.5, %v2727_v33  ;;  %2738 = vtanh.f32 %v211_v1  ;;  %v178_v7 = vadd.f32 %v3138_v61, %v6050_v26  ;;  %v6120_v61 = vld [vmem:[#allocation84_spill] sm:$0xff] }
  0x85   : > { %v2731_v50 = vpop.eup %2730  ;;  %316 = vmatpush.msra.mxu0 %v295_v60  ;;  %v294_v18 = vadd.f32 0.5, %v262_v35  ;;  %v261_v31 = vmul.f32 0.5, %v2729_v52  ;;  %v194_v34 = vmul.f32 0.5, %v162_v59  ;;  %v176_v59 = vadd.f32 %v3146_v55, %v6053_v24 }
  0x86   : > { %v2733_v58 = vpop.eup %2732  ;;  %429 = vmatpush.msra.mxu1 %v311_v63  ;;  %v310_v19 = vadd.f32 0.5, %v278_v30  ;;  %v277_v32 = vmul.f32 0.5, %v2731_v50  ;;  %v210_v29 = vmul.f32 0.5, %v178_v7  ;;  %v161_v63 = vadd.f32 %v3206_v41, %v6023_v9 }
  0x87   : > { %317 = vmatpush.msra.mxu0 %v294_v18  ;;  %v293_v51 = vadd.f32 0.5, %v261_v31  ;;  %v260_v17 = vmul.f32 0.5, %v2733_v58  ;;  %v2735_v28 = vpop.eup %2734  ;;  %2740 = vtanh.f32 %v194_v34  ;;  %v177_v50 = vadd.f32 %v3142_v56, %v6051_v25  ;;  %v6119_v56 = vld [vmem:[#allocation83_spill] sm:$0xff] }
  0x88   : > { %430 = vmatpush.msra.mxu1 %v310_v19  ;;  %v309_v2 = vadd.f32 0.5, %v277_v32  ;;  %v2737_v33 = vpop.eup %2736  ;;  %v276_v35 = vmul.f32 0.5, %v2735_v28  ;;  %2742 = vtanh.f32 %v210_v29  ;;  %v193_v31 = vmul.f32 0.5, %v161_v63 }
  0x89   : > { %318 = vmatpush.msra.mxu0 %v293_v51  ;;  %v292_v60 = vadd.f32 0.5, %v260_v17  ;;  %v259_v52 = vmul.f32 0.5, %v2737_v33  ;;  %v209_v58 = vmul.f32 0.5, %v177_v50  ;;  %v160_v19 = vadd.f32 %v3210_v40, %v6052_v8  ;;  %v6131_v8 = vld [vmem:[#allocation95_spill] sm:$0xff] }
  0x8a   : > { %431 = vmatpush.msra.mxu1 %v309_v2  ;;  %v308_v30 = vadd.f32 0.5, %v276_v35  ;;  %v2739_v1 = vpop.eup %2738  ;;  %2744 = vtanh.f32 %v193_v31  ;;  %v159_v17 = vadd.f32 %v3214_v39, %v6054_v6  ;;  %v208_v2 = vmul.f32 0.5, %v176_v59 }
  0x8b   : > { %319 = vmatpush.msra.mxu0 %v292_v60  ;;  %v291_v18 = vadd.f32 0.5, %v259_v52  ;;  %v275_v32 = vmul.f32 0.5, %v2739_v1  ;;  %2746 = vtanh.f32 %v209_v58  ;;  %v192_v51 = vmul.f32 0.5, %v160_v19 }
  0x8c   : > { %432 = vmatpush.msra.mxu1 %v308_v30  ;;  %v191_v60 = vmul.f32 0.5, %v159_v17  ;;  %v175_v35 = vadd.f32 %v3150_v62, %v6055_v23  ;;  %v158_v30 = vadd.f32 %v3218_v38, %v6056_v5  ;;  %v174_v19 = vadd.f32 %v3154_v54, %v6057_v22  ;;  %v6070_v22 = vld [vmem:[#allocation114_spill] sm:$0xff] }
  0x8d   : > { %320 = vmatpush.msra.mxu0 %v291_v18  ;;  %v2741_v7 = vpop.eup %2740  ;;  %v307_v28 = vadd.f32 0.5, %v275_v32  ;;  %2748 = vtanh.f32 %v192_v51 }
  0x8e   : > { %v2743_v34 = vpop.eup %2742  ;;  %v258_v33 = vmul.f32 0.5, %v2741_v7  ;;  %2750 = vtanh.f32 %v208_v2  ;;  %v207_v63 = vmul.f32 0.5, %v175_v35  ;;  %v190_v58 = vmul.f32 0.5, %v158_v30 }
  0x8f   : > { %433 = vmatpush.msra.mxu1 %v307_v28  ;;  %v274_v29 = vmul.f32 0.5, %v2743_v34  ;;  %2752 = vtanh.f32 %v191_v60  ;;  %v206_v17 = vmul.f32 0.5, %v174_v19  ;;  %v157_v7 = vadd.f32 %v3222_v37, %v6058_v4  ;;  %v6129_v4 = vld [vmem:[#allocation93_spill] sm:$0xff] }
  0x90   : > { %v290_v52 = vadd.f32 0.5, %v258_v33  ;;  %v2745_v50 = vpop.eup %2744  ;;  %2754 = vtanh.f32 %v207_v63  ;;  %v173_v33 = vadd.f32 %v3158_v53, %v6059_v21  ;;  %v6069_v21 = vld [vmem:[#allocation19_spill] sm:$0xff] }
  0x91   : > { %v306_v18 = vadd.f32 0.5, %v274_v29  ;;  %v2747_v31 = vpop.eup %2746  ;;  %v257_v1 = vmul.f32 0.5, %v2745_v50  ;;  %2756 = vtanh.f32 %v190_v58  ;;  %v189_v29 = vmul.f32 0.5, %v157_v7  ;;  %v6115_v53 = vld [vmem:[#allocation79_spill] sm:$0xff] }
  0x92   : > { %321 = vmatpush.msra.mxu0 %v290_v52  ;;  %v273_v32 = vmul.f32 0.5, %v2747_v31  ;;  %2758 = vtanh.f32 %v206_v17  ;;  %v156_v52 = vadd.f32 %v3226_v36, %v6060_v3  ;;  %v205_v50 = vmul.f32 0.5, %v173_v33  ;;  %v6064_v33 = vld [vmem:[#allocation115_spill] sm:$0xff] }
  0x93   : > { %434 = vmatpush.msra.mxu1 %v306_v18  ;;  %v2749_v59 = vpop.eup %2748  ;;  %v289_v51 = vadd.f32 0.5, %v257_v1  ;;  %2760 = vtanh.f32 %v189_v29  ;;  %v170_v23 = vadd.f32 %v6070_v22, %v6069_v21  ;;  %v6084_v22 = vld [vmem:[#allocation48_spill] sm:$0xff] }
  0x94   : > { %v2751_v28 = vpop.eup %2750  ;;  %v305_v2 = vadd.f32 0.5, %v273_v32  ;;  %v256_v34 = vmul.f32 0.5, %v2749_v59  ;;  %v188_v1 = vmul.f32 0.5, %v156_v52  ;;  %2762 = vtanh.f32 %v205_v50  ;;  %v6062_v32 = vld [vmem:[#allocation112_spill] sm:$0xff]  ;;  %v6065_v52 = vld [vmem:[#allocation20_spill] sm:$0xff] }
  0x95   : > { %v2753_v60 = vpop.eup %2752  ;;  %322 = vmatpush.msra.mxu0 %v289_v51  ;;  %v272_v35 = vmul.f32 0.5, %v2751_v28  ;;  %v172_v59 = vadd.f32 %v6062_v32, %v6061_v20  ;;  %v6067_v20 = vld [vmem:[#allocation2_spill] sm:$0xff] }
  0x96   : > { %435 = vmatpush.msra.mxu1 %v305_v2  ;;  %v288_v63 = vadd.f32 0.5, %v256_v34  ;;  %v255_v30 = vmul.f32 0.5, %v2753_v60  ;;  %v2755_v18 = vpop.eup %2754  ;;  %2764 = vtanh.f32 %v188_v1  ;;  %v6063_v34 = vld [vmem:[#allocation3_spill] sm:$0xff] }
  0x97   : > { %v304_v31 = vadd.f32 0.5, %v272_v35  ;;  %v271_v19 = vmul.f32 0.5, %v2755_v18  ;;  %v2757_v51 = vpop.eup %2756  ;;  %v204_v28 = vmul.f32 0.5, %v172_v59  ;;  %v155_v60 = vadd.f32 %v6064_v33, %v6063_v34  ;;  %v6124_v34 = vld [vmem:[#allocation88_spill] sm:$0xff] }
  0x98   : > { %323 = vmatpush.msra.mxu0 %v288_v63  ;;  %v287_v58 = vadd.f32 0.5, %v255_v30  ;;  %v254_v7 = vmul.f32 0.5, %v2757_v51  ;;  %v2759_v2 = vpop.eup %2758  ;;  %v6066_v63 = vld [vmem:[#allocation113_spill] sm:$0xff] }
  0x99   : > { %436 = vmatpush.msra.mxu1 %v304_v31  ;;  %v303_v17 = vadd.f32 0.5, %v271_v19  ;;  %v270_v29 = vmul.f32 0.5, %v2759_v2  ;;  %2766 = vtanh.f32 %v204_v28  ;;  %v171_v30 = vadd.f32 %v6066_v63, %v6065_v52  ;;  %v2761_v50 = vpop.eup %2760  ;;  %v6068_v31 = vld [vmem:[#allocation116_spill] sm:$0xff]  ;;  %v6088_v63 = vld [vmem:[#allocation52_spill] sm:$0xff] }
  0x9a   : > { %324 = vmatpush.msra.mxu0 %v287_v58  ;;  %v286_v35 = vadd.f32 0.5, %v254_v7  ;;  %v187_v18 = vmul.f32 0.5, %v155_v60  ;;  %v154_v1 = vadd.f32 %v6068_v31, %v6067_v20  ;;  %v2763_v58 = vpop.eup %2762  ;;  %v253_v59 = vmul.f32 0.5, %v2761_v50  ;;  %v6130_v20 = vld [vmem:[#allocation94_spill] sm:$0xff] }
  0x9b   : > { %437 = vmatpush.msra.mxu1 %v303_v17  ;;  %v302_v19 = vadd.f32 0.5, %v270_v29  ;;  %v203_v51 = vmul.f32 0.5, %v171_v30  ;;  %v269_v7 = vmul.f32 0.5, %v2763_v58  ;;  %v202_v60 = vmul.f32 0.5, %v170_v23 }
  0x9c   : > { %325 = vmatpush.msra.mxu0 %v286_v35  ;;  %v2765_v17 = vpop.eup %2764  ;;  %2768 = vtanh.f32 %v187_v18  ;;  %v186_v28 = vmul.f32 0.5, %v154_v1  ;;  %v285_v2 = vadd.f32 0.5, %v253_v59 }
  0x9d   : > { %438 = vmatpush.msra.mxu1 %v302_v19  ;;  %v252_v52 = vmul.f32 0.5, %v2765_v17  ;;  %2770 = vtanh.f32 %v203_v51  ;;  %v301_v24 = vadd.f32 0.5, %v269_v7 }
  0x9e   : > { %2772 = vtanh.f32 %v186_v28  ;;  %326 = vmatpush.msra.mxu0 %v285_v2  ;;  %v6073_v28 = vld [vmem:[#allocation37_spill] sm:$0xff]  ;;  %v6074_v2 = vld [vmem:[#allocation38_spill] sm:$0xff] }
  0x9f   : > { %v2767_v25 = vpop.eup %2766  ;;  %v284_v35 = vadd.f32 0.5, %v252_v52  ;;  %2774 = vtanh.f32 %v202_v60  ;;  %439 = vmatpush.msra.mxu1 %v301_v24  ;;  %v6071_v24 = vld [vmem:[#allocation35_spill] sm:$0xff]  ;;  %v6076_v60 = vld [vmem:[#allocation40_spill] sm:$0xff] }
  0xa0   : > { %v268_v29 = vmul.f32 0.5, %v2767_v25  ;;  %v6072_v25 = vld [vmem:[#allocation36_spill] sm:$0xff] }
  0xa1   : > { %327 = vmatpush.msra.mxu0 %v284_v35  ;;  %v6077_v35 = vld [vmem:[#allocation41_spill] sm:$0xff] }
  0xa2   : > { %v2769_v30 = vpop.eup %2768  ;;  %v300_v50 = vadd.f32 0.5, %v268_v29  ;;  %v6110_v29 = vld [vmem:[#allocation74_spill] sm:$0xff] }
  0xa3   : > { %v2771_v21 = vpop.eup %2770  ;;  %v251_v58 = vmul.f32 0.5, %v2769_v30 }
  0xa4   : > { %v2773_v18 = vpop.eup %2772  ;;  %440 = vmatpush.msra.mxu1 %v300_v50  ;;  %v267_v1 = vmul.f32 0.5, %v2771_v21  ;;  %v6075_v21 = vld [vmem:[#allocation39_spill] sm:$0xff]  ;;  %v6078_v50 = vld [vmem:[#allocation42_spill] sm:$0xff] }
  0xa5   : > { %v2775_v19 = vpop.eup %2774  ;;  %v283_v59 = vadd.f32 0.5, %v251_v58  ;;  %v250_v23 = vmul.f32 0.5, %v2773_v18  ;;  %v574_v58 = vstv %s573_s30 }
  0xa6   : > { %v299_v51 = vadd.f32 0.5, %v267_v1  ;;  %v266_v17 = vmul.f32 0.5, %v2775_v19  ;;  %2776 = vrcp.f32 %v574_v58  ;;  %v6079_v1 = vld [vmem:[#allocation43_spill] sm:$0xff]  ;;  %v6080_v19 = vld [vmem:[#allocation44_spill] sm:$0xff]  ;;  %vm580_vm1 = vweird.f32 %v574_v58 }
  0xa7   : > { %328 = vmatpush.msra.mxu0 %v283_v59  ;;  %v282_v7 = vadd.f32 0.5, %v250_v23 }
  0xa8   : > { %441 = vmatpush.msra.mxu1 %v299_v51  ;;  %v298_v52 = vadd.f32 0.5, %v266_v17  ;;  %v6081_v17 = vld [vmem:[#allocation45_spill] sm:$0xff] }
  0xa9   : > { %329 = vmatpush.msra.mxu0 %v282_v7 }
  0xaa   : > { %442 = vmatpush.msra.mxu1 %v298_v52  ;;  %330 = vmatmul.f32.vlgmr.msra.gmra.mxu0 %v6071_v24  ;;  %v6082_v52 = vld [vmem:[#allocation46_spill] sm:$0xff]  ;;  %v6128_v24 = vld [vmem:[#allocation92_spill] sm:$0xff] }
  0xab   : > { %443 = vmatmul.f32.vlgmr.msra.gmra.mxu1 %v6072_v25 }
  0xac   : > { %v2777_v59 = vpop.eup %2776 }
  0xad   : > { %v576_v23 = vmul.f32 %v2777_v59, %v574_v58  ;;  %vm581_vm2 = vweird.f32 %v2777_v59 }
  0xae   : > { %vm582_vm3 = vmor %vm580_vm1, %vm581_vm2 }
  0xaf   : > { %v577_v51 = vsub.f32 1.0, %v576_v23  ;;  %v6085_v23 = vld [vmem:[#allocation49_spill] sm:$0xff] }
  0xb1   : > { %v578_v7 = vmul.f32 %v2777_v59, %v577_v51  ;;  %v6086_v51 = vld [vmem:[#allocation50_spill] sm:$0xff] }
  0xb2   : > { %333 = vmatmul.f32.gmra.mxu0 %v6073_v28  ;;  %v6127_v28 = vld [vmem:[#allocation91_spill] sm:$0xff] }
  0xb3   : > { %446 = vmatmul.f32.gmra.mxu1 %v6074_v2  ;;  %v579_v18 = vadd.f32 %v2777_v59, %v578_v7  ;;  %v6090_v7 = vld [vmem:[#allocation54_spill] sm:$0xff] }
  0xb5   : > { %v583_v2 = vsel %vm582_vm3, %v2777_v59, %v579_v18  ;;  %v6094_v18 = vld [vmem:[#allocation58_spill] sm:$0xff]  ;;  %v6095_v59 = vld [vmem:[#allocation59_spill] sm:$0xff] }
  0xba   : > { %336 = vmatmul.f32.gmra.mxu0 %v6075_v21  ;;  %v6126_v21 = vld [vmem:[#allocation90_spill] sm:$0xff] }
  0xbb   : > { %449 = vmatmul.f32.gmra.mxu1 %v6076_v60  ;;  %v584_v60 = vand.u32 2147483647, %v574_v58 }
  0xbd   : > { %vm585_vm4 = vcmp.eq.f32.partialorder %v584_v60, 8.507059e+37  ;;  %v6091_v60 = vld [vmem:[#allocation55_spill] sm:$0xff] }
  0xc2   : > { %339 = vmatmul.f32.gmra.mxu0 %v6077_v35  ;;  %v586_v35 = vand.u32 2147483648, %v574_v58  ;;  %v6089_v58 = vld [vmem:[#allocation53_spill] sm:$0xff] }
  0xc3   : > { %452 = vmatmul.f32.gmra.mxu1 %v6078_v50 }
  0xc4   : > { %v587_v50 = vor.u32 1.1754944e-38, %v586_v35  ;;  %v6096_v35 = vld [vmem:[#allocation60_spill] sm:$0xff] }
  0xc6   : > { %v588_v25 = vsel %vm585_vm4, %v587_v50, %v583_v2  ;;  %v6092_v2 = vld [vmem:[#allocation56_spill] sm:$0xff]  ;;  %v6097_v50 = vld [vmem:[#allocation61_spill] sm:$0xff] }
  0xc7   : > { %2438 = vpush %v588_v25  ;;  %v6093_v25 = vld [vmem:[#allocation57_spill] sm:$0xff] }
  0xca   : > { %342 = vmatmul.f32.gmra.mxu0 %v6079_v1  ;;  %v6108_v1 = vld [vmem:[#allocation72_spill] sm:$0xff] }
  0xcb   : > { %455 = vmatmul.f32.gmra.mxu1 %v6080_v19  ;;  %v6083_v19 = vld [vmem:[#allocation47_spill] sm:$0xff] }
  0xd2   : > { %345 = vmatmul.f32.gmra.mxu0 %v6081_v17  ;;  %v6117_v17 = vld [vmem:[#allocation81_spill] sm:$0xff] }
  0xd3   : > { %458 = vmatmul.f32.gmra.mxu1 %v6082_v52  ;;  %v6087_v52 = vld [vmem:[#allocation51_spill] sm:$0xff] }
  0xda   : > { %348 = vmatmul.f32.gmra.mxu0 %v6083_v19  ;;  %v6122_v19 = vld [vmem:[#allocation86_spill] sm:$0xff] }
  0xdb   : > { %461 = vmatmul.f32.gmra.mxu1 %v6084_v22  ;;  %v6112_v22 = vld [vmem:[#allocation76_spill] sm:$0xff] }
  0xe2   : > { %351 = vmatmul.f32.gmra.mxu0 %v6085_v23 }
  0xe3   : > { %464 = vmatmul.f32.gmra.mxu1 %v6086_v51  ;;  %v6098_v51 = vld [vmem:[#allocation62_spill] sm:$0xff] }
  0xea   : > { %354 = vmatmul.f32.gmra.mxu0 %v6087_v52  ;;  %v6100_v52 = vld [vmem:[#allocation64_spill] sm:$0xff] }
  0xeb   : > { %467 = vmatmul.f32.gmra.mxu1 %v6088_v63  ;;  %v6099_v63 = vld [vmem:[#allocation63_spill] sm:$0xff] }
  0xf2   : > { %357 = vmatmul.f32.gmra.mxu0 %v6089_v58  ;;  %v6101_v58 = vld [vmem:[#allocation65_spill] sm:$0xff] }
  0xf3   : > { %470 = vmatmul.f32.gmra.mxu1 %v6090_v7  ;;  %v6102_v7 = vld [vmem:[#allocation66_spill] sm:$0xff] }
  0xf8   : > { %s2439_s3 = spop %2438 }
  0xf9   : > { %s590_s4 = smul.f32 2.0, %s2439_s3 }
  0xfa   : > { %360 = vmatmul.f32.gmra.mxu0 %v6091_v60 }
  0xfb   : > { %473 = vmatmul.f32.gmra.mxu1 %v6092_v2 }
 0x102   : > { %363 = vmatmul.f32.gmra.mxu0 %v6093_v25  ;;  %v6114_v25 = vld [vmem:[#allocation78_spill] sm:$0xff] }
 0x103   : > { %476 = vmatmul.f32.gmra.mxu1 %v6094_v18  ;;  %v6103_v18 = vld [vmem:[#allocation67_spill] sm:$0xff] }
 0x10a   : > { %366 = vmatmul.f32.gmra.mxu0 %v6095_v59  ;;  %v6104_v59 = vld [vmem:[#allocation68_spill] sm:$0xff] }
 0x10b   : > { %479 = vmatmul.f32.gmra.mxu1 %v6096_v35 }
 0x112   : > { %369 = vmatmul.f32.gmra.mxu0 %v6097_v50 }
 0x113   : > { %482 = vmatmul.f32.gmra.mxu1 %v6098_v51  ;;  %v6105_v51 = vld [vmem:[#allocation69_spill] sm:$0xff] }
 0x11a   : > { %372 = vmatmul.f32.gmra.mxu0 %v6099_v63  ;;  %v6106_v63 = vld [vmem:[#allocation70_spill] sm:$0xff] }
 0x11b   : > { %485 = vmatmul.f32.gmra.mxu1 %v6100_v52 }
 0x122   : > { %375 = vmatmul.f32.gmra.mxu0 %v6101_v58 }
 0x123   : > { %488 = vmatmul.f32.gmra.mxu1 %v6102_v7  ;;  %v6107_v7 = vld [vmem:[#allocation71_spill] sm:$0xff] }
 0x127   : > { %v4004_v60 = vpop.f32.mrf.mxu0 }
 0x128   : > { %v4006_v2 = vpop.f32.mrf.mxu1 }
 0x12a   : > { %378 = vmatmul.f32.gmra.mxu0 %v6103_v18 }
 0x12b   : > { %491 = vmatmul.f32.gmra.mxu1 %v6104_v59  ;;  %v6109_v59 = vld [vmem:[#allocation73_spill] sm:$0xff] }
 0x12f   : > { %v4010_v35 = vpop.f32.mrf.mxu0 }
 0x130   : > { %v4012_v50 = vpop.f32.mrf.mxu1 }
 0x132   : > { %381 = vmatmul.f32.gmra.mxu0 %v6105_v51 }
 0x133   : > { %494 = vmatmul.f32.gmra.mxu1 %v6106_v63  ;;  %v6111_v63 = vld [vmem:[#allocation75_spill] sm:$0xff] }
 0x137   : > { %v4016_v52 = vpop.f32.mrf.mxu0 }
 0x138   : > { %v4018_v58 = vpop.f32.mrf.mxu1 }
 0x13a   : > { %384 = vmatmul.f32.gmra.mxu0 %v6107_v7 }
 0x13b   : > { %497 = vmatmul.f32.gmra.mxu1 %v6108_v1  ;;  %v6113_v1 = vld [vmem:[#allocation77_spill] sm:$0xff] }
 0x13f   : > { %v4022_v27 = vpop.f32.mrf.mxu0 }
 0x140   : > { %v4024_v26 = vpop.f32.mrf.mxu1 }
 0x142   : > { %387 = vmatmul.f32.gmra.mxu0 %v6109_v59 }
 0x143   : > { %500 = vmatmul.f32.gmra.mxu1 %v6110_v29  ;;  %v6116_v29 = vld [vmem:[#allocation80_spill] sm:$0xff] }
 0x147   : > { %v4028_v32 = vpop.f32.mrf.mxu0 }
 0x148   : > { %v4030_v51 = vpop.f32.mrf.mxu1 }
 0x14a   : > { %390 = vmatmul.f32.gmra.mxu0 %v6111_v63  ;;  %v6118_v63 = vld [vmem:[#allocation82_spill] sm:$0xff] }
 0x14b   : > { %503 = vmatmul.f32.gmra.mxu1 %v6112_v22 }
 0x14f   : > { %v4034_v23 = vpop.f32.mrf.mxu0 }
 0x150   : > { %v4036_v7 = vpop.f32.mrf.mxu1 }
 0x152   : > { %393 = vmatmul.f32.gmra.mxu0 %v6113_v1 }
 0x153   : > { %506 = vmatmul.f32.gmra.mxu1 %v6114_v25 }
 0x157   : > { %v349_v18 = vpop.f32.mrf.mxu0 }
 0x158   : > { %v462_v59 = vpop.f32.mrf.mxu1 }
 0x15a   : > { %396 = vmatmul.f32.gmra.mxu0 %v6115_v53 }
 0x15b   : > { %509 = vmatmul.f32.gmra.mxu1 %v6116_v29 }
 0x15f   : > { %v352_v54 = vpop.f32.mrf.mxu0 }
 0x160   : > { %v465_v62 = vpop.f32.mrf.mxu1 }
 0x162   : > { %399 = vmatmul.f32.gmra.mxu0 %v6117_v17  ;;  %v6125_v17 = vld [vmem:[#allocation89_spill] sm:$0xff] }
 0x163   : > { %512 = vmatmul.f32.gmra.mxu1 %v6118_v63 }
 0x167   : > { %v355_v22 = vpop.f32.mrf.mxu0 }
 0x168   : > { %v468_v55 = vpop.f32.mrf.mxu1 }
 0x16a   : > { %402 = vmatmul.f32.gmra.mxu0 %v6119_v56 }
 0x16b   : > { %515 = vmatmul.f32.gmra.mxu1 %v6120_v61 }
 0x16f   : > { %v358_v1 = vpop.f32.mrf.mxu0 }
 0x170   : > { %v471_v25 = vpop.f32.mrf.mxu1 }
 0x172   : > { %405 = vmatmul.f32.gmra.mxu0 %v6121_v57 }
 0x173   : > { %518 = vmatmul.f32.gmra.mxu1 %v6122_v19 }
 0x177   : > { %v361_v53 = vpop.f32.mrf.mxu0 }
 0x178   : > { %v474_v29 = vpop.f32.mrf.mxu1 }
 0x17a   : > { %408 = vmatmul.f32.gmra.mxu0 %v6123_v0 }
 0x17b   : > { %521 = vmatmul.f32.gmra.mxu1 %v6124_v34 }
 0x17f   : > { %v364_v30 = vpop.f32.mrf.mxu0 }
 0x180   : > { %v477_v63 = vpop.f32.mrf.mxu1 }
 0x181   : > { %v478_v5 = vadd.f32 %v477_v63, %v364_v30  ;;  %v469_v30 = vadd.f32 %v468_v55, %v355_v22  ;;  %v6133_v55 = vld [vmem:[#allocation97_spill] sm:$0xff] }
 0x182   : > { %411 = vmatmul.f32.gmra.mxu0 %v6125_v17 }
 0x183   : > { %524 = vmatmul.f32.gmra.mxu1 %v6126_v21  ;;  %v548_v22 = vsub.f32 %v469_v30, %v3202_v42 }
 0x187   : > { %v367_v56 = vpop.f32.mrf.mxu0 }
 0x188   : > { %v480_v61 = vpop.f32.mrf.mxu1 }
 0x189   : > { %v481_v34 = vadd.f32 %v480_v61, %v367_v56  ;;  %v472_v56 = vadd.f32 %v471_v25, %v358_v1  ;;  %v551_v61 = vsub.f32 %v478_v5, %v3190_v45  ;;  %v6135_v25 = vld [vmem:[#allocation98_spill] sm:$0xff] }
 0x18a   : > { %414 = vmatmul.f32.gmra.mxu0 %v6127_v28  ;;  %v4058_v28 = vstv %s590_s4 }
 0x18b   : > { %527 = vmatmul.f32.gmra.mxu1 %v6128_v24  ;;  %v475_v24 = vadd.f32 %v474_v29, %v361_v53  ;;  %v552_v31 = vsub.f32 %v481_v34, %v3186_v46  ;;  %v549_v1 = vsub.f32 %v472_v56, %v3198_v43  ;;  %v603_v5 = vmul.f32 %v4058_v28, %v551_v61 }
 0x18c   : > { %v457_v56 = vadd.f32 %v4030_v51, %v4028_v32 }
 0x18d   : > { %v601_v34 = vmul.f32 %v4058_v28, %v549_v1 }
 0x18f   : > { %v370_v57 = vpop.f32.mrf.mxu0 }
 0x190   : > { %v483_v19 = vpop.f32.mrf.mxu1 }
 0x191   : > { %v484_v0 = vadd.f32 %v483_v19, %v370_v57 }
 0x192   : > { %417 = vmatmul.f32.gmra.mxu0 %v6129_v4 }
 0x193   : > { %530 = vmatmul.f32.gmra.mxu1 %v6130_v20  ;;  %v553_v17 = vsub.f32 %v484_v0, %v3182_v47  ;;  %v6132_v20 = vld [vmem:[#allocation96_spill] sm:$0xff]  ;;  %v466_v0 = vadd.f32 %v465_v62, %v352_v54  ;;  %v460_v62 = vadd.f32 %v4036_v7, %v4034_v23 }
 0x195   : > { %v605_v19 = vmul.f32 %v4058_v28, %v553_v17  ;;  %v545_v32 = vsub.f32 %v460_v62, %v3214_v39 }
 0x197   : > { %v373_v3 = vpop.f32.mrf.mxu0 }
 0x198   : > { %v486_v21 = vpop.f32.mrf.mxu1 }
 0x199   : > { %v487_v6 = vadd.f32 %v486_v21, %v373_v3  ;;  %v550_v3 = vsub.f32 %v475_v24, %v3194_v44  ;;  %v604_v21 = vmul.f32 %v4058_v28, %v552_v31  ;;  %v6134_v24 = vmov %v6133_v55 }
 0x19a   : > { %420 = vmatmul.f32.gmra.mxu0 %v6131_v8 }
 0x19b   : > { %v554_v4 = vsub.f32 %v487_v6, %v3178_v48  ;;  %533 = vmatmul.f32.gmra.mxu1 %v6132_v20  ;;  %v4072_v6 = vadd.f32 %v3182_v47, %v605_v19  ;;  %v602_v31 = vmul.f32 %v4058_v28, %v550_v3 }
 0x19d   : > { %v606_v57 = vmul.f32 %v4058_v28, %v554_v4  ;;  %v463_v4 = vadd.f32 %v462_v59, %v349_v18  ;;  %v669_v18 = vadd.f32 %v4072_v6, %v6017_v15  ;;  %v547_v59 = vsub.f32 %v466_v0, %v3206_v41  ;;  %v6136_v0 = vld [vmem:[#allocation18_spill] sm:$0xff] }
 0x19e   : > { %v4101_v23 = vadd.f32 %v3194_v44, %v602_v31 }
 0x19f   : > { %v4069_v29 = vadd.f32 %v3178_v48, %v606_v57  ;;  %v376_v53 = vpop.f32.mrf.mxu0  ;;  %v4080_v48 = vadd.f32 %v3186_v46, %v604_v21  ;;  %v4093_v46 = vadd.f32 %v3190_v45, %v603_v5  ;;  %v546_v61 = vsub.f32 %v463_v4, %v3210_v40 }
 0x1a0   : > { %v489_v63 = vpop.f32.mrf.mxu1  ;;  %v600_v57 = vmul.f32 %v4058_v28, %v548_v22  ;;  %v454_v21 = vadd.f32 %v4024_v26, %v4022_v27  ;;  %v599_v44 = vmul.f32 %v4058_v28, %v547_v59  ;;  %v451_v5 = vadd.f32 %v4018_v58, %v4016_v52 }
 0x1a1   : > { %v490_v17 = vadd.f32 %v489_v63, %v376_v53  ;;  %v670_v54 = vadd.f32 %v4069_v29, %v6016_v16  ;;  %v668_v45 = vadd.f32 %v4080_v48, %v6018_v14  ;;  %v701_v53 = vmul.f32 0.5, %v669_v18 }
 0x1a2   : > { %423 = vmatmul.f32.gmra.mxu0 %v6133_v55  ;;  %v4117_v63 = vadd.f32 %v3198_v43, %v601_v34  ;;  %v667_v1 = vadd.f32 %v4093_v46, %v6019_v13  ;;  %v544_v26 = vsub.f32 %v457_v56, %v3218_v38  ;;  %v598_v27 = vmul.f32 %v4058_v28, %v546_v61 }
 0x1a3   : > { %v555_v47 = vsub.f32 %v490_v17, %v3174_v49  ;;  %536 = vmatmul.f32.gmra.mxu1 %v6135_v25  ;;  %v702_v3 = vmul.f32 0.5, %v670_v54  ;;  %v4128_v17 = vadd.f32 %v3202_v42, %v600_v57  ;;  %v700_v43 = vmul.f32 0.5, %v668_v45 }
 0x1a4   : > { %v666_v22 = vadd.f32 %v4101_v23, %v6020_v12  ;;  %v448_v55 = vadd.f32 %v4012_v50, %v4010_v35  ;;  %v543_v31 = vsub.f32 %v454_v21, %v3222_v37  ;;  %v597_v52 = vmul.f32 %v4058_v28, %v545_v32 }
 0x1a5   : > { %v607_v19 = vmul.f32 %v4058_v28, %v555_v47  ;;  %2778 = vtanh.f32 %v702_v3  ;;  %v4137_v58 = vadd.f32 %v3206_v41, %v599_v44  ;;  %v699_v42 = vmul.f32 0.5, %v667_v1  ;;  %v6138_v3 = vld [vmem:[#allocation116_spill] sm:$0xff] }
 0x1a6   : > { %2780 = vtanh.f32 %v701_v53  ;;  %v665_v47 = vadd.f32 %v4117_v63, %v6021_v11  ;;  %v445_v54 = vadd.f32 %v4006_v2, %v4004_v60  ;;  %v542_v62 = vsub.f32 %v451_v5, %v3226_v36 }
 0x1a7   : > { %v4103_v7 = vpop.f32.mrf.mxu0  ;;  %v4106_v30 = vadd.f32 %v3174_v49, %v607_v19  ;;  %v596_v35 = vmul.f32 %v4058_v28, %v544_v26  ;;  %v4146_v50 = vadd.f32 %v3210_v40, %v598_v27  ;;  %v698_v41 = vmul.f32 0.5, %v666_v22  ;;  %v6142_v22 = vld [vmem:[#allocation7_spill] sm:$0xff] }
 0x1a8   : > { %v4113_v51 = vpop.f32.mrf.mxu1  ;;  %v664_v59 = vadd.f32 %v4128_v17, %v6022_v10  ;;  %v541_v34 = vsub.f32 %v448_v55, %v6064_v33  ;;  %v595_v19 = vmul.f32 %v4058_v28, %v543_v31  ;;  %v4157_v60 = vadd.f32 %v3214_v39, %v597_v52  ;;  %v6159_v10 = vld [vmem:[#allocation51_spill] sm:$0xff] }
 0x1a9   : > { %v671_v49 = vadd.f32 %v4106_v30, %v6136_v0  ;;  %v697_v40 = vmul.f32 0.5, %v665_v47  ;;  %v663_v61 = vadd.f32 %v4137_v58, %v6023_v9  ;;  %v540_v45 = vsub.f32 %v445_v54, %v6138_v3  ;;  %v6160_v9 = vld [vmem:[#allocation101_spill] sm:$0xff] }
 0x1aa   : > { %6137 = vst [vmem:[#allocation115_spill] sm:$0xff] %v4157_v60  ;;  %v594_v21 = vmul.f32 %v4058_v28, %v542_v62  ;;  %v4164_v53 = vadd.f32 %v3218_v38, %v596_v35  ;;  %v696_v44 = vmul.f32 0.5, %v664_v59  ;;  %v593_v1 = vmul.f32 %v4058_v28, %v541_v34  ;;  %v6144_v35 = vld [vmem:[#allocation6_spill] sm:$0xff] }
 0x1ab   : > { %v703_v4 = vmul.f32 0.5, %v671_v49  ;;  %v2779_v2 = vpop.eup %2778  ;;  %v6140_v49 = vld [vmem:[#allocation9_spill] sm:$0xff]  ;;  %v661_v55 = vadd.f32 %v4157_v60, %v6142_v22  ;;  %v592_v38 = vmul.f32 %v4058_v28, %v540_v45  ;;  %v6157_v22 = vld [vmem:[#allocation47_spill] sm:$0xff] }
 0x1ac   : > { %v2781_v57 = vpop.eup %2780  ;;  %6139 = vst [vmem:[#allocation116_spill] sm:$0xff] %v4164_v53  ;;  %v662_v39 = vadd.f32 %v4146_v50, %v6140_v49  ;;  %v766_v26 = vmul.f32 0.5, %v2779_v2  ;;  %v4176_v47 = vadd.f32 %v3226_v36, %v594_v21  ;;  %v4185_v2 = vadd.f32 %v6064_v33, %v593_v1  ;;  %v6146_v36 = vld [vmem:[#allocation5_spill] sm:$0xff] }
 0x1ad   : > { %2782 = vtanh.f32 %v703_v4  ;;  %v4170_v4 = vadd.f32 %v3222_v37, %v595_v19  ;;  %v765_v52 = vmul.f32 0.5, %v2781_v57  ;;  %v660_v37 = vadd.f32 %v4164_v53, %v6144_v35  ;;  %v6162_v53 = vld [vmem:[#allocation100_spill] sm:$0xff] }
 0x1ae   : > { %2784 = vtanh.f32 %v700_v43  ;;  %v695_v43 = vmul.f32 0.5, %v663_v61  ;;  %6143 = vst [vmem:[#allocation118_spill] sm:$0xff] %v4176_v47  ;;  %v694_v62 = vmul.f32 0.5, %v662_v39  ;;  %v798_v59 = vadd.f32 0.5, %v766_v26  ;;  %v6148_v39 = vld [vmem:[#allocation4_spill] sm:$0xff] }
 0x1af   : > { %v4148_v18 = vpop.f32.mrf.mxu0  ;;  %2786 = vtanh.f32 %v699_v42  ;;  %6141 = vst [vmem:[#allocation117_spill] sm:$0xff] %v4170_v4  ;;  %v659_v61 = vadd.f32 %v4170_v4, %v6146_v36  ;;  %v797_v57 = vadd.f32 0.5, %v765_v52  ;;  %v6161_v4 = vld [vmem:[#allocation102_spill] sm:$0xff] }
 0x1b0   : > { %v4154_v56 = vpop.f32.mrf.mxu1  ;;  %2788 = vtanh.f32 %v698_v41  ;;  %6145 = vst [vmem:[#allocation119_spill] sm:$0xff] %v4185_v2 }
 0x1b1   : > { %2790 = vtanh.f32 %v697_v40  ;;  %v693_v40 = vmul.f32 0.5, %v661_v55 }
 0x1b2   : > { %2792 = vtanh.f32 %v696_v44  ;;  %v692_v44 = vmul.f32 0.5, %v660_v37 }
 0x1b3   : > { %v2783_v32 = vpop.eup %2782  ;;  %2794 = vtanh.f32 %v695_v43  ;;  %v6149_v43 = vld [vmem:[#allocation3_spill] sm:$0xff] }
 0x1b4   : > { %v767_v5 = vmul.f32 0.5, %v2783_v32  ;;  %v2785_v27 = vpop.eup %2784  ;;  %v4190_v32 = vadd.f32 %v6138_v3, %v592_v38  ;;  %2796 = vtanh.f32 %v694_v62  ;;  %v657_v55 = vadd.f32 %v4185_v2, %v6149_v43  ;;  %v6150_v62 = vld [vmem:[#allocation2_spill] sm:$0xff] }
 0x1b5   : > { %v2787_v42 = vpop.eup %2786  ;;  %v764_v34 = vmul.f32 0.5, %v2785_v27  ;;  %2798 = vtanh.f32 %v693_v40  ;;  %v691_v27 = vmul.f32 0.5, %v659_v61 }
 0x1b6   : > { %v799_v31 = vadd.f32 0.5, %v767_v5  ;;  %v2789_v19 = vpop.eup %2788  ;;  %v763_v45 = vmul.f32 0.5, %v2787_v42  ;;  %6147 = vst [vmem:[#allocation120_spill] sm:$0xff] %v4190_v32  ;;  %v658_v5 = vadd.f32 %v4176_v47, %v6148_v39  ;;  %2800 = vtanh.f32 %v692_v44 }
 0x1b7   : > { %v4178_v54 = vpop.f32.mrf.mxu0  ;;  %v2791_v21 = vpop.eup %2790  ;;  %v796_v33 = vadd.f32 0.5, %v764_v34  ;;  %v762_v1 = vmul.f32 0.5, %v2789_v19  ;;  %v656_v37 = vadd.f32 %v4190_v32, %v6150_v62  ;;  %2802 = vtanh.f32 %v691_v27  ;;  %v6158_v32 = vld [vmem:[#allocation49_spill] sm:$0xff] }
 0x1b8   : > { %v4182_v41 = vpop.f32.mrf.mxu1  ;;  %816 = vmatpush.msra.mxu2 %v799_v31  ;;  %v2793_v26 = vpop.eup %2792  ;;  %v795_v31 = vadd.f32 0.5, %v763_v45  ;;  %v761_v52 = vmul.f32 0.5, %v2791_v21  ;;  %v690_v38 = vmul.f32 0.5, %v658_v5  ;;  %v689_v61 = vmul.f32 0.5, %v657_v55 }
 0x1b9   : > { %v2795_v42 = vpop.eup %2794  ;;  %v794_v34 = vadd.f32 0.5, %v762_v1  ;;  %v760_v19 = vmul.f32 0.5, %v2793_v26 }
 0x1ba   : > { %817 = vmatpush.msra.mxu2 %v798_v59  ;;  %v2797_v40 = vpop.eup %2796  ;;  %v759_v45 = vmul.f32 0.5, %v2795_v42  ;;  %2804 = vtanh.f32 %v690_v38 }
 0x1bb   : > { %v2799_v21 = vpop.eup %2798  ;;  %v792_v44 = vadd.f32 0.5, %v760_v19  ;;  %v758_v5 = vmul.f32 0.5, %v2797_v40  ;;  %2806 = vtanh.f32 %v689_v61 }
 0x1bc   : > { %818 = vmatpush.msra.mxu2 %v797_v57  ;;  %v793_v57 = vadd.f32 0.5, %v761_v52  ;;  %v2801_v43 = vpop.eup %2800  ;;  %v791_v62 = vadd.f32 0.5, %v759_v45  ;;  %v757_v39 = vmul.f32 0.5, %v2799_v21 }
 0x1bd   : > { %v790_v27 = vadd.f32 0.5, %v758_v5  ;;  %v756_v55 = vmul.f32 0.5, %v2801_v43  ;;  %v6151_v5 = vld [vmem:[#allocation35_spill] sm:$0xff] }
 0x1be   : > { %819 = vmatpush.msra.mxu2 %v796_v33  ;;  %v688_v33 = vmul.f32 0.5, %v656_v37  ;;  %v789_v42 = vadd.f32 0.5, %v757_v39 }
 0x1bf   : > { %v4196_v3 = vpop.f32.mrf.mxu0 }
 0x1c0   : > { %v4200_v59 = vpop.f32.mrf.mxu1  ;;  %820 = vmatpush.msra.mxu2 %v795_v31  ;;  %v2803_v31 = vpop.eup %2802  ;;  %2808 = vtanh.f32 %v688_v33 }
 0x1c1   : > { %v2805_v52 = vpop.eup %2804  ;;  %v755_v38 = vmul.f32 0.5, %v2803_v31 }
 0x1c2   : > { %821 = vmatpush.msra.mxu2 %v794_v34  ;;  %v2807_v37 = vpop.eup %2806  ;;  %v788_v34 = vadd.f32 0.5, %v756_v55  ;;  %v754_v19 = vmul.f32 0.5, %v2805_v52  ;;  %v6152_v55 = vld [vmem:[#allocation37_spill] sm:$0xff] }
 0x1c3   : > { %v787_v61 = vadd.f32 0.5, %v755_v38  ;;  %v6153_v38 = vld [vmem:[#allocation39_spill] sm:$0xff] }
 0x1c4   : > { %822 = vmatpush.msra.mxu2 %v793_v57  ;;  %v753_v57 = vmul.f32 0.5, %v2807_v37 }
 0x1c6   : > { %823 = vmatpush.msra.mxu2 %v792_v44  ;;  %v2809_v40 = vpop.eup %2808  ;;  %v785_v43 = vadd.f32 0.5, %v753_v57  ;;  %v6155_v57 = vld [vmem:[#allocation43_spill] sm:$0xff] }
 0x1c7   : > { %v4202_v1 = vpop.f32.mrf.mxu0  ;;  %v752_v33 = vmul.f32 0.5, %v2809_v40 }
 0x1c8   : > { %v4204_v26 = vpop.f32.mrf.mxu1  ;;  %824 = vmatpush.msra.mxu2 %v791_v62  ;;  %v786_v62 = vadd.f32 0.5, %v754_v19  ;;  %v6154_v19 = vld [vmem:[#allocation41_spill] sm:$0xff] }
 0x1c9   : > { %v784_v39 = vadd.f32 0.5, %v752_v33 }
 0x1ca   : > { %825 = vmatpush.msra.mxu2 %v790_v27 }
 0x1cc   : > { %826 = vmatpush.msra.mxu2 %v789_v42 }
 0x1ce   : > { %827 = vmatpush.msra.mxu2 %v788_v34 }
 0x1cf   : > { %v4206_v45 = vpop.f32.mrf.mxu0 }
 0x1d0   : > { %v4208_v21 = vpop.f32.mrf.mxu1  ;;  %828 = vmatpush.msra.mxu2 %v787_v61 }
 0x1d2   : > { %829 = vmatpush.msra.mxu2 %v786_v62 }
 0x1d4   : > { %830 = vmatpush.msra.mxu2 %v785_v43  ;;  %v6156_v43 = vld [vmem:[#allocation45_spill] sm:$0xff] }
 0x1d6   : > { %831 = vmatpush.msra.mxu2 %v784_v39 }
 0x1d7   : > { %v397_v44 = vpop.f32.mrf.mxu0  ;;  %832 = vmatmul.f32.vlgmr.msra.gmra.mxu2 %v6151_v5 }
 0x1d8   : > { %v510_v31 = vpop.f32.mrf.mxu1 }
 0x1df   : > { %v400_v27 = vpop.f32.mrf.mxu0  ;;  %835 = vmatmul.f32.gmra.mxu2 %v6152_v55 }
 0x1e0   : > { %v513_v52 = vpop.f32.mrf.mxu1 }
 0x1e7   : > { %v403_v42 = vpop.f32.mrf.mxu0  ;;  %838 = vmatmul.f32.gmra.mxu2 %v6153_v38 }
 0x1e8   : > { %v516_v37 = vpop.f32.mrf.mxu1 }
 0x1ef   : > { %v406_v34 = vpop.f32.mrf.mxu0  ;;  %841 = vmatmul.f32.gmra.mxu2 %v6154_v19 }
 0x1f0   : > { %v519_v40 = vpop.f32.mrf.mxu1 }
 0x1f1   : > { %v520_v0 = vadd.f32 %v519_v40, %v406_v34  ;;  %v514_v34 = vadd.f32 %v513_v52, %v400_v27  ;;  %v6166_v40 = vld [vmem:[#allocation105_spill] sm:$0xff]  ;;  %v6171_v27 = vld [vmem:[#allocation107_spill] sm:$0xff] }
 0x1f7   : > { %v409_v61 = vpop.f32.mrf.mxu0  ;;  %844 = vmatmul.f32.gmra.mxu2 %v6155_v57 }
 0x1f8   : > { %v522_v62 = vpop.f32.mrf.mxu1 }
 0x1ff   : > { %v412_v33 = vpop.f32.mrf.mxu0  ;;  %847 = vmatmul.f32.gmra.mxu2 %v6156_v43  ;;  %v523_v43 = vadd.f32 %v522_v62, %v409_v61  ;;  %v6167_v61 = vld [vmem:[#allocation106_spill] sm:$0xff] }
 0x200   : > { %v525_v39 = vpop.f32.mrf.mxu1 }
 0x201   : > { %v526_v11 = vadd.f32 %v525_v39, %v412_v33  ;;  %v6168_v39 = vld [vmem:[#allocation99_spill] sm:$0xff] }
 0x207   : > { %v415_v5 = vpop.f32.mrf.mxu0  ;;  %850 = vmatmul.f32.gmra.mxu2 %v6157_v22 }
 0x208   : > { %v528_v55 = vpop.f32.mrf.mxu1 }
 0x209   : > { %v529_v49 = vadd.f32 %v528_v55, %v415_v5  ;;  %v517_v5 = vadd.f32 %v516_v37, %v403_v42  ;;  %v6164_v55 = vld [vmem:[#allocation104_spill] sm:$0xff]  ;;  %v511_v37 = vadd.f32 %v510_v31, %v397_v44  ;;  %v563_v44 = vsub.f32 %v514_v34, %v6171_v27  ;;  %v6174_v34 = vld [vmem:[#allocation55_spill] sm:$0xff] }
 0x20b   : > { %v568_v12 = vsub.f32 %v529_v49, %v6161_v4  ;;  %v564_v62 = vsub.f32 %v517_v5, %v6167_v61  ;;  %v6172_v5 = vld [vmem:[#allocation108_spill] sm:$0xff] }
 0x20f   : > { %v418_v36 = vpop.f32.mrf.mxu0  ;;  %853 = vmatmul.f32.gmra.mxu2 %v6158_v32  ;;  %v6163_v32 = vld [vmem:[#allocation103_spill] sm:$0xff] }
 0x210   : > { %v531_v38 = vpop.f32.mrf.mxu1  ;;  %v567_v60 = vsub.f32 %v526_v11, %v6163_v32  ;;  %v565_v11 = vsub.f32 %v520_v0, %v6166_v40  ;;  %v6170_v0 = vld [vmem:[#allocation32_spill] sm:$0xff] }
 0x211   : > { %v532_v35 = vadd.f32 %v531_v38, %v418_v36  ;;  %v566_v38 = vsub.f32 %v523_v43, %v6164_v55  ;;  %v6169_v43 = vld [vmem:[#allocation33_spill] sm:$0xff] }
 0x212   : > { %v617_v31 = vmul.f32 %v4058_v28, %v565_v11 }
 0x213   : > { %v569_v57 = vsub.f32 %v532_v35, %v6160_v9  ;;  %v620_v35 = vmul.f32 %v4058_v28, %v568_v12  ;;  %v618_v12 = vmul.f32 %v4058_v28, %v566_v38  ;;  %v562_v38 = vsub.f32 %v511_v37, %v6172_v5 }
 0x214   : > { %v615_v37 = vmul.f32 %v4058_v28, %v563_v44 }
 0x215   : > { %v621_v13 = vmul.f32 %v4058_v28, %v569_v57 }
 0x217   : > { %v421_v19 = vpop.f32.mrf.mxu0  ;;  %856 = vmatmul.f32.gmra.mxu2 %v6159_v10  ;;  %v4232_v49 = vadd.f32 %v6160_v9, %v621_v13  ;;  %v508_v13 = vadd.f32 %v4208_v21, %v4206_v45  ;;  %v4259_v45 = vadd.f32 %v6164_v55, %v618_v12  ;;  %v4272_v55 = vadd.f32 %v6166_v40, %v617_v31 }
 0x218   : > { %v534_v47 = vpop.f32.mrf.mxu1  ;;  %v496_v31 = vadd.f32 %v4154_v56, %v4148_v18 }
 0x219   : > { %v535_v2 = vadd.f32 %v534_v47, %v421_v19  ;;  %v6165_v19 = vld [vmem:[#allocation53_spill] sm:$0xff] }
 0x21b   : > { %v570_v22 = vsub.f32 %v535_v2, %v6162_v53 }
 0x21d   : > { %v622_v36 = vmul.f32 %v4058_v28, %v570_v22  ;;  %v619_v22 = vmul.f32 %v4058_v28, %v567_v60  ;;  %v685_v60 = vadd.f32 %v4232_v49, %v6170_v0 }
 0x21f   : > { %v4228_v33 = vadd.f32 %v6162_v53, %v622_v36  ;;  %v424_v47 = vpop.f32.mrf.mxu0  ;;  %859 = vmatmul.f32.gmra.mxu2 %v6165_v19  ;;  %v4239_v53 = vadd.f32 %v6161_v4, %v620_v35  ;;  %v4251_v52 = vadd.f32 %v6163_v32, %v619_v22  ;;  %v505_v36 = vadd.f32 %v4204_v26, %v4202_v1  ;;  %v6175_v1 = vld [vmem:[#allocation109_spill] sm:$0xff] }
 0x220   : > { %v537_v2 = vpop.f32.mrf.mxu1  ;;  %v616_v35 = vmul.f32 %v4058_v28, %v564_v62  ;;  %v502_v22 = vadd.f32 %v4200_v59, %v4196_v3  ;;  %v561_v26 = vsub.f32 %v508_v13, %v6175_v1  ;;  %v6176_v62 = vld [vmem:[#allocation34_spill] sm:$0xff]  ;;  %v614_v3 = vmul.f32 %v4058_v28, %v562_v38 }
 0x221   : > { %v538_v42 = vadd.f32 %v537_v2, %v424_v47  ;;  %v686_v9 = vadd.f32 %v4228_v33, %v6169_v43  ;;  %v6173_v2 = vld [vmem:[#allocation31_spill] sm:$0xff] }
 0x222   : > { %v684_v32 = vadd.f32 %v4239_v53, %v6173_v2  ;;  %v4283_v59 = vadd.f32 %v6167_v61, %v616_v35  ;;  %v493_v35 = vadd.f32 %v4113_v51, %v4103_v7  ;;  %v4301_v56 = vadd.f32 %v6172_v5, %v614_v3  ;;  %v6188_v3 = vld [vmem:[#allocation114_spill] sm:$0xff] }
 0x223   : > { %v571_v57 = vsub.f32 %v538_v42, %v6168_v39  ;;  %v718_v47 = vmul.f32 0.5, %v686_v9  ;;  %v717_v42 = vmul.f32 0.5, %v685_v60  ;;  %v499_v9 = vadd.f32 %v4182_v41, %v4178_v54  ;;  %v6179_v60 = vld [vmem:[#allocation29_spill] sm:$0xff] }
 0x224   : > { %v716_v40 = vmul.f32 0.5, %v684_v32  ;;  %v682_v44 = vadd.f32 %v4259_v45, %v6179_v60  ;;  %v613_v54 = vmul.f32 %v4058_v28, %v561_v26  ;;  %v4292_v41 = vadd.f32 %v6171_v27, %v615_v37  ;;  %v6183_v26 = vld [vmem:[#allocation27_spill] sm:$0xff] }
 0x225   : > { %v623_v4 = vmul.f32 %v4058_v28, %v571_v57  ;;  %2810 = vtanh.f32 %v718_v47  ;;  %v6182_v47 = vld [vmem:[#allocation112_spill] sm:$0xff]  ;;  %v680_v27 = vadd.f32 %v4283_v59, %v6183_v26  ;;  %v6185_v37 = vld [vmem:[#allocation113_spill] sm:$0xff] }
 0x226   : > { %2812 = vtanh.f32 %v717_v42  ;;  %v558_v32 = vsub.f32 %v499_v9, %v6182_v47  ;;  %v6184_v42 = vld [vmem:[#allocation57_spill] sm:$0xff]  ;;  %v4309_v7 = vadd.f32 %v6175_v1, %v613_v54  ;;  %v6187_v9 = vld [vmem:[#allocation26_spill] sm:$0xff] }
 0x227   : > { %v4262_v21 = vadd.f32 %v6168_v39, %v623_v4  ;;  %862 = vmatmul.f32.gmra.mxu2 %v6174_v34  ;;  %v6177_v39 = vld [vmem:[#allocation30_spill] sm:$0xff]  ;;  %v6178_v4 = vld [vmem:[#allocation110_spill] sm:$0xff]  ;;  %v679_v5 = vadd.f32 %v4292_v41, %v6187_v9 }
 0x228   : > { %v683_v57 = vadd.f32 %v4251_v52, %v6177_v39  ;;  %v560_v34 = vsub.f32 %v505_v36, %v6178_v4  ;;  %v6180_v39 = vld [vmem:[#allocation111_spill] sm:$0xff]  ;;  %v6181_v36 = vld [vmem:[#allocation28_spill] sm:$0xff]  ;;  %6186 = vst [vmem:[#allocation101_spill] sm:$0xff] %v4309_v7 }
 0x229   : > { %v687_v12 = vadd.f32 %v4262_v21, %v6176_v62  ;;  %v559_v62 = vsub.f32 %v502_v22, %v6180_v39  ;;  %v681_v38 = vadd.f32 %v4272_v55, %v6181_v36  ;;  %v714_v22 = vmul.f32 0.5, %v682_v44 }
 0x22a   : > { %v715_v61 = vmul.f32 0.5, %v683_v57  ;;  %v612_v18 = vmul.f32 %v4058_v28, %v560_v34  ;;  %v557_v57 = vsub.f32 %v496_v31, %v6185_v37  ;;  %v610_v44 = vmul.f32 %v4058_v28, %v558_v32  ;;  %v6190_v31 = vld [vmem:[#allocation25_spill] sm:$0xff]  ;;  %v6192_v32 = vld [vmem:[#allocation24_spill] sm:$0xff] }
 0x22b   : > { %v719_v13 = vmul.f32 0.5, %v687_v12  ;;  %v2811_v36 = vpop.eup %2810  ;;  %v713_v51 = vmul.f32 0.5, %v681_v38  ;;  %v678_v1 = vadd.f32 %v4301_v56, %v6190_v31  ;;  %v677_v60 = vadd.f32 %v4309_v7, %v6192_v32 }
 0x22c   : > { %v2813_v34 = vpop.eup %2812  ;;  %v609_v54 = vmul.f32 %v4058_v28, %v557_v57  ;;  %v782_v38 = vmul.f32 0.5, %v2811_v36  ;;  %v4328_v31 = vadd.f32 %v6182_v47, %v610_v44  ;;  %v6194_v36 = vld [vmem:[#allocation23_spill] sm:$0xff] }
 0x22d   : > { %2814 = vtanh.f32 %v719_v13  ;;  %v611_v13 = vmul.f32 %v4058_v28, %v559_v62  ;;  %v712_v62 = vmul.f32 0.5, %v680_v27 }
 0x22e   : > { %2816 = vtanh.f32 %v716_v40  ;;  %v556_v40 = vsub.f32 %v493_v35, %v6188_v3  ;;  %v711_v35 = vmul.f32 0.5, %v679_v5  ;;  %6193 = vst [vmem:[#allocation103_spill] sm:$0xff] %v4328_v31  ;;  %v4334_v32 = vadd.f32 %v6185_v37, %v609_v54 }
 0x22f   : > { %865 = vmatmul.f32.gmra.mxu2 %v6184_v42  ;;  %2818 = vtanh.f32 %v715_v61  ;;  %v4316_v42 = vadd.f32 %v6178_v4, %v612_v18  ;;  %v4322_v9 = vadd.f32 %v6180_v39, %v611_v13  ;;  %v6195_v39 = vld [vmem:[#allocation59_spill] sm:$0xff] }
 0x230   : > { %2820 = vtanh.f32 %v714_v22  ;;  %v608_v4 = vmul.f32 %v4058_v28, %v556_v40  ;;  %v781_v22 = vmul.f32 0.5, %v2813_v34  ;;  %6196 = vst [vmem:[#allocation104_spill] sm:$0xff] %v4334_v32  ;;  %v709_v28 = vmul.f32 0.5, %v677_v60  ;;  %v6197_v34 = vld [vmem:[#allocation22_spill] sm:$0xff] }
 0x231   : > { %6189 = vst [vmem:[#allocation102_spill] sm:$0xff] %v4316_v42  ;;  %2822 = vtanh.f32 %v713_v51  ;;  %v676_v57 = vadd.f32 %v4316_v42, %v6194_v36  ;;  %v814_v51 = vadd.f32 0.5, %v782_v38  ;;  %v675_v47 = vadd.f32 %v4322_v9, %v6197_v34  ;;  %v6199_v38 = vld [vmem:[#allocation21_spill] sm:$0xff] }
 0x232   : > { %6191 = vst [vmem:[#allocation100_spill] sm:$0xff] %v4322_v9  ;;  %2824 = vtanh.f32 %v712_v62  ;;  %v813_v40 = vadd.f32 0.5, %v781_v22 }
 0x233   : > { %v2815_v12 = vpop.eup %2814  ;;  %2826 = vtanh.f32 %v711_v35  ;;  %v707_v60 = vmul.f32 0.5, %v675_v47 }
 0x234   : > { %v783_v61 = vmul.f32 0.5, %v2815_v12  ;;  %v2817_v26 = vpop.eup %2816  ;;  %v710_v12 = vmul.f32 0.5, %v678_v1  ;;  %v4339_v1 = vadd.f32 %v6188_v3, %v608_v4  ;;  %v6201_v4 = vld [vmem:[#allocation19_spill] sm:$0xff] }
 0x235   : > { %v2819_v27 = vpop.eup %2818  ;;  %v780_v5 = vmul.f32 0.5, %v2817_v26  ;;  %v674_v26 = vadd.f32 %v4328_v31, %v6199_v38  ;;  %v6244_v38 = vld [vmem:[#allocation86_spill] sm:$0xff] }
 0x236   : > { %v815_v18 = vadd.f32 0.5, %v783_v61  ;;  %v2821_v11 = vpop.eup %2820  ;;  %v779_v44 = vmul.f32 0.5, %v2819_v27  ;;  %6198 = vst [vmem:[#allocation105_spill] sm:$0xff] %v4339_v1  ;;  %2828 = vtanh.f32 %v710_v12  ;;  %v708_v61 = vmul.f32 0.5, %v676_v57  ;;  %v6202_v57 = vld [vmem:[#allocation61_spill] sm:$0xff] }
 0x237   : > { %868 = vmatmul.f32.gmra.mxu2 %v6195_v39  ;;  %v2823_v62 = vpop.eup %2822  ;;  %v812_v37 = vadd.f32 0.5, %v780_v5  ;;  %v778_v54 = vmul.f32 0.5, %v2821_v11  ;;  %2830 = vtanh.f32 %v709_v28  ;;  %v706_v3 = vmul.f32 0.5, %v674_v26 }
 0x238   : > { %929 = vmatpush.msra.mxu3 %v815_v18  ;;  %v2825_v35 = vpop.eup %2824  ;;  %v6200_v18 = vld [vmem:[#allocation20_spill] sm:$0xff]  ;;  %v811_v22 = vadd.f32 0.5, %v779_v44  ;;  %v777_v27 = vmul.f32 0.5, %v2823_v62  ;;  %2832 = vtanh.f32 %v708_v61  ;;  %v672_v12 = vadd.f32 %v4339_v1, %v6201_v4 }
 0x239   : > { %v673_v39 = vadd.f32 %v4334_v32, %v6200_v18  ;;  %v810_v5 = vadd.f32 0.5, %v778_v54  ;;  %v776_v11 = vmul.f32 0.5, %v2825_v35  ;;  %2834 = vtanh.f32 %v707_v60  ;;  %v6203_v54 = vld [vmem:[#allocation63_spill] sm:$0xff]  ;;  %v6247_v1 = vld [vmem:[#allocation92_spill] sm:$0xff] }
 0x23a   : > { %930 = vmatpush.msra.mxu3 %v814_v51  ;;  %v2827_v51 = vpop.eup %2826  ;;  %v809_v47 = vadd.f32 0.5, %v777_v27  ;;  %2836 = vtanh.f32 %v706_v3  ;;  %v704_v44 = vmul.f32 0.5, %v672_v12 }
 0x23b   : > { %v705_v28 = vmul.f32 0.5, %v673_v39  ;;  %v775_v18 = vmul.f32 0.5, %v2827_v51  ;;  %v808_v62 = vadd.f32 0.5, %v776_v11 }
 0x23c   : > { %931 = vmatpush.msra.mxu3 %v813_v40  ;;  %v2829_v40 = vpop.eup %2828 }
 0x23d   : > { %v774_v61 = vmul.f32 0.5, %v2829_v40  ;;  %2838 = vtanh.f32 %v705_v28  ;;  %v807_v13 = vadd.f32 0.5, %v775_v18  ;;  %v6204_v28 = vld [vmem:[#allocation65_spill] sm:$0xff] }
 0x23e   : > { %932 = vmatpush.msra.mxu3 %v812_v37  ;;  %v2831_v37 = vpop.eup %2830  ;;  %2840 = vtanh.f32 %v704_v44 }
 0x23f   : > { %871 = vmatmul.f32.gmra.mxu2 %v6202_v57  ;;  %v2833_v26 = vpop.eup %2832  ;;  %v773_v57 = vmul.f32 0.5, %v2831_v37  ;;  %v806_v35 = vadd.f32 0.5, %v774_v61  ;;  %v6206_v61 = vld [vmem:[#allocation67_spill] sm:$0xff] }
 0x240   : > { %933 = vmatpush.msra.mxu3 %v811_v22  ;;  %v2835_v22 = vpop.eup %2834  ;;  %v772_v60 = vmul.f32 0.5, %v2833_v26  ;;  %v6245_v26 = vld [vmem:[#allocation88_spill] sm:$0xff] }
 0x241   : > { %v2837_v39 = vpop.eup %2836  ;;  %v805_v27 = vadd.f32 0.5, %v773_v57  ;;  %v771_v51 = vmul.f32 0.5, %v2835_v22  ;;  %v6207_v57 = vld [vmem:[#allocation38_spill] sm:$0xff] }
 0x242   : > { %934 = vmatpush.msra.mxu3 %v810_v5  ;;  %v804_v12 = vadd.f32 0.5, %v772_v60  ;;  %v770_v5 = vmul.f32 0.5, %v2837_v39  ;;  %v6210_v60 = vld [vmem:[#allocation71_spill] sm:$0xff]  ;;  %v6211_v39 = vld [vmem:[#allocation42_spill] sm:$0xff] }
 0x243   : > { %v2839_v3 = vpop.eup %2838  ;;  %v803_v40 = vadd.f32 0.5, %v771_v51  ;;  %v6212_v51 = vld [vmem:[#allocation73_spill] sm:$0xff] }
 0x244   : > { %935 = vmatpush.msra.mxu3 %v809_v47  ;;  %v2841_v11 = vpop.eup %2840  ;;  %v769_v18 = vmul.f32 0.5, %v2839_v3  ;;  %v802_v47 = vadd.f32 0.5, %v770_v5 }
 0x246   : > { %936 = vmatpush.msra.mxu3 %v808_v62  ;;  %v801_v37 = vadd.f32 0.5, %v769_v18  ;;  %v6205_v62 = vld [vmem:[#allocation36_spill] sm:$0xff] }
 0x247   : > { %874 = vmatmul.f32.gmra.mxu2 %v6203_v54  ;;  %v6208_v54 = vld [vmem:[#allocation69_spill] sm:$0xff] }
 0x248   : > { %937 = vmatpush.msra.mxu3 %v807_v13  ;;  %v768_v13 = vmul.f32 0.5, %v2841_v11  ;;  %v6213_v11 = vld [vmem:[#allocation44_spill] sm:$0xff] }
 0x24a   : > { %938 = vmatpush.msra.mxu3 %v806_v35  ;;  %v800_v44 = vadd.f32 0.5, %v768_v13  ;;  %v6209_v35 = vld [vmem:[#allocation40_spill] sm:$0xff] }
 0x24c   : > { %939 = vmatpush.msra.mxu3 %v805_v27 }
 0x24e   : > { %940 = vmatpush.msra.mxu3 %v804_v12 }
 0x24f   : > { %877 = vmatmul.f32.gmra.mxu2 %v6204_v28 }
 0x250   : > { %941 = vmatpush.msra.mxu3 %v803_v40  ;;  %v6214_v40 = vld [vmem:[#allocation75_spill] sm:$0xff] }
 0x252   : > { %942 = vmatpush.msra.mxu3 %v802_v47  ;;  %v1075_v47 = vstv %s1074_s5 }
 0x253   : > { %2842 = vrcp.f32 %v1075_v47  ;;  %vm1081_vm5 = vweird.f32 %v1075_v47 }
 0x254   : > { %943 = vmatpush.msra.mxu3 %v801_v37  ;;  %v6215_v37 = vld [vmem:[#allocation46_spill] sm:$0xff] }
 0x256   : > { %944 = vmatpush.msra.mxu3 %v800_v44  ;;  %v6216_v44 = vld [vmem:[#allocation77_spill] sm:$0xff] }
 0x257   : > { %945 = vmatmul.f32.vlgmr.msra.gmra.mxu3 %v6205_v62  ;;  %880 = vmatmul.f32.gmra.mxu2 %v6206_v61 }
 0x259   : > { %v2843_v13 = vpop.eup %2842 }
 0x25a   : > { %v1077_v62 = vmul.f32 %v2843_v13, %v1075_v47  ;;  %vm1082_vm6 = vweird.f32 %v2843_v13 }
 0x25b   : > { %vm1083_vm7 = vmor %vm1081_vm5, %vm1082_vm6 }
 0x25c   : > { %v1078_v61 = vsub.f32 1.0, %v1077_v62  ;;  %v6221_v62 = vld [vmem:[#allocation52_spill] sm:$0xff] }
 0x25f   : > { %948 = vmatmul.f32.gmra.mxu3 %v6207_v57  ;;  %883 = vmatmul.f32.gmra.mxu2 %v6208_v54  ;;  %v1079_v57 = vmul.f32 %v2843_v13, %v1078_v61  ;;  %v1087_v54 = vand.u32 2147483648, %v1075_v47  ;;  %v6222_v61 = vld [vmem:[#allocation54_spill] sm:$0xff] }
 0x267   : > { %951 = vmatmul.f32.gmra.mxu3 %v6209_v35  ;;  %886 = vmatmul.f32.gmra.mxu2 %v6210_v60  ;;  %v1080_v35 = vadd.f32 %v2843_v13, %v1079_v57  ;;  %v1085_v60 = vand.u32 2147483647, %v1075_v47  ;;  %v6223_v57 = vld [vmem:[#allocation56_spill] sm:$0xff]  ;;  %v6224_v47 = vld [vmem:[#allocation58_spill] sm:$0xff] }
 0x269   : > { %vm1086_vm8 = vcmp.eq.f32.partialorder %v1085_v60, 8.507059e+37 }
 0x26f   : > { %954 = vmatmul.f32.gmra.mxu3 %v6211_v39  ;;  %889 = vmatmul.f32.gmra.mxu2 %v6212_v51  ;;  %v6217_v39 = vld [vmem:[#allocation48_spill] sm:$0xff]  ;;  %v1088_v51 = vor.u32 1.1754944e-38, %v1087_v54  ;;  %v833_v54 = vpop.f32.mrf.mxu2 }
 0x277   : > { %957 = vmatmul.f32.gmra.mxu3 %v6213_v11  ;;  %892 = vmatmul.f32.gmra.mxu2 %v6214_v40  ;;  %v6218_v40 = vld [vmem:[#allocation79_spill] sm:$0xff]  ;;  %v1084_v11 = vsel %vm1083_vm7, %v2843_v13, %v1080_v35  ;;  %v6227_v13 = vld [vmem:[#allocation62_spill] sm:$0xff]  ;;  %v6229_v35 = vld [vmem:[#allocation64_spill] sm:$0xff] }
 0x278   : > { %v1089_v27 = vsel %vm1086_vm8, %v1088_v51, %v1084_v11  ;;  %v6228_v11 = vld [vmem:[#allocation85_spill] sm:$0xff]  ;;  %v6230_v51 = vld [vmem:[#allocation87_spill] sm:$0xff] }
 0x279   : > { %2440 = vpush %v1089_v27  ;;  %v836_v27 = vpop.f32.mrf.mxu2 }
 0x27f   : > { %960 = vmatmul.f32.gmra.mxu3 %v6215_v37  ;;  %895 = vmatmul.f32.gmra.mxu2 %v6216_v44  ;;  %v6219_v37 = vld [vmem:[#allocation50_spill] sm:$0xff]  ;;  %v6220_v44 = vld [vmem:[#allocation81_spill] sm:$0xff] }
 0x281   : > { %v839_v60 = vpop.f32.mrf.mxu2 }
 0x287   : > { %963 = vmatmul.f32.gmra.mxu3 %v6217_v39  ;;  %898 = vmatmul.f32.gmra.mxu2 %v6218_v40  ;;  %v6225_v39 = vld [vmem:[#allocation60_spill] sm:$0xff]  ;;  %v6226_v40 = vld [vmem:[#allocation83_spill] sm:$0xff] }
 0x28f   : > { %966 = vmatmul.f32.gmra.mxu3 %v6219_v37  ;;  %901 = vmatmul.f32.gmra.mxu2 %v6220_v44  ;;  %v6231_v37 = vld [vmem:[#allocation66_spill] sm:$0xff]  ;;  %v842_v44 = vpop.f32.mrf.mxu2 }
 0x297   : > { %969 = vmatmul.f32.gmra.mxu3 %v6221_v62  ;;  %904 = vmatmul.f32.gmra.mxu2 %v6226_v40  ;;  %v6232_v62 = vld [vmem:[#allocation89_spill] sm:$0xff] }
 0x29f   : > { %972 = vmatmul.f32.gmra.mxu3 %v6222_v61  ;;  %907 = vmatmul.f32.gmra.mxu2 %v6228_v11  ;;  %v6233_v61 = vld [vmem:[#allocation68_spill] sm:$0xff] }
 0x2a7   : > { %975 = vmatmul.f32.gmra.mxu3 %v6223_v57  ;;  %910 = vmatmul.f32.gmra.mxu2 %v6230_v51  ;;  %v845_v57 = vpop.f32.mrf.mxu2 }
 0x2aa   : > { %s2441_s6 = spop %2440 }
 0x2ab   : > { %s1091_s7 = smul.f32 2.0, %s2441_s6 }
 0x2af   : > { %978 = vmatmul.f32.gmra.mxu3 %v6224_v47  ;;  %913 = vmatmul.f32.gmra.mxu2 %v6232_v62  ;;  %v6234_v47 = vld [vmem:[#allocation91_spill] sm:$0xff]  ;;  %v848_v4 = vpop.f32.mrf.mxu2 }
 0x2b7   : > { %981 = vmatmul.f32.gmra.mxu3 %v6225_v39  ;;  %916 = vmatmul.f32.gmra.mxu2 %v6234_v47  ;;  %v851_v5 = vpop.f32.mrf.mxu2  ;;  %v6238_v47 = vld [vmem:[#allocation74_spill] sm:$0xff] }
 0x2bf   : > { %984 = vmatmul.f32.gmra.mxu3 %v6227_v13  ;;  %v6235_v13 = vld [vmem:[#allocation70_spill] sm:$0xff] }
 0x2c7   : > { %987 = vmatmul.f32.gmra.mxu3 %v6229_v35  ;;  %v6236_v35 = vld [vmem:[#allocation93_spill] sm:$0xff] }
 0x2c8   : > { %919 = vmatmul.f32.gmra.mxu2 %v6236_v35  ;;  %v6239_v35 = vld [vmem:[#allocation76_spill] sm:$0xff] }
 0x2cf   : > { %990 = vmatmul.f32.gmra.mxu3 %v6231_v37  ;;  %v6237_v37 = vld [vmem:[#allocation72_spill] sm:$0xff] }
 0x2d0   : > { %922 = vmatmul.f32.gmra.mxu2 %v6131_v8 }
 0x2d7   : > { %993 = vmatmul.f32.gmra.mxu3 %v6233_v61 }
 0x2da   : > { %v946_v39 = vpop.f32.mrf.mxu3 }
 0x2db   : > { %v4381_v40 = vadd.f32 %v946_v39, %v833_v54  ;;  %v854_v54 = vpop.f32.mrf.mxu2  ;;  %925 = vmatmul.f32.gmra.mxu2 %v6134_v24 }
 0x2df   : > { %996 = vmatmul.f32.gmra.mxu3 %v6235_v13 }
 0x2e2   : > { %v949_v28 = vpop.f32.mrf.mxu3 }
 0x2e3   : > { %v4385_v51 = vadd.f32 %v949_v28, %v836_v27  ;;  %v857_v28 = vpop.f32.mrf.mxu2 }
 0x2e7   : > { %999 = vmatmul.f32.gmra.mxu3 %v6237_v37  ;;  %v6240_v37 = vld [vmem:[#allocation78_spill] sm:$0xff] }
 0x2ea   : > { %v952_v62 = vpop.f32.mrf.mxu3 }
 0x2eb   : > { %v4389_v61 = vadd.f32 %v952_v62, %v839_v60  ;;  %v860_v8 = vpop.f32.mrf.mxu2  ;;  %v6241_v62 = vld [vmem:[#allocation80_spill] sm:$0xff] }
 0x2ef   : > { %1002 = vmatmul.f32.gmra.mxu3 %v6238_v47 }
 0x2f2   : > { %v955_v39 = vpop.f32.mrf.mxu3 }
 0x2f3   : > { %v4393_v13 = vadd.f32 %v955_v39, %v842_v44  ;;  %v863_v47 = vpop.f32.mrf.mxu2  ;;  %v6242_v44 = vld [vmem:[#allocation82_spill] sm:$0xff] }
 0x2f7   : > { %1005 = vmatmul.f32.gmra.mxu3 %v6239_v35 }
 0x2fa   : > { %v958_v27 = vpop.f32.mrf.mxu3 }
 0x2fb   : > { %v4396_v3 = vadd.f32 %v958_v27, %v845_v57  ;;  %v866_v39 = vpop.f32.mrf.mxu2  ;;  %v6243_v57 = vld [vmem:[#allocation84_spill] sm:$0xff] }
 0x2ff   : > { %1008 = vmatmul.f32.gmra.mxu3 %v6240_v37 }
 0x302   : > { %v961_v22 = vpop.f32.mrf.mxu3 }
 0x303   : > { %v4399_v60 = vadd.f32 %v961_v22, %v848_v4  ;;  %v869_v18 = vpop.f32.mrf.mxu2 }
 0x307   : > { %1011 = vmatmul.f32.gmra.mxu3 %v6241_v62 }
 0x30a   : > { %v964_v12 = vpop.f32.mrf.mxu3 }
 0x30b   : > { %v4402_v24 = vadd.f32 %v964_v12, %v851_v5  ;;  %v872_v4 = vpop.f32.mrf.mxu2  ;;  %v6246_v12 = vld [vmem:[#allocation90_spill] sm:$0xff] }
 0x30f   : > { %1014 = vmatmul.f32.gmra.mxu3 %v6242_v44 }
 0x312   : > { %v967_v35 = vpop.f32.mrf.mxu3 }
 0x313   : > { %v4405_v11 = vadd.f32 %v967_v35, %v854_v54  ;;  %v875_v62 = vpop.f32.mrf.mxu2 }
 0x317   : > { %1017 = vmatmul.f32.gmra.mxu3 %v6243_v57  ;;  %v6249_v57 = vld [vmem:[#allocation94_spill] sm:$0xff] }
 0x31a   : > { %v970_v37 = vpop.f32.mrf.mxu3 }
 0x31b   : > { %v878_v5 = vpop.f32.mrf.mxu2 }
 0x31f   : > { %1020 = vmatmul.f32.gmra.mxu3 %v6244_v38 }
 0x322   : > { %v973_v22 = vpop.f32.mrf.mxu3 }
 0x323   : > { %v4412_v35 = vpop.f32.mrf.mxu2 }
 0x324   : > { %6248 = vst [vmem:[#allocation106_spill] sm:$0xff] %v4412_v35 }
 0x327   : > { %1023 = vmatmul.f32.gmra.mxu3 %v6245_v26 }
 0x32a   : > { %v976_v34 = vpop.f32.mrf.mxu3 }
 0x32b   : > { %v4415_v32 = vpop.f32.mrf.mxu2  ;;  %v977_v7 = vadd.f32 %v976_v34, %v863_v47 }
 0x32c   : > { %6250 = vst [vmem:[#allocation99_spill] sm:$0xff] %v4415_v32 }
 0x32f   : > { %1026 = vmatmul.f32.gmra.mxu3 %v6246_v12 }
 0x332   : > { %v979_v44 = vpop.f32.mrf.mxu3 }
 0x333   : > { %v980_v9 = vadd.f32 %v979_v44, %v866_v39  ;;  %v4424_v32 = vpop.f32.mrf.mxu2  ;;  %v971_v39 = vadd.f32 %v970_v37, %v857_v28  ;;  %v1049_v37 = vsub.f32 %v4405_v11, %v4137_v58 }
 0x337   : > { %1029 = vmatmul.f32.gmra.mxu3 %v6247_v1  ;;  %v4419_v1 = vstv %s1091_s7 }
 0x33a   : > { %v982_v54 = vpop.f32.mrf.mxu3 }
 0x33b   : > { %v983_v26 = vadd.f32 %v982_v54, %v869_v18 }
 0x33d   : > { %v1054_v27 = vsub.f32 %v983_v26, %v4080_v48 }
 0x33f   : > { %1032 = vmatmul.f32.gmra.mxu3 %v6249_v57  ;;  %v1105_v34 = vmul.f32 %v4419_v1, %v1054_v27 }
 0x342   : > { %v985_v36 = vpop.f32.mrf.mxu3 }
 0x343   : > { %v986_v38 = vadd.f32 %v985_v36, %v872_v4  ;;  %v974_v36 = vadd.f32 %v973_v22, %v860_v8  ;;  %v1053_v4 = vsub.f32 %v980_v9, %v4093_v46 }
 0x345   : > { %v1055_v12 = vsub.f32 %v986_v38, %v4072_v6  ;;  %v1051_v8 = vsub.f32 %v974_v36, %v4117_v63  ;;  %v1104_v9 = vmul.f32 %v4419_v1, %v1053_v4  ;;  %v6251_v36 = vld [vmem:[#allocation115_spill] sm:$0xff] }
 0x346   : > { %v1047_v4 = vsub.f32 %v4399_v60, %v6251_v36 }
 0x347   : > { %1035 = vmatmul.f32.gmra.mxu3 %v6132_v20  ;;  %v1106_v35 = vmul.f32 %v4419_v1, %v1055_v12  ;;  %v1102_v12 = vmul.f32 %v4419_v1, %v1051_v8  ;;  %v6254_v8 = vld [vmem:[#allocation116_spill] sm:$0xff] }
 0x34a   : > { %v988_v31 = vpop.f32.mrf.mxu3 }
 0x34b   : > { %v989_v42 = vadd.f32 %v988_v31, %v875_v62  ;;  %v1052_v31 = vsub.f32 %v977_v7, %v4101_v23  ;;  %v1050_v62 = vsub.f32 %v971_v39, %v4128_v17  ;;  %v4442_v7 = vadd.f32 %v1105_v34, %v4080_v48 }
 0x34c   : > { %v1048_v48 = vsub.f32 %v4402_v24, %v4146_v50  ;;  %v1100_v39 = vmul.f32 %v4419_v1, %v1049_v37  ;;  %v1098_v37 = vmul.f32 %v4419_v1, %v1047_v4  ;;  %v6261_v4 = vld [vmem:[#allocation11_spill] sm:$0xff] }
 0x34d   : > { %v1056_v57 = vsub.f32 %v989_v42, %v4069_v29  ;;  %v4435_v42 = vadd.f32 %v1106_v35, %v4072_v6  ;;  %v1103_v28 = vmul.f32 %v4419_v1, %v1052_v31  ;;  %v1101_v54 = vmul.f32 %v4419_v1, %v1050_v62  ;;  %v4459_v35 = vpop.f32.mrf.mxu2 }
 0x34e   : > { %v4475_v31 = vadd.f32 %v1102_v12, %v4117_v63  ;;  %v4493_v12 = vadd.f32 %v1100_v39, %v4137_v58  ;;  %v6262_v58 = vld [vmem:[#allocation119_spill] sm:$0xff] }
 0x34f   : > { %v1107_v18 = vmul.f32 %v4419_v1, %v1056_v57  ;;  %1038 = vmatmul.f32.gmra.mxu3 %v6135_v25  ;;  %v1170_v6 = vadd.f32 %v4435_v42, %v6017_v15  ;;  %v4462_v38 = vadd.f32 %v1103_v28, %v4101_v23  ;;  %v6252_v23 = vld [vmem:[#allocation18_spill] sm:$0xff]  ;;  %v4485_v60 = vadd.f32 %v1101_v54, %v4128_v17 }
 0x350   : > { %6257 = vst [vmem:[#allocation107_spill] sm:$0xff] %v4493_v12  ;;  %v1043_v39 = vsub.f32 %v4385_v51, %v6262_v58 }
 0x351   : > { %v4432_v26 = vadd.f32 %v1107_v18, %v4069_v29  ;;  %v1202_v24 = vmul.f32 0.5, %v1170_v6 }
 0x352   : > { %v991_v47 = vpop.f32.mrf.mxu3 }
 0x353   : > { %v992_v22 = vadd.f32 %v991_v47, %v878_v5  ;;  %v1171_v29 = vadd.f32 %v4432_v26, %v6016_v16  ;;  %v4453_v5 = vadd.f32 %v1104_v9, %v4093_v46  ;;  %v1169_v46 = vadd.f32 %v4442_v7, %v6018_v14 }
 0x354   : > { %v1046_v9 = vsub.f32 %v4396_v3, %v6254_v8 }
 0x355   : > { %v1057_v27 = vsub.f32 %v992_v22, %v4106_v30  ;;  %v1203_v11 = vmul.f32 0.5, %v1171_v29  ;;  %v1099_v22 = vmul.f32 %v4419_v1, %v1048_v48  ;;  %v1201_v28 = vmul.f32 0.5, %v1169_v46  ;;  %v6256_v29 = vld [vmem:[#allocation117_spill] sm:$0xff]  ;;  %v6259_v48 = vld [vmem:[#allocation118_spill] sm:$0xff] }
 0x356   : > { %v1045_v6 = vsub.f32 %v4393_v13, %v6256_v29  ;;  %v1044_v54 = vsub.f32 %v4389_v61, %v6259_v48 }
 0x357   : > { %v1108_v44 = vmul.f32 %v4419_v1, %v1057_v27  ;;  %2844 = vtanh.f32 %v1203_v11  ;;  %v6255_v27 = vld [vmem:[#allocation13_spill] sm:$0xff]  ;;  %v1097_v11 = vmul.f32 %v4419_v1, %v1046_v9  ;;  %v4501_v46 = vadd.f32 %v1099_v22, %v4146_v50  ;;  %v6264_v22 = vld [vmem:[#allocation10_spill] sm:$0xff] }
 0x358   : > { %v1167_v63 = vadd.f32 %v4462_v38, %v6255_v27  ;;  %2846 = vtanh.f32 %v1202_v24  ;;  %v1165_v24 = vadd.f32 %v4485_v60, %v6261_v4  ;;  %v4513_v9 = vadd.f32 %v1098_v37, %v6251_v36  ;;  %v6265_v4 = vld [vmem:[#allocation120_spill] sm:$0xff] }
 0x359   : > { %v4465_v57 = vadd.f32 %v1108_v44, %v4106_v30  ;;  %v6253_v30 = vld [vmem:[#allocation14_spill] sm:$0xff]  ;;  %v6258_v44 = vld [vmem:[#allocation12_spill] sm:$0xff]  ;;  %6260 = vst [vmem:[#allocation108_spill] sm:$0xff] %v4501_v46  ;;  %v1095_v51 = vmul.f32 %v4419_v1, %v1044_v54  ;;  %v4521_v27 = vadd.f32 %v1097_v11, %v6254_v8  ;;  %v1094_v37 = vmul.f32 %v4419_v1, %v1043_v39  ;;  %v6269_v54 = vld [vmem:[#allocation7_spill] sm:$0xff] }
 0x35a   : > { %v4471_v18 = vpop.f32.mrf.mxu3  ;;  %v1168_v47 = vadd.f32 %v4453_v5, %v6253_v30  ;;  %v1166_v17 = vadd.f32 %v4475_v31, %v6258_v44  ;;  %v1199_v13 = vmul.f32 0.5, %v1167_v63  ;;  %6263 = vst [vmem:[#allocation109_spill] sm:$0xff] %v4513_v9  ;;  %v1042_v44 = vsub.f32 %v4381_v40, %v6265_v4 }
 0x35b   : > { %v1172_v34 = vadd.f32 %v4465_v57, %v6252_v23  ;;  %6266 = vst [vmem:[#allocation110_spill] sm:$0xff] %v4521_v27  ;;  %v1197_v30 = vmul.f32 0.5, %v1165_v24  ;;  %v6267_v23 = vld [vmem:[#allocation9_spill] sm:$0xff]  ;;  %v1162_v15 = vadd.f32 %v4513_v9, %v6269_v54  ;;  %v4540_v54 = vadd.f32 %v1094_v37, %v6262_v58 }
 0x35c   : > { %v1200_v3 = vmul.f32 0.5, %v1168_v47  ;;  %v1198_v50 = vmul.f32 0.5, %v1166_v17  ;;  %v1163_v36 = vadd.f32 %v4501_v46, %v6267_v23  ;;  %v1093_v8 = vmul.f32 %v4419_v1, %v1042_v44 }
 0x35d   : > { %v1204_v62 = vmul.f32 0.5, %v1172_v34  ;;  %v1096_v34 = vmul.f32 %v4419_v1, %v1045_v6  ;;  %v2845_v61 = vpop.eup %2844  ;;  %v4533_v23 = vadd.f32 %v1095_v51, %v6259_v48  ;;  %6272 = vst [vmem:[#allocation113_spill] sm:$0xff] %v4540_v54  ;;  %v1194_v44 = vmul.f32 0.5, %v1162_v15 }
 0x35e   : > { %v2847_v63 = vpop.eup %2846  ;;  %v1267_v17 = vmul.f32 0.5, %v2845_v61  ;;  %v1195_v39 = vmul.f32 0.5, %v1163_v36  ;;  %v6271_v61 = vld [vmem:[#allocation6_spill] sm:$0xff] }
 0x35f   : > { %2848 = vtanh.f32 %v1204_v62  ;;  %v4510_v62 = vpop.f32.mrf.mxu2  ;;  %v4527_v14 = vadd.f32 %v1096_v34, %v6256_v29  ;;  %6270 = vst [vmem:[#allocation112_spill] sm:$0xff] %v4533_v23 }
 0x360   : > { %2850 = vtanh.f32 %v1201_v28  ;;  %v1164_v28 = vadd.f32 %v4493_v12, %v6264_v22  ;;  %v1299_v34 = vadd.f32 0.5, %v1267_v17  ;;  %v6275_v17 = vld [vmem:[#allocation4_spill] sm:$0xff] }
 0x361   : > { %2852 = vtanh.f32 %v1200_v3  ;;  %6268 = vst [vmem:[#allocation111_spill] sm:$0xff] %v4527_v14  ;;  %v1159_v58 = vadd.f32 %v4533_v23, %v6275_v17 }
 0x362   : > { %v4508_v47 = vpop.f32.mrf.mxu3  ;;  %2854 = vtanh.f32 %v1199_v13  ;;  %v1196_v40 = vmul.f32 0.5, %v1164_v28  ;;  %v1266_v13 = vmul.f32 0.5, %v2847_v63  ;;  %v6273_v63 = vld [vmem:[#allocation5_spill] sm:$0xff] }
 0x363   : > { %2856 = vtanh.f32 %v1198_v50  ;;  %v1160_v48 = vadd.f32 %v4527_v14, %v6273_v63 }
 0x364   : > { %2858 = vtanh.f32 %v1197_v30  ;;  %v1298_v30 = vadd.f32 0.5, %v1266_v13 }
 0x365   : > { %v2849_v6 = vpop.eup %2848  ;;  %2860 = vtanh.f32 %v1196_v40 }
 0x366   : > { %v1268_v3 = vmul.f32 0.5, %v2849_v6  ;;  %v2851_v22 = vpop.eup %2850  ;;  %v1161_v6 = vadd.f32 %v4521_v27, %v6271_v61  ;;  %v4547_v61 = vadd.f32 %v1093_v8, %v6265_v4  ;;  %2862 = vtanh.f32 %v1195_v39  ;;  %v6277_v8 = vld [vmem:[#allocation2_spill] sm:$0xff] }
 0x367   : > { %v2853_v24 = vpop.eup %2852  ;;  %v1265_v50 = vmul.f32 0.5, %v2851_v22  ;;  %v4544_v36 = vpop.f32.mrf.mxu2  ;;  %2864 = vtanh.f32 %v1194_v44  ;;  %v1191_v4 = vmul.f32 0.5, %v1159_v58 }
 0x368   : > { %v1300_v11 = vadd.f32 0.5, %v1268_v3  ;;  %v2855_v28 = vpop.eup %2854  ;;  %v1264_v51 = vmul.f32 0.5, %v2853_v24  ;;  %6274 = vst [vmem:[#allocation114_spill] sm:$0xff] %v4547_v61  ;;  %v1193_v22 = vmul.f32 0.5, %v1161_v6  ;;  %v1157_v39 = vadd.f32 %v4547_v61, %v6277_v8 }
 0x369   : > { %v2857_v3 = vpop.eup %2856  ;;  %v1297_v37 = vadd.f32 0.5, %v1265_v50  ;;  %v1263_v15 = vmul.f32 0.5, %v2855_v28 }
 0x36a   : > { %v4537_v29 = vpop.f32.mrf.mxu3  ;;  %1317 = vmatpush.msrb.mxu0 %v1300_v11  ;;  %v2859_v40 = vpop.eup %2858  ;;  %v1192_v11 = vmul.f32 0.5, %v1160_v48  ;;  %v1296_v24 = vadd.f32 0.5, %v1264_v51  ;;  %v1262_v63 = vmul.f32 0.5, %v2857_v3  ;;  %2866 = vtanh.f32 %v1193_v22 }
 0x36b   : > { %v2861_v14 = vpop.eup %2860  ;;  %v1295_v50 = vadd.f32 0.5, %v1263_v15  ;;  %v1261_v28 = vmul.f32 0.5, %v2859_v40  ;;  %v1189_v51 = vmul.f32 0.5, %v1157_v39 }
 0x36c   : > { %1318 = vmatpush.msrb.mxu0 %v1299_v34  ;;  %v6276_v34 = vld [vmem:[#allocation3_spill] sm:$0xff]  ;;  %2868 = vtanh.f32 %v1192_v11  ;;  %v1294_v48 = vadd.f32 0.5, %v1262_v63 }
 0x36d   : > { %v1158_v13 = vadd.f32 %v4540_v54, %v6276_v34  ;;  %v1260_v34 = vmul.f32 0.5, %v2861_v14  ;;  %2870 = vtanh.f32 %v1191_v4  ;;  %v1293_v3 = vadd.f32 0.5, %v1261_v28  ;;  %v6285_v54 = vld [vmem:[#allocation49_spill] sm:$0xff] }
 0x36e   : > { %1319 = vmatpush.msrb.mxu0 %v1298_v30  ;;  %v2863_v30 = vpop.eup %2862 }
 0x36f   : > { %v1190_v44 = vmul.f32 0.5, %v1158_v13  ;;  %v1259_v22 = vmul.f32 0.5, %v2863_v30  ;;  %v4557_v58 = vpop.f32.mrf.mxu2 }
 0x370   : > { %1320 = vmatpush.msrb.mxu0 %v1297_v37  ;;  %v2865_v37 = vpop.eup %2864 }
 0x371   : > { %v2867_v8 = vpop.eup %2866  ;;  %2872 = vtanh.f32 %v1190_v44  ;;  %v1258_v15 = vmul.f32 0.5, %v2865_v37  ;;  %v1291_v63 = vadd.f32 0.5, %v1259_v22 }
 0x372   : > { %v4555_v6 = vpop.f32.mrf.mxu3  ;;  %1321 = vmatpush.msrb.mxu0 %v1296_v24  ;;  %v1292_v24 = vadd.f32 0.5, %v1260_v34  ;;  %v2869_v40 = vpop.eup %2868  ;;  %2874 = vtanh.f32 %v1189_v51  ;;  %v1257_v14 = vmul.f32 0.5, %v2867_v8 }
 0x373   : > { %v2871_v13 = vpop.eup %2870  ;;  %v1290_v4 = vadd.f32 0.5, %v1258_v15  ;;  %v1256_v39 = vmul.f32 0.5, %v2869_v40  ;;  %v6278_v15 = vld [vmem:[#allocation35_spill] sm:$0xff] }
 0x374   : > { %1322 = vmatpush.msrb.mxu0 %v1295_v50  ;;  %v1289_v28 = vadd.f32 0.5, %v1257_v14  ;;  %v1255_v30 = vmul.f32 0.5, %v2871_v13  ;;  %v6279_v14 = vld [vmem:[#allocation37_spill] sm:$0xff] }
 0x375   : > { %v1288_v44 = vadd.f32 0.5, %v1256_v39  ;;  %v6280_v39 = vld [vmem:[#allocation39_spill] sm:$0xff] }
 0x376   : > { %1323 = vmatpush.msrb.mxu0 %v1294_v48  ;;  %v1287_v51 = vadd.f32 0.5, %v1255_v30 }
 0x377   : > { %v2873_v50 = vpop.eup %2872  ;;  %v902_v37 = vpop.f32.mrf.mxu2 }
 0x378   : > { %1324 = vmatpush.msrb.mxu0 %v1293_v3  ;;  %v2875_v48 = vpop.eup %2874  ;;  %v1254_v34 = vmul.f32 0.5, %v2873_v50 }
 0x37a   : > { %v4559_v11 = vpop.f32.mrf.mxu3  ;;  %1325 = vmatpush.msrb.mxu0 %v1292_v24  ;;  %v1253_v24 = vmul.f32 0.5, %v2875_v48  ;;  %v1286_v8 = vadd.f32 0.5, %v1254_v34  ;;  %v6282_v34 = vld [vmem:[#allocation43_spill] sm:$0xff] }
 0x37c   : > { %1326 = vmatpush.msrb.mxu0 %v1291_v63  ;;  %v1285_v22 = vadd.f32 0.5, %v1253_v24  ;;  %v6283_v24 = vld [vmem:[#allocation45_spill] sm:$0xff] }
 0x37e   : > { %1327 = vmatpush.msrb.mxu0 %v1290_v4 }
 0x37f   : > { %v905_v63 = vpop.f32.mrf.mxu2 }
 0x380   : > { %1328 = vmatpush.msrb.mxu0 %v1289_v28 }
 0x382   : > { %v4561_v3 = vpop.f32.mrf.mxu3  ;;  %1329 = vmatpush.msrb.mxu0 %v1288_v44  ;;  %v6281_v44 = vld [vmem:[#allocation41_spill] sm:$0xff] }
 0x384   : > { %1330 = vmatpush.msrb.mxu0 %v1287_v51 }
 0x386   : > { %1331 = vmatpush.msrb.mxu0 %v1286_v8 }
 0x387   : > { %v908_v4 = vpop.f32.mrf.mxu2 }
 0x388   : > { %1332 = vmatpush.msrb.mxu0 %v1285_v22 }
 0x389   : > { %1333 = vmatmul.f32.vlgmr.msrb.gmra.mxu0 %v6278_v15  ;;  %v6284_v15 = vld [vmem:[#allocation47_spill] sm:$0xff] }
 0x38a   : > { %v1012_v40 = vpop.f32.mrf.mxu3 }
 0x38f   : > { %v911_v17 = vpop.f32.mrf.mxu2 }
 0x391   : > { %1336 = vmatmul.f32.gmra.mxu0 %v6279_v14 }
 0x392   : > { %v1015_v13 = vpop.f32.mrf.mxu3 }
 0x397   : > { %v914_v48 = vpop.f32.mrf.mxu2 }
 0x399   : > { %1339 = vmatmul.f32.gmra.mxu0 %v6280_v39 }
 0x39a   : > { %v1018_v50 = vpop.f32.mrf.mxu3 }
 0x39f   : > { %v917_v22 = vpop.f32.mrf.mxu2 }
 0x3a1   : > { %1342 = vmatmul.f32.gmra.mxu0 %v6281_v44 }
 0x3a2   : > { %v1021_v30 = vpop.f32.mrf.mxu3 }
 0x3a3   : > { %v1022_v9 = vadd.f32 %v1021_v30, %v908_v4  ;;  %v1013_v4 = vadd.f32 %v1012_v40, %v4557_v58 }
 0x3a7   : > { %v920_v61 = vpop.f32.mrf.mxu2 }
 0x3a9   : > { %1345 = vmatmul.f32.gmra.mxu0 %v6282_v34 }
 0x3aa   : > { %v1024_v51 = vpop.f32.mrf.mxu3 }
 0x3af   : > { %v923_v46 = vpop.f32.mrf.mxu2 }
 0x3b1   : > { %1348 = vmatmul.f32.gmra.mxu0 %v6283_v24  ;;  %v1025_v24 = vadd.f32 %v1024_v51, %v911_v17  ;;  %v1016_v17 = vadd.f32 %v1015_v13, %v902_v37  ;;  %v1007_v13 = vadd.f32 %v4559_v11, %v4510_v62  ;;  %v6287_v62 = vld [vmem:[#allocation101_spill] sm:$0xff] }
 0x3b2   : > { %v1027_v8 = vpop.f32.mrf.mxu3 }
 0x3b3   : > { %v1028_v27 = vadd.f32 %v1027_v8, %v914_v48  ;;  %v1065_v58 = vsub.f32 %v1016_v17, %v4292_v41  ;;  %v1064_v48 = vsub.f32 %v1013_v4, %v4301_v56  ;;  %v6286_v8 = vld [vmem:[#allocation55_spill] sm:$0xff] }
 0x3b9   : > { %1351 = vmatmul.f32.gmra.mxu0 %v6284_v15 }
 0x3ba   : > { %v1030_v14 = vpop.f32.mrf.mxu3 }
 0x3bb   : > { %v1031_v23 = vadd.f32 %v1030_v14, %v917_v22  ;;  %v1019_v14 = vadd.f32 %v1018_v50, %v905_v63  ;;  %v926_v22 = vpop.f32.mrf.mxu2 }
 0x3bd   : > { %v1070_v16 = vsub.f32 %v1031_v23, %v4239_v53  ;;  %v1066_v50 = vsub.f32 %v1019_v14, %v4283_v59  ;;  %v6289_v14 = vld [vmem:[#allocation30_spill] sm:$0xff] }
 0x3bf   : > { %v1117_v51 = vmul.f32 %v4419_v1, %v1066_v50  ;;  %v6293_v50 = vld [vmem:[#allocation100_spill] sm:$0xff] }
 0x3c1   : > { %1354 = vmatmul.f32.gmra.mxu0 %v6285_v54  ;;  %v1069_v54 = vsub.f32 %v1028_v27, %v4251_v52  ;;  %v1067_v27 = vsub.f32 %v1022_v9, %v4272_v55 }
 0x3c2   : > { %v1033_v39 = vpop.f32.mrf.mxu3 }
 0x3c3   : > { %v1034_v28 = vadd.f32 %v1033_v39, %v920_v61  ;;  %v1068_v39 = vsub.f32 %v1025_v24, %v4259_v45  ;;  %v1118_v37 = vmul.f32 %v4419_v1, %v1067_v27  ;;  %v6291_v27 = vld [vmem:[#allocation29_spill] sm:$0xff] }
 0x3c5   : > { %v1071_v44 = vsub.f32 %v1034_v28, %v4232_v49  ;;  %v1121_v28 = vmul.f32 %v4419_v1, %v1070_v16  ;;  %v1119_v16 = vmul.f32 %v4419_v1, %v1068_v39  ;;  %v1001_v39 = vadd.f32 %v4537_v29, %v4424_v32 }
 0x3c7   : > { %v1122_v25 = vmul.f32 %v4419_v1, %v1071_v44  ;;  %v1004_v44 = vadd.f32 %v4555_v6, %v4459_v35  ;;  %v1115_v35 = vmul.f32 %v4419_v1, %v1064_v48  ;;  %v4637_v6 = vadd.f32 %v1117_v51, %v4283_v59  ;;  %v6299_v48 = vld [vmem:[#allocation27_spill] sm:$0xff]  ;;  %v6300_v51 = vld [vmem:[#allocation57_spill] sm:$0xff] }
 0x3c9   : > { %1357 = vmatmul.f32.gmra.mxu0 %v6159_v10  ;;  %v4585_v23 = vadd.f32 %v1122_v25, %v4232_v49  ;;  %v1010_v49 = vadd.f32 %v4561_v3, %v4544_v36  ;;  %v4613_v36 = vadd.f32 %v1119_v16, %v4259_v45  ;;  %v4626_v45 = vadd.f32 %v1118_v37, %v4272_v55 }
 0x3ca   : > { %v1036_v34 = vpop.f32.mrf.mxu3  ;;  %v1061_v16 = vsub.f32 %v1004_v44, %v6293_v50 }
 0x3cb   : > { %v1037_v12 = vadd.f32 %v1036_v34, %v923_v46  ;;  %v1186_v9 = vadd.f32 %v4585_v23, %v6170_v0  ;;  %v1063_v11 = vsub.f32 %v1010_v49, %v6287_v62  ;;  %v6296_v49 = vld [vmem:[#allocation106_spill] sm:$0xff] }
 0x3cd   : > { %v1072_v15 = vsub.f32 %v1037_v12, %v4228_v33  ;;  %v1218_v34 = vmul.f32 0.5, %v1186_v9  ;;  %v1114_v32 = vmul.f32 %v4419_v1, %v1063_v11  ;;  %v995_v9 = vadd.f32 %v4471_v18, %v6296_v49 }
 0x3ce   : > { %v1112_v11 = vmul.f32 %v4419_v1, %v1061_v16 }
 0x3cf   : > { %v1123_v61 = vmul.f32 %v4419_v1, %v1072_v15  ;;  %v1120_v15 = vmul.f32 %v4419_v1, %v1069_v54  ;;  %v1116_v54 = vmul.f32 %v4419_v1, %v1065_v58  ;;  %v6297_v58 = vld [vmem:[#allocation103_spill] sm:$0xff]  ;;  %v4663_v18 = vadd.f32 %v1114_v32, %v6287_v62 }
 0x3d0   : > { %v1060_v37 = vsub.f32 %v1001_v39, %v6297_v58  ;;  %v6304_v39 = vld [vmem:[#allocation105_spill] sm:$0xff] }
 0x3d1   : > { %v4581_v46 = vadd.f32 %v1123_v61, %v4228_v33  ;;  %1360 = vmatmul.f32.gmra.mxu0 %v6165_v19  ;;  %v4593_v33 = vadd.f32 %v1121_v28, %v4239_v53  ;;  %v4605_v40 = vadd.f32 %v1120_v15, %v4251_v52  ;;  %v6288_v61 = vld [vmem:[#allocation34_spill] sm:$0xff]  ;;  %v6290_v28 = vld [vmem:[#allocation102_spill] sm:$0xff]  ;;  %v1183_v15 = vadd.f32 %v4613_v36, %v6291_v27 }
 0x3d2   : > { %v1039_v12 = vpop.f32.mrf.mxu3  ;;  %v4646_v29 = vadd.f32 %v1116_v54, %v4292_v41  ;;  %v1181_v41 = vadd.f32 %v4637_v6, %v6299_v48  ;;  %6302 = vst [vmem:[#allocation117_spill] sm:$0xff] %v4663_v18 }
 0x3d3   : > { %v1040_v63 = vadd.f32 %v1039_v12, %v926_v22  ;;  %v1187_v25 = vadd.f32 %v4581_v46, %v6169_v43  ;;  %v1185_v52 = vadd.f32 %v4593_v33, %v6173_v2  ;;  %v1184_v22 = vadd.f32 %v4605_v40, %v6289_v14 }
 0x3d4   : > { %v1062_v12 = vsub.f32 %v1007_v13, %v6290_v28  ;;  %6294 = vst [vmem:[#allocation115_spill] sm:$0xff] %v4646_v29  ;;  %v1215_v13 = vmul.f32 0.5, %v1183_v15  ;;  %v1213_v15 = vmul.f32 0.5, %v1181_v41 }
 0x3d5   : > { %v1073_v30 = vsub.f32 %v1040_v63, %v4262_v21  ;;  %v1219_v24 = vmul.f32 0.5, %v1187_v25  ;;  %v1217_v55 = vmul.f32 0.5, %v1185_v52  ;;  %v6292_v63 = vld [vmem:[#allocation99_spill] sm:$0xff]  ;;  %v1216_v59 = vmul.f32 0.5, %v1184_v22  ;;  %v6301_v52 = vld [vmem:[#allocation104_spill] sm:$0xff] }
 0x3d6   : > { %v998_v4 = vadd.f32 %v4508_v47, %v6292_v63  ;;  %v1113_v47 = vmul.f32 %v4419_v1, %v1062_v12  ;;  %v1058_v12 = vsub.f32 %v995_v9, %v6304_v39  ;;  %v6306_v63 = vld [vmem:[#allocation25_spill] sm:$0xff]  ;;  %v6308_v9 = vld [vmem:[#allocation24_spill] sm:$0xff] }
 0x3d7   : > { %v1124_v53 = vmul.f32 %v4419_v1, %v1073_v30  ;;  %2876 = vtanh.f32 %v1219_v24  ;;  %v6295_v30 = vld [vmem:[#allocation28_spill] sm:$0xff] }
 0x3d8   : > { %2878 = vtanh.f32 %v1218_v34  ;;  %v1182_v25 = vadd.f32 %v4626_v45, %v6295_v30  ;;  %v1059_v44 = vsub.f32 %v998_v4, %v6301_v52 }
 0x3d9   : > { %v4616_v3 = vadd.f32 %v1124_v53, %v4262_v21  ;;  %1363 = vmatmul.f32.gmra.mxu0 %v6286_v8  ;;  %v4655_v53 = vadd.f32 %v1115_v35, %v4301_v56  ;;  %v1111_v35 = vmul.f32 %v4419_v1, %v1060_v37  ;;  %v1178_v37 = vadd.f32 %v4663_v18, %v6308_v9 }
 0x3da   : > { %v1214_v54 = vmul.f32 0.5, %v1182_v25  ;;  %v1110_v4 = vmul.f32 %v4419_v1, %v1059_v44  ;;  %v4676_v25 = vadd.f32 %v1112_v11, %v6293_v50  ;;  %v6311_v50 = vld [vmem:[#allocation59_spill] sm:$0xff] }
 0x3db   : > { %v1188_v21 = vadd.f32 %v4616_v3, %v6288_v61  ;;  %6298 = vst [vmem:[#allocation116_spill] sm:$0xff] %v4655_v53  ;;  %v1179_v62 = vadd.f32 %v4655_v53, %v6306_v63 }
 0x3dc   : > { %6307 = vst [vmem:[#allocation119_spill] sm:$0xff] %v4676_v25  ;;  %v4688_v9 = vadd.f32 %v1110_v4, %v6301_v52 }
 0x3dd   : > { %v1220_v17 = vmul.f32 0.5, %v1188_v21  ;;  %v2877_v34 = vpop.eup %2876  ;;  %v6303_v21 = vld [vmem:[#allocation26_spill] sm:$0xff]  ;;  %v1211_v44 = vmul.f32 0.5, %v1179_v62 }
 0x3de   : > { %v1180_v56 = vadd.f32 %v4646_v29, %v6303_v21  ;;  %v2879_v22 = vpop.eup %2878  ;;  %v1283_v32 = vmul.f32 0.5, %v2877_v34  ;;  %v6310_v34 = vld [vmem:[#allocation23_spill] sm:$0xff]  ;;  %6312 = vst [vmem:[#allocation101_spill] sm:$0xff] %v4688_v9  ;;  %v6361_v21 = vld [vmem:[#allocation84_spill] sm:$0xff] }
 0x3df   : > { %2880 = vtanh.f32 %v1220_v17 }
 0x3e0   : > { %2882 = vtanh.f32 %v1217_v55  ;;  %v4670_v55 = vadd.f32 %v1113_v47, %v6290_v28  ;;  %v1212_v49 = vmul.f32 0.5, %v1180_v56  ;;  %v1109_v28 = vmul.f32 %v4419_v1, %v1058_v12 }
 0x3e1   : > { %1366 = vmatmul.f32.gmra.mxu0 %v6300_v51  ;;  %2884 = vtanh.f32 %v1216_v59  ;;  %v4682_v51 = vadd.f32 %v1111_v35, %v6297_v58  ;;  %v1210_v1 = vmul.f32 0.5, %v1178_v37 }
 0x3e2   : > { %6305 = vst [vmem:[#allocation118_spill] sm:$0xff] %v4670_v55  ;;  %2886 = vtanh.f32 %v1215_v13  ;;  %v1282_v13 = vmul.f32 0.5, %v2879_v22  ;;  %v6313_v22 = vld [vmem:[#allocation22_spill] sm:$0xff]  ;;  %v4693_v62 = vadd.f32 %v1109_v28, %v6304_v39  ;;  %v6317_v28 = vld [vmem:[#allocation19_spill] sm:$0xff] }
 0x3e3   : > { %2888 = vtanh.f32 %v1214_v54  ;;  %6309 = vst [vmem:[#allocation120_spill] sm:$0xff] %v4682_v51  ;;  %v1315_v54 = vadd.f32 0.5, %v1283_v32  ;;  %v1176_v58 = vadd.f32 %v4676_v25, %v6313_v22  ;;  %v6315_v32 = vld [vmem:[#allocation21_spill] sm:$0xff]  ;;  %v6359_v22 = vld [vmem:[#allocation80_spill] sm:$0xff] }
 0x3e4   : > { %2890 = vtanh.f32 %v1213_v15  ;;  %v1314_v12 = vadd.f32 0.5, %v1282_v13  ;;  %6314 = vst [vmem:[#allocation102_spill] sm:$0xff] %v4693_v62 }
 0x3e5   : > { %v2881_v17 = vpop.eup %2880  ;;  %2892 = vtanh.f32 %v1212_v49  ;;  %v1208_v37 = vmul.f32 0.5, %v1176_v58 }
 0x3e6   : > { %v1284_v16 = vmul.f32 0.5, %v2881_v17  ;;  %v2883_v59 = vpop.eup %2882  ;;  %v1177_v17 = vadd.f32 %v4670_v55, %v6310_v34  ;;  %2894 = vtanh.f32 %v1211_v44  ;;  %v1173_v44 = vadd.f32 %v4693_v62, %v6317_v28 }
 0x3e7   : > { %v2885_v41 = vpop.eup %2884  ;;  %v1281_v56 = vmul.f32 0.5, %v2883_v59  ;;  %v1175_v59 = vadd.f32 %v4682_v51, %v6315_v32  ;;  %2896 = vtanh.f32 %v1210_v1 }
 0x3e8   : > { %v1316_v47 = vadd.f32 0.5, %v1284_v16  ;;  %v2887_v63 = vpop.eup %2886  ;;  %v1280_v35 = vmul.f32 0.5, %v2885_v41  ;;  %v1209_v16 = vmul.f32 0.5, %v1177_v17  ;;  %v6318_v17 = vld [vmem:[#allocation61_spill] sm:$0xff] }
 0x3e9   : > { %1369 = vmatmul.f32.gmra.mxu0 %v6311_v50  ;;  %v2889_v15 = vpop.eup %2888  ;;  %v1313_v52 = vadd.f32 0.5, %v1281_v56  ;;  %v1279_v4 = vmul.f32 0.5, %v2887_v63  ;;  %v1207_v39 = vmul.f32 0.5, %v1175_v59 }
 0x3ea   : > { %1430 = vmatpush.msrb.mxu1 %v1316_v47  ;;  %v2891_v49 = vpop.eup %2890  ;;  %v6316_v47 = vld [vmem:[#allocation20_spill] sm:$0xff]  ;;  %v1312_v13 = vadd.f32 0.5, %v1280_v35  ;;  %v1278_v41 = vmul.f32 0.5, %v2889_v15  ;;  %2898 = vtanh.f32 %v1209_v16  ;;  %v1205_v35 = vmul.f32 0.5, %v1173_v44 }
 0x3eb   : > { %v1174_v50 = vadd.f32 %v4688_v9, %v6316_v47  ;;  %v1311_v56 = vadd.f32 0.5, %v1279_v4  ;;  %v1277_v63 = vmul.f32 0.5, %v2891_v49  ;;  %2900 = vtanh.f32 %v1208_v37  ;;  %v6319_v4 = vld [vmem:[#allocation63_spill] sm:$0xff] }
 0x3ec   : > { %1431 = vmatpush.msrb.mxu1 %v1315_v54  ;;  %v2893_v54 = vpop.eup %2892  ;;  %v1310_v58 = vadd.f32 0.5, %v1278_v41  ;;  %2902 = vtanh.f32 %v1207_v39 }
 0x3ed   : > { %v1206_v1 = vmul.f32 0.5, %v1174_v50  ;;  %v1276_v47 = vmul.f32 0.5, %v2893_v54  ;;  %v1309_v15 = vadd.f32 0.5, %v1277_v63 }
 0x3ee   : > { %1432 = vmatpush.msrb.mxu1 %v1314_v12  ;;  %v2895_v12 = vpop.eup %2894 }
 0x3ef   : > { %v1275_v16 = vmul.f32 0.5, %v2895_v12  ;;  %2904 = vtanh.f32 %v1206_v1  ;;  %v1308_v28 = vadd.f32 0.5, %v1276_v47  ;;  %v6320_v1 = vld [vmem:[#allocation65_spill] sm:$0xff] }
 0x3f0   : > { %1433 = vmatpush.msrb.mxu1 %v1313_v52  ;;  %v2897_v52 = vpop.eup %2896  ;;  %2906 = vtanh.f32 %v1205_v35 }
 0x3f1   : > { %1372 = vmatmul.f32.gmra.mxu0 %v6318_v17  ;;  %v2899_v59 = vpop.eup %2898  ;;  %v1274_v17 = vmul.f32 0.5, %v2897_v52  ;;  %v1307_v49 = vadd.f32 0.5, %v1275_v16  ;;  %v6323_v16 = vld [vmem:[#allocation38_spill] sm:$0xff] }
 0x3f2   : > { %1434 = vmatpush.msrb.mxu1 %v1312_v13  ;;  %v2901_v13 = vpop.eup %2900  ;;  %v1273_v37 = vmul.f32 0.5, %v2899_v59  ;;  %v6324_v59 = vld [vmem:[#allocation69_spill] sm:$0xff] }
 0x3f3   : > { %v2903_v50 = vpop.eup %2902  ;;  %v1306_v41 = vadd.f32 0.5, %v1274_v17  ;;  %v1272_v54 = vmul.f32 0.5, %v2901_v13  ;;  %v6321_v17 = vld [vmem:[#allocation36_spill] sm:$0xff]  ;;  %v6355_v13 = vld [vmem:[#allocation97_spill] sm:$0xff] }
 0x3f4   : > { %1435 = vmatpush.msrb.mxu1 %v1311_v56  ;;  %v1305_v44 = vadd.f32 0.5, %v1273_v37  ;;  %v1271_v56 = vmul.f32 0.5, %v2903_v50  ;;  %v6326_v37 = vld [vmem:[#allocation71_spill] sm:$0xff]  ;;  %v6327_v50 = vld [vmem:[#allocation42_spill] sm:$0xff] }
 0x3f5   : > { %v2905_v39 = vpop.eup %2904  ;;  %v1304_v12 = vadd.f32 0.5, %v1272_v54  ;;  %v1576_v54 = vstv %s1575_s8 }
 0x3f6   : > { %1436 = vmatpush.msrb.mxu1 %v1310_v58  ;;  %v2907_v63 = vpop.eup %2906  ;;  %v1270_v47 = vmul.f32 0.5, %v2905_v39  ;;  %v1303_v58 = vadd.f32 0.5, %v1271_v56  ;;  %2908 = vrcp.f32 %v1576_v54  ;;  %v6329_v39 = vld [vmem:[#allocation44_spill] sm:$0xff]  ;;  %vm1582_vm9 = vweird.f32 %v1576_v54 }
 0x3f8   : > { %1437 = vmatpush.msrb.mxu1 %v1309_v15  ;;  %v1302_v52 = vadd.f32 0.5, %v1270_v47  ;;  %v6322_v15 = vld [vmem:[#allocation67_spill] sm:$0xff] }
 0x3f9   : > { %1375 = vmatmul.f32.gmra.mxu0 %v6319_v4 }
 0x3fa   : > { %1438 = vmatpush.msrb.mxu1 %v1308_v28  ;;  %v1269_v28 = vmul.f32 0.5, %v2907_v63 }
 0x3fc   : > { %1439 = vmatpush.msrb.mxu1 %v1307_v49  ;;  %v1301_v35 = vadd.f32 0.5, %v1269_v28  ;;  %v6325_v49 = vld [vmem:[#allocation40_spill] sm:$0xff]  ;;  %v2909_v56 = vpop.eup %2908  ;;  %v6334_v28 = vld [vmem:[#allocation79_spill] sm:$0xff] }
 0x3fd   : > { %v1578_v63 = vmul.f32 %v2909_v56, %v1576_v54  ;;  %vm1583_vm10 = vweird.f32 %v2909_v56 }
 0x3fe   : > { %1440 = vmatpush.msrb.mxu1 %v1306_v41  ;;  %v6328_v41 = vld [vmem:[#allocation73_spill] sm:$0xff]  ;;  %vm1584_vm11 = vmor %vm1582_vm9, %vm1583_vm10 }
 0x3ff   : > { %v1579_v47 = vsub.f32 1.0, %v1578_v63  ;;  %v6335_v63 = vld [vmem:[#allocation50_spill] sm:$0xff] }
 0x400   : > { %1441 = vmatpush.msrb.mxu1 %v1305_v44  ;;  %v6330_v44 = vld [vmem:[#allocation75_spill] sm:$0xff] }
 0x401   : > { %1378 = vmatmul.f32.gmra.mxu0 %v6320_v1  ;;  %v6356_v1 = vld [vmem:[#allocation74_spill] sm:$0xff] }
 0x402   : > { %1442 = vmatpush.msrb.mxu1 %v1304_v12  ;;  %v6357_v12 = vld [vmem:[#allocation76_spill] sm:$0xff] }
 0x404   : > { %1443 = vmatpush.msrb.mxu1 %v1303_v58  ;;  %v1580_v58 = vmul.f32 %v2909_v56, %v1579_v47  ;;  %v6336_v47 = vld [vmem:[#allocation81_spill] sm:$0xff] }
 0x406   : > { %1444 = vmatpush.msrb.mxu1 %v1302_v52  ;;  %v6331_v52 = vld [vmem:[#allocation46_spill] sm:$0xff] }
 0x408   : > { %1445 = vmatpush.msrb.mxu1 %v1301_v35  ;;  %v1586_v35 = vand.u32 2147483647, %v1576_v54 }
 0x409   : > { %1446 = vmatmul.f32.vlgmr.msrb.gmra.mxu1 %v6321_v17  ;;  %1381 = vmatmul.f32.gmra.mxu0 %v6322_v15  ;;  %v6354_v17 = vld [vmem:[#allocation72_spill] sm:$0xff]  ;;  %v6358_v15 = vld [vmem:[#allocation78_spill] sm:$0xff] }
 0x40a   : > { %vm1587_vm12 = vcmp.eq.f32.partialorder %v1586_v35, 8.507059e+37  ;;  %v4725_v35 = vpop.f32.mrf.mxu0 }
 0x411   : > { %1449 = vmatmul.f32.gmra.mxu1 %v6323_v16  ;;  %1384 = vmatmul.f32.gmra.mxu0 %v6324_v59  ;;  %v1588_v59 = vand.u32 2147483648, %v1576_v54  ;;  %v6338_v54 = vld [vmem:[#allocation54_spill] sm:$0xff] }
 0x419   : > { %1452 = vmatmul.f32.gmra.mxu1 %v6325_v49  ;;  %1387 = vmatmul.f32.gmra.mxu0 %v6326_v37  ;;  %v6332_v49 = vld [vmem:[#allocation77_spill] sm:$0xff]  ;;  %v1581_v37 = vadd.f32 %v2909_v56, %v1580_v58  ;;  %v6340_v58 = vld [vmem:[#allocation58_spill] sm:$0xff] }
 0x421   : > { %1455 = vmatmul.f32.gmra.mxu1 %v6327_v50  ;;  %1390 = vmatmul.f32.gmra.mxu0 %v6328_v41  ;;  %v1589_v50 = vor.u32 1.1754944e-38, %v1588_v59  ;;  %v1585_v41 = vsel %vm1584_vm11, %v2909_v56, %v1581_v37  ;;  %v6341_v56 = vld [vmem:[#allocation83_spill] sm:$0xff]  ;;  %v6342_v59 = vld [vmem:[#allocation60_spill] sm:$0xff]  ;;  %v4729_v37 = vpop.f32.mrf.mxu0 }
 0x429   : > { %1458 = vmatmul.f32.gmra.mxu1 %v6329_v39  ;;  %1393 = vmatmul.f32.gmra.mxu0 %v6330_v44  ;;  %v1590_v39 = vsel %vm1587_vm12, %v1589_v50, %v1585_v41  ;;  %v6333_v44 = vld [vmem:[#allocation48_spill] sm:$0xff]  ;;  %v6343_v50 = vld [vmem:[#allocation85_spill] sm:$0xff]  ;;  %v6344_v41 = vld [vmem:[#allocation62_spill] sm:$0xff] }
 0x42a   : > { %2442 = vpush %v1590_v39  ;;  %v4733_v39 = vpop.f32.mrf.mxu0 }
 0x431   : > { %1461 = vmatmul.f32.gmra.mxu1 %v6331_v52  ;;  %1396 = vmatmul.f32.gmra.mxu0 %v6332_v49  ;;  %v6337_v52 = vld [vmem:[#allocation52_spill] sm:$0xff] }
 0x432   : > { %v6339_v49 = vld [vmem:[#allocation56_spill] sm:$0xff] }
 0x439   : > { %1464 = vmatmul.f32.gmra.mxu1 %v6333_v44  ;;  %1399 = vmatmul.f32.gmra.mxu0 %v6334_v28  ;;  %v6345_v44 = vld [vmem:[#allocation87_spill] sm:$0xff] }
 0x441   : > { %1467 = vmatmul.f32.gmra.mxu1 %v6335_v63  ;;  %1402 = vmatmul.f32.gmra.mxu0 %v6336_v47  ;;  %v6346_v63 = vld [vmem:[#allocation64_spill] sm:$0xff]  ;;  %v4737_v47 = vpop.f32.mrf.mxu0 }
 0x449   : > { %1470 = vmatmul.f32.gmra.mxu1 %v6337_v52  ;;  %1405 = vmatmul.f32.gmra.mxu0 %v6341_v56  ;;  %v6347_v52 = vld [vmem:[#allocation89_spill] sm:$0xff] }
 0x451   : > { %1473 = vmatmul.f32.gmra.mxu1 %v6338_v54  ;;  %1408 = vmatmul.f32.gmra.mxu0 %v6343_v50  ;;  %v6348_v54 = vld [vmem:[#allocation66_spill] sm:$0xff] }
 0x459   : > { %1476 = vmatmul.f32.gmra.mxu1 %v6339_v49  ;;  %1411 = vmatmul.f32.gmra.mxu0 %v6345_v44  ;;  %v4741_v49 = vpop.f32.mrf.mxu0 }
 0x45b   : > { %s2443_s9 = spop %2442 }
 0x45c   : > { %s1592_s10 = smul.f32 2.0, %s2443_s9 }
 0x45e   : > { %v4778_v53 = vstv %s1592_s10 }
 0x461   : > { %1479 = vmatmul.f32.gmra.mxu1 %v6340_v58  ;;  %1414 = vmatmul.f32.gmra.mxu0 %v6347_v52  ;;  %v6349_v58 = vld [vmem:[#allocation91_spill] sm:$0xff]  ;;  %v4747_v50 = vpop.f32.mrf.mxu0 }
 0x462   : > { %v6353_v52 = vld [vmem:[#allocation95_spill] sm:$0xff] }
 0x469   : > { %1482 = vmatmul.f32.gmra.mxu1 %v6342_v59  ;;  %1417 = vmatmul.f32.gmra.mxu0 %v6349_v58  ;;  %v6350_v59 = vld [vmem:[#allocation68_spill] sm:$0xff]  ;;  %v4753_v16 = vpop.f32.mrf.mxu0 }
 0x471   : > { %1485 = vmatmul.f32.gmra.mxu1 %v6344_v41  ;;  %v6351_v41 = vld [vmem:[#allocation93_spill] sm:$0xff]  ;;  %v1355_v58 = vpop.f32.mrf.mxu0 }
 0x472   : > { %1420 = vmatmul.f32.gmra.mxu0 %v6351_v41 }
 0x479   : > { %1488 = vmatmul.f32.gmra.mxu1 %v6346_v63  ;;  %v6352_v63 = vld [vmem:[#allocation70_spill] sm:$0xff]  ;;  %v1358_v41 = vpop.f32.mrf.mxu0 }
 0x47a   : > { %1423 = vmatmul.f32.gmra.mxu0 %v6353_v52 }
 0x481   : > { %1491 = vmatmul.f32.gmra.mxu1 %v6348_v54 }
 0x482   : > { %1426 = vmatmul.f32.gmra.mxu0 %v6355_v13  ;;  %v6360_v13 = vld [vmem:[#allocation82_spill] sm:$0xff] }
 0x486   : > { %v4744_v56 = vpop.f32.mrf.mxu1 }
 0x489   : > { %1494 = vmatmul.f32.gmra.mxu1 %v6350_v59 }
 0x48e   : > { %v4750_v44 = vpop.f32.mrf.mxu1 }
 0x491   : > { %1497 = vmatmul.f32.gmra.mxu1 %v6352_v63  ;;  %v1361_v63 = vpop.f32.mrf.mxu0 }
 0x496   : > { %v4756_v54 = vpop.f32.mrf.mxu1 }
 0x499   : > { %1500 = vmatmul.f32.gmra.mxu1 %v6354_v17  ;;  %v1364_v52 = vpop.f32.mrf.mxu0 }
 0x49e   : > { %v4760_v59 = vpop.f32.mrf.mxu1 }
 0x4a1   : > { %1503 = vmatmul.f32.gmra.mxu1 %v6356_v1  ;;  %v1367_v17 = vpop.f32.mrf.mxu0 }
 0x4a6   : > { %v4763_v4 = vpop.f32.mrf.mxu1 }
 0x4a9   : > { %1506 = vmatmul.f32.gmra.mxu1 %v6357_v12  ;;  %v1370_v34 = vpop.f32.mrf.mxu0  ;;  %v6362_v12 = vld [vmem:[#allocation86_spill] sm:$0xff] }
 0x4ae   : > { %v1462_v32 = vpop.f32.mrf.mxu1 }
 0x4b1   : > { %1509 = vmatmul.f32.gmra.mxu1 %v6358_v15  ;;  %v1373_v9 = vpop.f32.mrf.mxu0  ;;  %v6363_v15 = vld [vmem:[#allocation88_spill] sm:$0xff] }
 0x4b6   : > { %v1465_v28 = vpop.f32.mrf.mxu1 }
 0x4b9   : > { %1512 = vmatmul.f32.gmra.mxu1 %v6359_v22  ;;  %v1376_v48 = vpop.f32.mrf.mxu0  ;;  %v6364_v22 = vld [vmem:[#allocation90_spill] sm:$0xff] }
 0x4be   : > { %v1468_v11 = vpop.f32.mrf.mxu1 }
 0x4c1   : > { %1515 = vmatmul.f32.gmra.mxu1 %v6360_v13  ;;  %v1379_v30 = vpop.f32.mrf.mxu0  ;;  %v6365_v13 = vld [vmem:[#allocation92_spill] sm:$0xff] }
 0x4c6   : > { %v1471_v62 = vpop.f32.mrf.mxu1 }
 0x4c7   : > { %v1472_v1 = vadd.f32 %v1471_v62, %v1358_v41  ;;  %v6366_v41 = vld [vmem:[#allocation94_spill] sm:$0xff] }
 0x4c9   : > { %1518 = vmatmul.f32.gmra.mxu1 %v6361_v21  ;;  %v1382_v55 = vpop.f32.mrf.mxu0 }
 0x4ce   : > { %v1474_v24 = vpop.f32.mrf.mxu1 }
 0x4d1   : > { %1521 = vmatmul.f32.gmra.mxu1 %v6362_v12  ;;  %v4774_v62 = vpop.f32.mrf.mxu0 }
 0x4d6   : > { %v1477_v51 = vpop.f32.mrf.mxu1 }
 0x4d9   : > { %1524 = vmatmul.f32.gmra.mxu1 %v6363_v15  ;;  %v4784_v21 = vpop.f32.mrf.mxu0 }
 0x4de   : > { %v1480_v25 = vpop.f32.mrf.mxu1 }
 0x4df   : > { %v1481_v8 = vadd.f32 %v1480_v25, %v1367_v17 }
 0x4e1   : > { %1527 = vmatmul.f32.gmra.mxu1 %v6364_v22  ;;  %v1478_v22 = vadd.f32 %v1477_v51, %v1364_v52  ;;  %v1469_v51 = vadd.f32 %v1468_v11, %v1355_v58  ;;  %v6370_v11 = vld [vmem:[#allocation98_spill] sm:$0xff]  ;;  %v6372_v58 = vld [vmem:[#allocation107_spill] sm:$0xff]  ;;  %v1460_v52 = vadd.f32 %v4763_v4, %v4741_v49  ;;  %v6379_v4 = vld [vmem:[#allocation109_spill] sm:$0xff] }
 0x4e6   : > { %v1483_v27 = vpop.f32.mrf.mxu1 }
 0x4e7   : > { %v1484_v12 = vadd.f32 %v1483_v27, %v1370_v34  ;;  %v1554_v27 = vsub.f32 %v1481_v8, %v4453_v5  ;;  %v1466_v8 = vadd.f32 %v1465_v28, %v4753_v16 }
 0x4e9   : > { %1530 = vmatmul.f32.gmra.mxu1 %v6365_v13  ;;  %v1555_v29 = vsub.f32 %v1484_v12, %v4442_v7  ;;  %v1463_v12 = vadd.f32 %v1462_v32, %v4747_v50  ;;  %v4821_v32 = vpop.f32.mrf.mxu0 }
 0x4eb   : > { %v1606_v25 = vmul.f32 %v4778_v53, %v1555_v29  ;;  %v1548_v49 = vsub.f32 %v1463_v12, %v6379_v4  ;;  %v6383_v12 = vld [vmem:[#allocation13_spill] sm:$0xff] }
 0x4ed   : > { %v4802_v29 = vadd.f32 %v1606_v25, %v4442_v7 }
 0x4ee   : > { %v1486_v14 = vpop.f32.mrf.mxu1 }
 0x4ef   : > { %v1487_v61 = vadd.f32 %v1486_v14, %v1373_v9  ;;  %v1475_v14 = vadd.f32 %v1474_v24, %v1361_v63  ;;  %v1605_v24 = vmul.f32 %v4778_v53, %v1554_v27  ;;  %6369 = vst [vmem:[#allocation106_spill] sm:$0xff] %v4802_v29  ;;  %v6373_v63 = vld [vmem:[#allocation16_spill] sm:$0xff] }
 0x4f1   : > { %1533 = vmatmul.f32.gmra.mxu1 %v6366_v41  ;;  %v1556_v18 = vsub.f32 %v1487_v61, %v4435_v42  ;;  %v4814_v28 = vadd.f32 %v1605_v24, %v4453_v5  ;;  %v6378_v5 = vld [vmem:[#allocation15_spill] sm:$0xff] }
 0x4f2   : > { %v1670_v25 = vadd.f32 %v4802_v29, %v6378_v5 }
 0x4f3   : > { %v1607_v41 = vmul.f32 %v4778_v53, %v1556_v18  ;;  %v1552_v18 = vsub.f32 %v1475_v14, %v4475_v31  ;;  %6374 = vst [vmem:[#allocation103_spill] sm:$0xff] %v4814_v28 }
 0x4f6   : > { %v1489_v15 = vpop.f32.mrf.mxu1 }
 0x4f7   : > { %v1490_v2 = vadd.f32 %v1489_v15, %v1376_v48  ;;  %v1553_v48 = vsub.f32 %v1478_v22, %v4462_v38  ;;  %v1551_v15 = vsub.f32 %v1472_v1, %v4485_v60  ;;  %v1603_v1 = vmul.f32 %v4778_v53, %v1552_v18 }
 0x4f9   : > { %v1557_v13 = vsub.f32 %v1490_v2, %v4432_v26  ;;  %1536 = vmatmul.f32.gmra.mxu1 %v6132_v20  ;;  %v4794_v2 = vadd.f32 %v1607_v41, %v4435_v42  ;;  %v1604_v22 = vmul.f32 %v4778_v53, %v1553_v48  ;;  %v6371_v42 = vld [vmem:[#allocation17_spill] sm:$0xff]  ;;  %v6375_v41 = vld [vmem:[#allocation108_spill] sm:$0xff]  ;;  %v1602_v27 = vmul.f32 %v4778_v53, %v1551_v15 }
 0x4fa   : > { %v1549_v14 = vsub.f32 %v1466_v8, %v6375_v41  ;;  %v6381_v15 = vld [vmem:[#allocation14_spill] sm:$0xff] }
 0x4fb   : > { %v1608_v61 = vmul.f32 %v4778_v53, %v1557_v13  ;;  %6368 = vst [vmem:[#allocation100_spill] sm:$0xff] %v4794_v2  ;;  %v1671_v16 = vadd.f32 %v4794_v2, %v6373_v63  ;;  %v4824_v50 = vadd.f32 %v1604_v22, %v4462_v38  ;;  %v1669_v22 = vadd.f32 %v4814_v28, %v6381_v15  ;;  %v6411_v2 = vld [vmem:[#allocation47_spill] sm:$0xff] }
 0x4fc   : > { %v1451_v63 = vadd.f32 %v4750_v44, %v4729_v37 }
 0x4fd   : > { %v4791_v9 = vadd.f32 %v1608_v61, %v4432_v26  ;;  %6376 = vst [vmem:[#allocation104_spill] sm:$0xff] %v4824_v50  ;;  %v1703_v24 = vmul.f32 0.5, %v1671_v16  ;;  %v6384_v16 = vld [vmem:[#allocation111_spill] sm:$0xff] }
 0x4fe   : > { %v1492_v34 = vpop.f32.mrf.mxu1 }
 0x4ff   : > { %6367 = vst [vmem:[#allocation99_spill] sm:$0xff] %v4791_v9  ;;  %v1493_v17 = vadd.f32 %v1492_v34, %v1379_v30  ;;  %v1672_v13 = vadd.f32 %v4791_v9, %v6371_v42  ;;  %v1550_v30 = vsub.f32 %v1469_v51, %v6372_v58  ;;  %v1457_v51 = vadd.f32 %v4760_v59, %v4737_v47  ;;  %v6382_v59 = vld [vmem:[#allocation110_spill] sm:$0xff] }
 0x500   : > { %v1454_v47 = vadd.f32 %v4756_v54, %v4733_v39  ;;  %v1600_v42 = vmul.f32 %v4778_v53, %v1549_v14  ;;  %v1599_v39 = vmul.f32 %v4778_v53, %v1548_v49  ;;  %v1448_v14 = vadd.f32 %v4744_v56, %v4725_v35  ;;  %v4876_v56 = vpop.f32.mrf.mxu0 }
 0x501   : > { %v1558_v26 = vsub.f32 %v1493_v17, %v4465_v57  ;;  %1539 = vmatmul.f32.gmra.mxu1 %v6370_v11  ;;  %v1704_v48 = vmul.f32 0.5, %v1672_v13  ;;  %v1601_v34 = vmul.f32 %v4778_v53, %v1550_v30  ;;  %v4836_v17 = vadd.f32 %v1603_v1, %v4475_v31 }
 0x502   : > { %v4849_v13 = vadd.f32 %v1602_v27, %v4485_v60  ;;  %v1668_v30 = vadd.f32 %v4824_v50, %v6383_v12  ;;  %v1546_v1 = vsub.f32 %v1457_v51, %v6384_v16  ;;  %v1701_v60 = vmul.f32 0.5, %v1669_v22  ;;  %v6386_v27 = vld [vmem:[#allocation112_spill] sm:$0xff]  ;;  %v6388_v51 = vld [vmem:[#allocation113_spill] sm:$0xff]  ;;  %v6391_v12 = vld [vmem:[#allocation9_spill] sm:$0xff] }
 0x503   : > { %v1609_v7 = vmul.f32 %v4778_v53, %v1558_v26  ;;  %v1547_v26 = vsub.f32 %v1460_v52, %v6382_v59  ;;  %2910 = vtanh.f32 %v1704_v48  ;;  %v4858_v54 = vadd.f32 %v1601_v34, %v6372_v58 }
 0x504   : > { %2912 = vtanh.f32 %v1703_v24  ;;  %v1545_v48 = vsub.f32 %v1454_v47, %v6386_v27  ;;  %v4867_v44 = vadd.f32 %v1600_v42, %v6375_v41  ;;  %v1700_v5 = vmul.f32 0.5, %v1668_v30  ;;  %v6390_v47 = vld [vmem:[#allocation114_spill] sm:$0xff] }
 0x505   : > { %v4827_v61 = vadd.f32 %v1609_v7, %v4465_v57  ;;  %v6380_v57 = vld [vmem:[#allocation18_spill] sm:$0xff]  ;;  %v6385_v7 = vld [vmem:[#allocation12_spill] sm:$0xff]  ;;  %v1598_v37 = vmul.f32 %v4778_v53, %v1547_v26  ;;  %v1544_v49 = vsub.f32 %v1451_v63, %v6388_v51  ;;  %v1597_v34 = vmul.f32 %v4778_v53, %v1546_v1 }
 0x506   : > { %v1495_v18 = vpop.f32.mrf.mxu1  ;;  %v1667_v52 = vadd.f32 %v4836_v17, %v6385_v7  ;;  %v1543_v26 = vsub.f32 %v1448_v14, %v6390_v47  ;;  %v1596_v42 = vmul.f32 %v4778_v53, %v1545_v48 }
 0x507   : > { %6377 = vst [vmem:[#allocation105_spill] sm:$0xff] %v4827_v61  ;;  %v4838_v38 = vadd.f32 %v1495_v18, %v1382_v55  ;;  %v1673_v8 = vadd.f32 %v4827_v61, %v6380_v57  ;;  %v1702_v55 = vmul.f32 0.5, %v1670_v25  ;;  %v6387_v25 = vld [vmem:[#allocation11_spill] sm:$0xff]  ;;  %v4874_v18 = vadd.f32 %v1599_v39, %v6379_v4 }
 0x508   : > { %v1666_v58 = vadd.f32 %v4849_v13, %v6387_v25  ;;  %v1699_v41 = vmul.f32 0.5, %v1667_v52  ;;  %v4886_v4 = vadd.f32 %v1598_v37, %v6382_v59  ;;  %v1595_v30 = vmul.f32 %v4778_v53, %v1544_v49  ;;  %v6392_v52 = vld [vmem:[#allocation7_spill] sm:$0xff]  ;;  %v6394_v49 = vld [vmem:[#allocation6_spill] sm:$0xff] }
 0x509   : > { %v1705_v31 = vmul.f32 0.5, %v1673_v8  ;;  %v2911_v24 = vpop.eup %2910  ;;  %v6389_v8 = vld [vmem:[#allocation10_spill] sm:$0xff]  ;;  %v1663_v14 = vadd.f32 %v4874_v18, %v6392_v52  ;;  %v1594_v59 = vmul.f32 %v4778_v53, %v1543_v26  ;;  %v4900_v25 = vadd.f32 %v1596_v42, %v6386_v27  ;;  %v6400_v52 = vld [vmem:[#allocation3_spill] sm:$0xff] }
 0x50a   : > { %v1665_v15 = vadd.f32 %v4858_v54, %v6389_v8  ;;  %v2913_v22 = vpop.eup %2912  ;;  %v1768_v1 = vmul.f32 0.5, %v2911_v24 }
 0x50b   : > { %2914 = vtanh.f32 %v1705_v31  ;;  %v1767_v37 = vmul.f32 0.5, %v2913_v22  ;;  %v1695_v27 = vmul.f32 0.5, %v1663_v14  ;;  %v6396_v22 = vld [vmem:[#allocation5_spill] sm:$0xff] }
 0x50c   : > { %2916 = vtanh.f32 %v1702_v55  ;;  %v1698_v55 = vmul.f32 0.5, %v1666_v58  ;;  %v1697_v7 = vmul.f32 0.5, %v1665_v15  ;;  %v4908_v24 = vadd.f32 0.5, %v1768_v1 }
 0x50d   : > { %2918 = vtanh.f32 %v1701_v60  ;;  %v4892_v60 = vadd.f32 %v1597_v34, %v6384_v16  ;;  %v1662_v16 = vadd.f32 %v4886_v4, %v6394_v49  ;;  %v4905_v34 = vadd.f32 %v1595_v30, %v6388_v51 }
 0x50e   : > { %v1498_v35 = vpop.f32.mrf.mxu1  ;;  %2920 = vtanh.f32 %v1700_v5  ;;  %6395 = vst [vmem:[#allocation108_spill] sm:$0xff] %v4908_v24  ;;  %v4916_v42 = vadd.f32 0.5, %v1767_v37 }
 0x50f   : > { %v4879_v57 = vadd.f32 %v1498_v35, %v4774_v62  ;;  %v1664_v62 = vadd.f32 %v4867_v44, %v6391_v12  ;;  %2922 = vtanh.f32 %v1699_v41  ;;  %v1661_v26 = vadd.f32 %v4892_v60, %v6396_v22 }
 0x510   : > { %2924 = vtanh.f32 %v1698_v55  ;;  %6397 = vst [vmem:[#allocation109_spill] sm:$0xff] %v4916_v42  ;;  %v4921_v12 = vadd.f32 %v1594_v59, %v6390_v47  ;;  %v1659_v14 = vadd.f32 %v4905_v34, %v6400_v52 }
 0x511   : > { %v2915_v31 = vpop.eup %2914  ;;  %v1696_v58 = vmul.f32 0.5, %v1664_v62  ;;  %2926 = vtanh.f32 %v1697_v7  ;;  %v1694_v62 = vmul.f32 0.5, %v1662_v16  ;;  %v1693_v7 = vmul.f32 0.5, %v1661_v26 }
 0x512   : > { %v1769_v63 = vmul.f32 0.5, %v2915_v31  ;;  %v2917_v39 = vpop.eup %2916  ;;  %v4918_v31 = vpop.f32.mrf.mxu0  ;;  %v1691_v22 = vmul.f32 0.5, %v1659_v14 }
 0x513   : > { %v2919_v5 = vpop.eup %2918  ;;  %v1766_v41 = vmul.f32 0.5, %v2917_v39  ;;  %2928 = vtanh.f32 %v1696_v58  ;;  %v6402_v58 = vld [vmem:[#allocation2_spill] sm:$0xff] }
 0x514   : > { %v4897_v48 = vadd.f32 0.5, %v1769_v63  ;;  %v2921_v8 = vpop.eup %2920  ;;  %v1765_v51 = vmul.f32 0.5, %v2919_v5  ;;  %2930 = vtanh.f32 %v1695_v27  ;;  %v1658_v49 = vadd.f32 %v4921_v12, %v6402_v58 }
 0x515   : > { %v2923_v55 = vpop.eup %2922  ;;  %v4926_v63 = vadd.f32 0.5, %v1766_v41  ;;  %v1764_v1 = vmul.f32 0.5, %v2921_v8  ;;  %2932 = vtanh.f32 %v1694_v62 }
 0x516   : > { %6393 = vst [vmem:[#allocation107_spill] sm:$0xff] %v4897_v48  ;;  %v1501_v35 = vpop.f32.mrf.mxu1  ;;  %1818 = vmatpush.msrb.mxu2 %v4897_v48  ;;  %v2925_v39 = vpop.eup %2924  ;;  %v4931_v47 = vadd.f32 0.5, %v1765_v51  ;;  %v1763_v59 = vmul.f32 0.5, %v2923_v55  ;;  %2934 = vtanh.f32 %v1693_v7  ;;  %v1690_v62 = vmul.f32 0.5, %v1658_v49 }
 0x517   : > { %v4911_v15 = vadd.f32 %v1501_v35, %v4784_v21  ;;  %v6398_v21 = vld [vmem:[#allocation4_spill] sm:$0xff]  ;;  %6399 = vst [vmem:[#allocation110_spill] sm:$0xff] %v4926_v63  ;;  %v2927_v37 = vpop.eup %2926  ;;  %v4936_v35 = vadd.f32 0.5, %v1764_v1  ;;  %v1762_v41 = vmul.f32 0.5, %v2925_v39 }
 0x518   : > { %1819 = vmatpush.msrb.mxu2 %v4908_v24  ;;  %v1660_v30 = vadd.f32 %v4900_v25, %v6398_v21  ;;  %6401 = vst [vmem:[#allocation111_spill] sm:$0xff] %v4931_v47  ;;  %v4942_v26 = vadd.f32 0.5, %v1763_v59  ;;  %v1761_v51 = vmul.f32 0.5, %v2927_v37  ;;  %v6408_v24 = vld [vmem:[#allocation41_spill] sm:$0xff] }
 0x519   : > { %6403 = vst [vmem:[#allocation112_spill] sm:$0xff] %v4936_v35  ;;  %v2929_v8 = vpop.eup %2928  ;;  %v4945_v21 = vadd.f32 0.5, %v1762_v41 }
 0x51a   : > { %1820 = vmatpush.msrb.mxu2 %v4916_v42  ;;  %v1692_v5 = vmul.f32 0.5, %v1660_v30  ;;  %6404 = vst [vmem:[#allocation113_spill] sm:$0xff] %v4942_v26  ;;  %v2931_v55 = vpop.eup %2930  ;;  %v1760_v30 = vmul.f32 0.5, %v2929_v8  ;;  %v1400_v1 = vpop.f32.mrf.mxu0 }
 0x51b   : > { %v2933_v39 = vpop.eup %2932  ;;  %v1759_v7 = vmul.f32 0.5, %v2931_v55 }
 0x51c   : > { %1821 = vmatpush.msrb.mxu2 %v4926_v63  ;;  %2936 = vtanh.f32 %v1692_v5  ;;  %v2935_v52 = vpop.eup %2934  ;;  %v4951_v59 = vadd.f32 0.5, %v1760_v30  ;;  %v1758_v37 = vmul.f32 0.5, %v2933_v39  ;;  %v6412_v63 = vld [vmem:[#allocation49_spill] sm:$0xff] }
 0x51d   : > { %2938 = vtanh.f32 %v1691_v22  ;;  %v4957_v49 = vadd.f32 0.5, %v1759_v7 }
 0x51e   : > { %v1504_v16 = vpop.f32.mrf.mxu1  ;;  %1822 = vmatpush.msrb.mxu2 %v4931_v47  ;;  %2940 = vtanh.f32 %v1690_v62  ;;  %v4960_v8 = vadd.f32 0.5, %v1758_v37 }
 0x51f   : > { %v4939_v27 = vadd.f32 %v1504_v16, %v4821_v32  ;;  %v4948_v32 = vadd.f32 0.5, %v1761_v51  ;;  %v1757_v16 = vmul.f32 0.5, %v2935_v52 }
 0x520   : > { %1823 = vmatpush.msrb.mxu2 %v4936_v35 }
 0x521   : > { %v4963_v55 = vadd.f32 0.5, %v1757_v16 }
 0x522   : > { %1824 = vmatpush.msrb.mxu2 %v4942_v26  ;;  %v2937_v5 = vpop.eup %2936  ;;  %v1403_v30 = vpop.f32.mrf.mxu0 }
 0x523   : > { %v2939_v41 = vpop.eup %2938  ;;  %v1756_v22 = vmul.f32 0.5, %v2937_v5  ;;  %v6405_v5 = vld [vmem:[#allocation35_spill] sm:$0xff] }
 0x524   : > { %1825 = vmatpush.msrb.mxu2 %v4945_v21  ;;  %v2941_v51 = vpop.eup %2940  ;;  %v1755_v62 = vmul.f32 0.5, %v2939_v41 }
 0x525   : > { %v4966_v39 = vadd.f32 0.5, %v1756_v22  ;;  %v1754_v7 = vmul.f32 0.5, %v2941_v51  ;;  %v6406_v51 = vld [vmem:[#allocation37_spill] sm:$0xff] }
 0x526   : > { %v1507_v14 = vpop.f32.mrf.mxu1  ;;  %1826 = vmatpush.msrb.mxu2 %v4948_v32 }
 0x527   : > { %v4954_v58 = vadd.f32 %v1507_v14, %v4876_v56  ;;  %v4972_v14 = vadd.f32 0.5, %v1755_v62  ;;  %v4975_v37 = vadd.f32 0.5, %v1754_v7  ;;  %v6407_v62 = vld [vmem:[#allocation39_spill] sm:$0xff] }
 0x528   : > { %1827 = vmatpush.msrb.mxu2 %v4951_v59 }
 0x52a   : > { %1828 = vmatpush.msrb.mxu2 %v4957_v49  ;;  %v1406_v41 = vpop.f32.mrf.mxu0 }
 0x52c   : > { %1829 = vmatpush.msrb.mxu2 %v4960_v8 }
 0x52e   : > { %v1510_v56 = vpop.f32.mrf.mxu1  ;;  %1830 = vmatpush.msrb.mxu2 %v4963_v55 }
 0x52f   : > { %v4969_v52 = vadd.f32 %v1510_v56, %v4918_v31 }
 0x530   : > { %1831 = vmatpush.msrb.mxu2 %v4966_v39 }
 0x532   : > { %1832 = vmatpush.msrb.mxu2 %v4972_v14  ;;  %v1409_v48 = vpop.f32.mrf.mxu0 }
 0x534   : > { %1833 = vmatpush.msrb.mxu2 %v4975_v37 }
 0x535   : > { %1834 = vmatmul.f32.vlgmr.msrb.gmra.mxu2 %v6405_v5  ;;  %v6409_v5 = vld [vmem:[#allocation43_spill] sm:$0xff] }
 0x536   : > { %v1513_v16 = vpop.f32.mrf.mxu1 }
 0x537   : > { %v4979_v22 = vadd.f32 %v1513_v16, %v1400_v1  ;;  %v6410_v1 = vld [vmem:[#allocation45_spill] sm:$0xff] }
 0x53a   : > { %v1412_v7 = vpop.f32.mrf.mxu0 }
 0x53d   : > { %1837 = vmatmul.f32.gmra.mxu2 %v6406_v51 }
 0x53e   : > { %v1516_v31 = vpop.f32.mrf.mxu1 }
 0x53f   : > { %v4982_v56 = vadd.f32 %v1516_v31, %v1403_v30 }
 0x542   : > { %v1415_v20 = vpop.f32.mrf.mxu0 }
 0x545   : > { %1840 = vmatmul.f32.gmra.mxu2 %v6407_v62 }
 0x546   : > { %v1519_v61 = vpop.f32.mrf.mxu1 }
 0x547   : > { %v1520_v11 = vadd.f32 %v1519_v61, %v1406_v41 }
 0x54a   : > { %v1418_v51 = vpop.f32.mrf.mxu0 }
 0x54d   : > { %1843 = vmatmul.f32.gmra.mxu2 %v6408_v24 }
 0x54e   : > { %v1522_v9 = vpop.f32.mrf.mxu1 }
 0x54f   : > { %v1523_v26 = vadd.f32 %v1522_v9, %v1409_v48 }
 0x551   : > { %v1568_v9 = vsub.f32 %v1523_v26, %v4626_v45 }
 0x552   : > { %v1421_v31 = vpop.f32.mrf.mxu0 }
 0x555   : > { %1846 = vmatmul.f32.gmra.mxu2 %v6409_v5 }
 0x556   : > { %v1525_v42 = vpop.f32.mrf.mxu1 }
 0x55a   : > { %v1424_v41 = vpop.f32.mrf.mxu0 }
 0x55d   : > { %1849 = vmatmul.f32.gmra.mxu2 %v6410_v1  ;;  %v1526_v1 = vadd.f32 %v1525_v42, %v1412_v7 }
 0x55e   : > { %v1528_v16 = vpop.f32.mrf.mxu1 }
 0x55f   : > { %v1529_v47 = vadd.f32 %v1528_v16, %v1415_v20 }
 0x565   : > { %1852 = vmatmul.f32.gmra.mxu2 %v6411_v2 }
 0x566   : > { %v1531_v30 = vpop.f32.mrf.mxu1 }
 0x567   : > { %v1532_v29 = vadd.f32 %v1531_v30, %v1418_v51  ;;  %v1427_v51 = vpop.f32.mrf.mxu0  ;;  %v1569_v30 = vsub.f32 %v1526_v1, %v4613_v36 }
 0x569   : > { %v1571_v35 = vsub.f32 %v1532_v29, %v4593_v33  ;;  %v1620_v7 = vmul.f32 %v4778_v53, %v1569_v30 }
 0x56d   : > { %1855 = vmatmul.f32.gmra.mxu2 %v6412_v63  ;;  %v1570_v63 = vsub.f32 %v1529_v47, %v4605_v40  ;;  %v1567_v47 = vsub.f32 %v1520_v11, %v4637_v6 }
 0x56e   : > { %v1534_v62 = vpop.f32.mrf.mxu1 }
 0x56f   : > { %v1535_v61 = vadd.f32 %v1534_v62, %v1421_v31  ;;  %v1622_v62 = vmul.f32 %v4778_v53, %v1571_v35  ;;  %v1621_v48 = vmul.f32 %v4778_v53, %v1570_v63  ;;  %v6418_v63 = vld [vmem:[#allocation55_spill] sm:$0xff] }
 0x571   : > { %v1572_v24 = vsub.f32 %v1535_v61, %v4585_v23  ;;  %v5011_v35 = vadd.f32 %v1622_v62, %v4593_v33  ;;  %v1619_v61 = vmul.f32 %v4778_v53, %v1568_v9  ;;  %v5022_v11 = vadd.f32 %v1621_v48, %v4605_v40  ;;  %v6415_v33 = vld [vmem:[#allocation116_spill] sm:$0xff]  ;;  %v6419_v40 = vld [vmem:[#allocation117_spill] sm:$0xff]  ;;  %v6422_v9 = vld [vmem:[#allocation118_spill] sm:$0xff] }
 0x572   : > { %v1563_v48 = vsub.f32 %v4954_v58, %v6422_v9 }
 0x573   : > { %v1623_v50 = vmul.f32 %v4778_v53, %v1572_v24  ;;  %v1565_v24 = vsub.f32 %v4979_v22, %v6415_v33  ;;  %v5041_v30 = vadd.f32 %v1619_v61, %v4626_v45 }
 0x575   : > { %1858 = vmatmul.f32.gmra.mxu2 %v6159_v10  ;;  %v5004_v29 = vadd.f32 %v1623_v50, %v4585_v23  ;;  %v6414_v50 = vld [vmem:[#allocation115_spill] sm:$0xff] }
 0x576   : > { %v1537_v5 = vpop.f32.mrf.mxu1  ;;  %v1566_v26 = vsub.f32 %v4982_v56, %v6414_v50  ;;  %v6417_v56 = vld [vmem:[#allocation31_spill] sm:$0xff] }
 0x577   : > { %v1538_v28 = vadd.f32 %v1537_v5, %v1424_v41  ;;  %v1687_v23 = vadd.f32 %v5004_v29, %v6170_v0  ;;  %v1618_v5 = vmul.f32 %v4778_v53, %v1567_v47 }
 0x578   : > { %v1617_v22 = vmul.f32 %v4778_v53, %v1566_v26 }
 0x579   : > { %v1573_v2 = vsub.f32 %v1538_v28, %v4581_v46  ;;  %v5051_v47 = vadd.f32 %v1618_v5, %v4637_v6 }
 0x57a   : > { %v5059_v61 = vadd.f32 %v1617_v22, %v6414_v50  ;;  %v6428_v50 = vld [vmem:[#allocation57_spill] sm:$0xff] }
 0x57b   : > { %v1624_v31 = vmul.f32 %v4778_v53, %v1573_v2  ;;  %v1686_v2 = vadd.f32 %v5011_v35, %v6417_v56 }
 0x57d   : > { %v5000_v20 = vadd.f32 %v1624_v31, %v4581_v46  ;;  %1861 = vmatmul.f32.gmra.mxu2 %v6165_v19  ;;  %v1564_v31 = vsub.f32 %v4969_v52, %v6419_v40 }
 0x57e   : > { %v1540_v28 = vpop.f32.mrf.mxu1 }
 0x57f   : > { %6413 = vst [vmem:[#allocation114_spill] sm:$0xff] %v5000_v20  ;;  %v1541_v42 = vadd.f32 %v1540_v28, %v1427_v51  ;;  %v1688_v16 = vadd.f32 %v5000_v20, %v6169_v43  ;;  %v5029_v43 = vadd.f32 %v1620_v7, %v4613_v36  ;;  %v1719_v51 = vmul.f32 0.5, %v1687_v23  ;;  %v6420_v36 = vld [vmem:[#allocation34_spill] sm:$0xff] }
 0x580   : > { %v1718_v7 = vmul.f32 0.5, %v1686_v2  ;;  %v1615_v26 = vmul.f32 %v4778_v53, %v1564_v31  ;;  %v6427_v2 = vld [vmem:[#allocation27_spill] sm:$0xff] }
 0x581   : > { %v1574_v46 = vsub.f32 %v1541_v42, %v4616_v3  ;;  %v1720_v1 = vmul.f32 0.5, %v1688_v16  ;;  %v1616_v42 = vmul.f32 %v4778_v53, %v1565_v24  ;;  %v6424_v16 = vld [vmem:[#allocation119_spill] sm:$0xff]  ;;  %v6426_v24 = vld [vmem:[#allocation120_spill] sm:$0xff]  ;;  %v6429_v31 = vld [vmem:[#allocation101_spill] sm:$0xff] }
 0x582   : > { %v1562_v23 = vsub.f32 %v4939_v27, %v6424_v16  ;;  %v1561_v5 = vsub.f32 %v4911_v15, %v6426_v24  ;;  %v5076_v15 = vadd.f32 %v1615_v26, %v6419_v40 }
 0x583   : > { %v1625_v41 = vmul.f32 %v4778_v53, %v1574_v46  ;;  %2942 = vtanh.f32 %v1720_v1  ;;  %v6423_v46 = vld [vmem:[#allocation29_spill] sm:$0xff]  ;;  %v1614_v1 = vmul.f32 %v4778_v53, %v1563_v48  ;;  %v5067_v56 = vadd.f32 %v1616_v42, %v6415_v33  ;;  %v6430_v33 = vld [vmem:[#allocation26_spill] sm:$0xff]  ;;  %v6431_v48 = vld [vmem:[#allocation102_spill] sm:$0xff] }
 0x584   : > { %v1684_v45 = vadd.f32 %v5029_v43, %v6423_v46  ;;  %2944 = vtanh.f32 %v1719_v51  ;;  %v1560_v51 = vsub.f32 %v4879_v57, %v6429_v31  ;;  %v1613_v22 = vmul.f32 %v4778_v53, %v1562_v23 }
 0x585   : > { %v5032_v0 = vadd.f32 %v1625_v41, %v4616_v3  ;;  %1864 = vmatmul.f32.gmra.mxu2 %v6418_v63  ;;  %v6421_v3 = vld [vmem:[#allocation30_spill] sm:$0xff]  ;;  %v6425_v41 = vld [vmem:[#allocation28_spill] sm:$0xff]  ;;  %v1682_v63 = vadd.f32 %v5051_v47, %v6427_v2  ;;  %v1559_v42 = vsub.f32 %v4838_v38, %v6431_v48  ;;  %v5084_v57 = vadd.f32 %v1614_v1, %v6422_v9 }
 0x586   : > { %v1685_v28 = vadd.f32 %v5022_v11, %v6421_v3  ;;  %v1683_v6 = vadd.f32 %v5041_v30, %v6425_v41  ;;  %v1716_v27 = vmul.f32 0.5, %v1684_v45  ;;  %v1681_v3 = vadd.f32 %v5059_v61, %v6430_v33  ;;  %v6432_v45 = vld [vmem:[#allocation25_spill] sm:$0xff] }
 0x587   : > { %6416 = vst [vmem:[#allocation115_spill] sm:$0xff] %v5032_v0  ;;  %v1689_v62 = vadd.f32 %v5032_v0, %v6420_v36  ;;  %v1714_v46 = vmul.f32 0.5, %v1682_v63  ;;  %v1680_v40 = vadd.f32 %v5067_v56, %v6432_v45  ;;  %v1611_v23 = vmul.f32 %v4778_v53, %v1560_v51 }
 0x588   : > { %v1717_v58 = vmul.f32 0.5, %v1685_v28  ;;  %v1713_v38 = vmul.f32 0.5, %v1681_v3  ;;  %v1610_v9 = vmul.f32 %v4778_v53, %v1559_v42 }
 0x589   : > { %v1721_v52 = vmul.f32 0.5, %v1689_v62  ;;  %v2943_v36 = vpop.eup %2942  ;;  %v1715_v62 = vmul.f32 0.5, %v1683_v6  ;;  %v5090_v6 = vadd.f32 %v1613_v22, %v6424_v16  ;;  %v1712_v51 = vmul.f32 0.5, %v1680_v40  ;;  %v6436_v22 = vld [vmem:[#allocation59_spill] sm:$0xff] }
 0x58a   : > { %v2945_v28 = vpop.eup %2944  ;;  %v5107_v3 = vadd.f32 %v1611_v23, %v6429_v31  ;;  %v5115_v45 = vadd.f32 %v1610_v9, %v6431_v48 }
 0x58b   : > { %2946 = vtanh.f32 %v1721_v52  ;;  %v1612_v52 = vmul.f32 %v4778_v53, %v1561_v5  ;;  %v6433_v5 = vld [vmem:[#allocation24_spill] sm:$0xff] }
 0x58c   : > { %2948 = vtanh.f32 %v1718_v7  ;;  %v1679_v2 = vadd.f32 %v5076_v15, %v6433_v5  ;;  %v6442_v5 = vld [vmem:[#allocation20_spill] sm:$0xff] }
 0x58d   : > { %1867 = vmatmul.f32.gmra.mxu2 %v6428_v50  ;;  %2950 = vtanh.f32 %v1717_v58  ;;  %v1784_v58 = vmul.f32 0.5, %v2943_v36  ;;  %v5098_v50 = vadd.f32 %v1612_v52, %v6426_v24  ;;  %v6435_v36 = vld [vmem:[#allocation23_spill] sm:$0xff]  ;;  %v6438_v24 = vld [vmem:[#allocation22_spill] sm:$0xff] }
 0x58e   : > { %2952 = vtanh.f32 %v1716_v27  ;;  %v1783_v27 = vmul.f32 0.5, %v2945_v28  ;;  %v1678_v16 = vadd.f32 %v5084_v57, %v6435_v36  ;;  %v1711_v28 = vmul.f32 0.5, %v1679_v2 }
 0x58f   : > { %2954 = vtanh.f32 %v1715_v62  ;;  %v5104_v62 = vadd.f32 0.5, %v1784_v58  ;;  %v1677_v42 = vadd.f32 %v5090_v6, %v6438_v24  ;;  %v1675_v2 = vadd.f32 %v5107_v3, %v6442_v5  ;;  %v6446_v5 = vld [vmem:[#allocation63_spill] sm:$0xff] }
 0x590   : > { %2956 = vtanh.f32 %v1714_v46  ;;  %v5112_v52 = vadd.f32 0.5, %v1783_v27  ;;  %v1710_v40 = vmul.f32 0.5, %v1678_v16  ;;  %v6445_v16 = vld [vmem:[#allocation61_spill] sm:$0xff] }
 0x591   : > { %v2947_v7 = vpop.eup %2946  ;;  %6437 = vst [vmem:[#allocation117_spill] sm:$0xff] %v5104_v62  ;;  %2958 = vtanh.f32 %v1713_v38  ;;  %v1709_v38 = vmul.f32 0.5, %v1677_v42 }
 0x592   : > { %v1785_v26 = vmul.f32 0.5, %v2947_v7  ;;  %v2949_v41 = vpop.eup %2948  ;;  %6439 = vst [vmem:[#allocation118_spill] sm:$0xff] %v5112_v52  ;;  %2960 = vtanh.f32 %v1712_v51  ;;  %v6444_v51 = vld [vmem:[#allocation19_spill] sm:$0xff] }
 0x593   : > { %v2951_v63 = vpop.eup %2950  ;;  %v1782_v33 = vmul.f32 0.5, %v2949_v41  ;;  %2962 = vtanh.f32 %v1711_v28  ;;  %v1674_v36 = vadd.f32 %v5115_v45, %v6444_v51  ;;  %v1707_v28 = vmul.f32 0.5, %v1675_v2 }
 0x594   : > { %v5095_v1 = vadd.f32 0.5, %v1785_v26  ;;  %v2953_v53 = vpop.eup %2952  ;;  %v1781_v7 = vmul.f32 0.5, %v2951_v63  ;;  %v6440_v26 = vld [vmem:[#allocation21_spill] sm:$0xff]  ;;  %2964 = vtanh.f32 %v1710_v40 }
 0x595   : > { %1870 = vmatmul.f32.gmra.mxu2 %v6436_v22  ;;  %v2955_v46 = vpop.eup %2954  ;;  %v1676_v31 = vadd.f32 %v5098_v50, %v6440_v26  ;;  %v5120_v23 = vadd.f32 0.5, %v1782_v33  ;;  %v1780_v58 = vmul.f32 0.5, %v2953_v53  ;;  %2966 = vtanh.f32 %v1709_v38 }
 0x596   : > { %6434 = vst [vmem:[#allocation116_spill] sm:$0xff] %v5095_v1  ;;  %1931 = vmatpush.msrb.mxu3 %v5095_v1  ;;  %v2957_v41 = vpop.eup %2956  ;;  %v5125_v48 = vadd.f32 0.5, %v1781_v7  ;;  %v1779_v9 = vmul.f32 0.5, %v2955_v46  ;;  %v1706_v46 = vmul.f32 0.5, %v1674_v36 }
 0x597   : > { %6441 = vst [vmem:[#allocation119_spill] sm:$0xff] %v5120_v23  ;;  %v2959_v27 = vpop.eup %2958  ;;  %v1708_v63 = vmul.f32 0.5, %v1676_v31  ;;  %v5131_v22 = vadd.f32 0.5, %v1780_v58  ;;  %v1778_v33 = vmul.f32 0.5, %v2957_v41 }
 0x598   : > { %1932 = vmatpush.msrb.mxu3 %v5104_v62  ;;  %6443 = vst [vmem:[#allocation120_spill] sm:$0xff] %v5125_v48  ;;  %v2961_v53 = vpop.eup %2960  ;;  %v5134_v24 = vadd.f32 0.5, %v1779_v9  ;;  %v1777_v42 = vmul.f32 0.5, %v2959_v27  ;;  %v6480_v62 = vld [vmem:[#allocation93_spill] sm:$0xff] }
 0x599   : > { %v2963_v7 = vpop.eup %2962  ;;  %2968 = vtanh.f32 %v1708_v63  ;;  %v5137_v40 = vadd.f32 0.5, %v1778_v33  ;;  %v1776_v26 = vmul.f32 0.5, %v2961_v53 }
 0x59a   : > { %1933 = vmatpush.msrb.mxu3 %v5112_v52  ;;  %v2965_v31 = vpop.eup %2964  ;;  %2970 = vtanh.f32 %v1707_v28  ;;  %v5140_v58 = vadd.f32 0.5, %v1777_v42  ;;  %v1775_v41 = vmul.f32 0.5, %v2963_v7  ;;  %v6447_v7 = vld [vmem:[#allocation65_spill] sm:$0xff] }
 0x59b   : > { %v2967_v38 = vpop.eup %2966  ;;  %2972 = vtanh.f32 %v1706_v46  ;;  %v5144_v2 = vadd.f32 0.5, %v1776_v26  ;;  %v1774_v9 = vmul.f32 0.5, %v2965_v31 }
 0x59c   : > { %1934 = vmatpush.msrb.mxu3 %v5120_v23  ;;  %v5147_v63 = vadd.f32 0.5, %v1775_v41  ;;  %v1773_v51 = vmul.f32 0.5, %v2967_v38  ;;  %v6448_v38 = vld [vmem:[#allocation36_spill] sm:$0xff] }
 0x59d   : > { %1873 = vmatmul.f32.gmra.mxu2 %v6445_v16  ;;  %v5150_v16 = vadd.f32 0.5, %v1774_v9  ;;  %v6450_v9 = vld [vmem:[#allocation38_spill] sm:$0xff]  ;;  %v6481_v23 = vld [vmem:[#allocation72_spill] sm:$0xff] }
 0x59e   : > { %1935 = vmatpush.msrb.mxu3 %v5125_v48  ;;  %v5153_v28 = vadd.f32 0.5, %v1773_v51  ;;  %v6452_v51 = vld [vmem:[#allocation40_spill] sm:$0xff] }
 0x59f   : > { %v2969_v27 = vpop.eup %2968 }
 0x5a0   : > { %1936 = vmatpush.msrb.mxu3 %v5131_v22  ;;  %v2971_v36 = vpop.eup %2970  ;;  %v1772_v33 = vmul.f32 0.5, %v2969_v27  ;;  %v6451_v27 = vld [vmem:[#allocation69_spill] sm:$0xff] }
 0x5a1   : > { %v2973_v53 = vpop.eup %2972  ;;  %v1771_v42 = vmul.f32 0.5, %v2971_v36  ;;  %v6453_v36 = vld [vmem:[#allocation71_spill] sm:$0xff] }
 0x5a2   : > { %1937 = vmatpush.msrb.mxu3 %v5134_v24  ;;  %v5157_v46 = vadd.f32 0.5, %v1772_v33  ;;  %v1770_v26 = vmul.f32 0.5, %v2973_v53  ;;  %v6454_v33 = vld [vmem:[#allocation42_spill] sm:$0xff]  ;;  %v6455_v53 = vld [vmem:[#allocation73_spill] sm:$0xff] }
 0x5a3   : > { %v5160_v31 = vadd.f32 0.5, %v1771_v42  ;;  %v6456_v42 = vld [vmem:[#allocation44_spill] sm:$0xff] }
 0x5a4   : > { %1938 = vmatpush.msrb.mxu3 %v5137_v40  ;;  %v5163_v41 = vadd.f32 0.5, %v1770_v26  ;;  %v2077_v26 = vstv %s2076_s11 }
 0x5a5   : > { %1876 = vmatmul.f32.gmra.mxu2 %v6446_v5  ;;  %v6449_v5 = vld [vmem:[#allocation67_spill] sm:$0xff]  ;;  %2974 = vrcp.f32 %v2077_v26  ;;  %vm2083_vm13 = vweird.f32 %v2077_v26 }
 0x5a6   : > { %1939 = vmatpush.msrb.mxu3 %v5140_v58 }
 0x5a8   : > { %1940 = vmatpush.msrb.mxu3 %v5144_v2 }
 0x5aa   : > { %1941 = vmatpush.msrb.mxu3 %v5147_v63 }
 0x5ac   : > { %1942 = vmatpush.msrb.mxu3 %v5150_v16 }
 0x5ad   : > { %1879 = vmatmul.f32.gmra.mxu2 %v6447_v7  ;;  %v6457_v7 = vld [vmem:[#allocation75_spill] sm:$0xff] }
 0x5ae   : > { %1943 = vmatpush.msrb.mxu3 %v5153_v28 }
 0x5b0   : > { %1944 = vmatpush.msrb.mxu3 %v5157_v46 }
 0x5b2   : > { %1945 = vmatpush.msrb.mxu3 %v5160_v31 }
 0x5b4   : > { %1946 = vmatpush.msrb.mxu3 %v5163_v41 }
 0x5b5   : > { %1947 = vmatmul.f32.vlgmr.msrb.gmra.mxu3 %v6448_v38  ;;  %1882 = vmatmul.f32.gmra.mxu2 %v6449_v5  ;;  %v2975_v38 = vpop.eup %2974  ;;  %v6458_v5 = vld [vmem:[#allocation46_spill] sm:$0xff] }
 0x5b6   : > { %vm2084_vm14 = vweird.f32 %v2975_v38 }
 0x5b7   : > { %vm2085_vm15 = vmor %vm2083_vm13, %vm2084_vm14 }
 0x5bd   : > { %1950 = vmatmul.f32.gmra.mxu3 %v6450_v9  ;;  %1885 = vmatmul.f32.gmra.mxu2 %v6451_v27  ;;  %v6459_v9 = vld [vmem:[#allocation77_spill] sm:$0xff]  ;;  %v2079_v27 = vmul.f32 %v2975_v38, %v2077_v26 }
 0x5c5   : > { %1953 = vmatmul.f32.gmra.mxu3 %v6452_v51  ;;  %1888 = vmatmul.f32.gmra.mxu2 %v6453_v36  ;;  %v2080_v51 = vsub.f32 1.0, %v2079_v27  ;;  %v2089_v36 = vand.u32 2147483648, %v2077_v26  ;;  %v6464_v27 = vld [vmem:[#allocation52_spill] sm:$0xff] }
 0x5c7   : > { %v2081_v10 = vmul.f32 %v2975_v38, %v2080_v51  ;;  %v6466_v51 = vld [vmem:[#allocation56_spill] sm:$0xff] }
 0x5c9   : > { %v2082_v19 = vadd.f32 %v2975_v38, %v2081_v10  ;;  %v6465_v10 = vld [vmem:[#allocation54_spill] sm:$0xff] }
 0x5cb   : > { %v2086_v1 = vsel %vm2085_vm15, %v2975_v38, %v2082_v19  ;;  %v6470_v19 = vld [vmem:[#allocation62_spill] sm:$0xff]  ;;  %v6472_v38 = vld [vmem:[#allocation64_spill] sm:$0xff] }
 0x5cd   : > { %1956 = vmatmul.f32.gmra.mxu3 %v6454_v33  ;;  %1891 = vmatmul.f32.gmra.mxu2 %v6455_v53  ;;  %v2087_v33 = vand.u32 2147483647, %v2077_v26  ;;  %v6460_v53 = vld [vmem:[#allocation48_spill] sm:$0xff]  ;;  %v6467_v26 = vld [vmem:[#allocation58_spill] sm:$0xff] }
 0x5cf   : > { %vm2088_vm1 = vcmp.eq.f32.partialorder %v2087_v33, 8.507059e+37 }
 0x5d5   : > { %1959 = vmatmul.f32.gmra.mxu3 %v6456_v42  ;;  %1894 = vmatmul.f32.gmra.mxu2 %v6457_v7  ;;  %v2090_v42 = vor.u32 1.1754944e-38, %v2089_v36  ;;  %v6461_v7 = vld [vmem:[#allocation79_spill] sm:$0xff]  ;;  %v1835_v36 = vpop.f32.mrf.mxu2 }
 0x5d7   : > { %v2091_v0 = vsel %vm2088_vm1, %v2090_v42, %v2086_v1  ;;  %v6471_v1 = vld [vmem:[#allocation85_spill] sm:$0xff]  ;;  %v6473_v42 = vld [vmem:[#allocation87_spill] sm:$0xff] }
 0x5d8   : > { %2444 = vpush %v2091_v0 }
 0x5dd   : > { %1962 = vmatmul.f32.gmra.mxu3 %v6458_v5  ;;  %1897 = vmatmul.f32.gmra.mxu2 %v6459_v9  ;;  %v6462_v5 = vld [vmem:[#allocation50_spill] sm:$0xff]  ;;  %v6463_v9 = vld [vmem:[#allocation81_spill] sm:$0xff]  ;;  %v1838_v0 = vpop.f32.mrf.mxu2 }
 0x5e5   : > { %1965 = vmatmul.f32.gmra.mxu3 %v6460_v53  ;;  %1900 = vmatmul.f32.gmra.mxu2 %v6461_v7  ;;  %v6468_v53 = vld [vmem:[#allocation60_spill] sm:$0xff]  ;;  %v6469_v7 = vld [vmem:[#allocation83_spill] sm:$0xff]  ;;  %v1841_v33 = vpop.f32.mrf.mxu2 }
 0x5ed   : > { %1968 = vmatmul.f32.gmra.mxu3 %v6462_v5  ;;  %1903 = vmatmul.f32.gmra.mxu2 %v6463_v9  ;;  %v6474_v5 = vld [vmem:[#allocation66_spill] sm:$0xff]  ;;  %v1844_v9 = vpop.f32.mrf.mxu2 }
 0x5f5   : > { %1971 = vmatmul.f32.gmra.mxu3 %v6464_v27  ;;  %1906 = vmatmul.f32.gmra.mxu2 %v6469_v7  ;;  %v6475_v27 = vld [vmem:[#allocation89_spill] sm:$0xff] }
 0x5fd   : > { %1974 = vmatmul.f32.gmra.mxu3 %v6465_v10  ;;  %1909 = vmatmul.f32.gmra.mxu2 %v6471_v1  ;;  %v6476_v10 = vld [vmem:[#allocation68_spill] sm:$0xff] }
 0x605   : > { %1977 = vmatmul.f32.gmra.mxu3 %v6466_v51  ;;  %1912 = vmatmul.f32.gmra.mxu2 %v6473_v42  ;;  %v1847_v51 = vpop.f32.mrf.mxu2  ;;  %v6478_v42 = vld [vmem:[#allocation70_spill] sm:$0xff] }
 0x609   : > { %s2445_s12 = spop %2444 }
 0x60a   : > { %s2093_s13 = smul.f32 2.0, %s2445_s12 }
 0x60d   : > { %1980 = vmatmul.f32.gmra.mxu3 %v6467_v26  ;;  %1915 = vmatmul.f32.gmra.mxu2 %v6475_v27  ;;  %v6477_v26 = vld [vmem:[#allocation91_spill] sm:$0xff]  ;;  %v1850_v27 = vpop.f32.mrf.mxu2 }
 0x615   : > { %1983 = vmatmul.f32.gmra.mxu3 %v6468_v53  ;;  %1918 = vmatmul.f32.gmra.mxu2 %v6477_v26 }
 0x61d   : > { %1986 = vmatmul.f32.gmra.mxu3 %v6470_v19  ;;  %v5197_v19 = vstv %s2093_s13  ;;  %1921 = vmatmul.f32.gmra.mxu2 %v6480_v62 }
 0x625   : > { %1989 = vmatmul.f32.gmra.mxu3 %v6472_v38 }
 0x62d   : > { %1992 = vmatmul.f32.gmra.mxu3 %v6474_v5 }
 0x635   : > { %1995 = vmatmul.f32.gmra.mxu3 %v6476_v10 }
 0x638   : > { %v1948_v53 = vpop.f32.mrf.mxu3 }
 0x639   : > { %v1949_v7 = vadd.f32 %v1948_v53, %v1835_v36 }
 0x63b   : > { %v2044_v1 = vsub.f32 %v1949_v7, %v4921_v12 }
 0x63d   : > { %v2095_v38 = vmul.f32 %v5197_v19, %v2044_v1  ;;  %1998 = vmatmul.f32.gmra.mxu3 %v6478_v42  ;;  %v2159_v36 = vmul.f32 %v2044_v1, %v4975_v37  ;;  %v6484_v1 = vld [vmem:[#allocation74_spill] sm:$0xff] }
 0x63f   : > { %v5203_v5 = vadd.f32 %v2095_v38, %v4921_v12   ;;  %v1853_v38 = vpop.f32.mrf.mxu2 }
 0x640   : > { %v1951_v10 = vpop.f32.mrf.mxu3 }
 0x641   : > { %6479 = vst [vmem:[#allocation121_spill] sm:$0xff] %v5203_v5  ;;  %v1952_v52 = vadd.f32 %v1951_v10, %v1838_v0  ;;  %v6483_v5 = vld [vmem:[#allocation95_spill] sm:$0xff]  ;;  %v6486_v10 = vld [vmem:[#allocation97_spill] sm:$0xff] }
 0x642   : > { %1924 = vmatmul.f32.gmra.mxu2 %v6483_v5 }
 0x643   : > { %v2045_v26 = vsub.f32 %v1952_v52, %v4905_v34 }
 0x645   : > { %v2096_v53 = vmul.f32 %v5197_v19, %v2045_v26  ;;  %v2160_v7 = vmul.f32 %v2045_v26, %v4972_v14  ;;  %2001 = vmatmul.f32.gmra.mxu3 %v6481_v23 }
 0x647   : > { %v5212_v42 = vadd.f32 %v2096_v53, %v4905_v34   ;;  %v2191_v12 = vadd.f32 %v2160_v7, %v2159_v36  ;;  %v1856_v34 = vpop.f32.mrf.mxu2  ;;  %v6487_v7 = vld [vmem:[#allocation76_spill] sm:$0xff] }
 0x648   : > { %v1954_v62 = vpop.f32.mrf.mxu3 }
 0x649   : > { %6482 = vst [vmem:[#allocation122_spill] sm:$0xff] %v5212_v42  ;;  %v1955_v48 = vadd.f32 %v1954_v62, %v1841_v33 }
 0x64a   : > { %1927 = vmatmul.f32.gmra.mxu2 %v6486_v10 }
 0x64b   : > { %v2046_v0 = vsub.f32 %v1955_v48, %v4900_v25 }
 0x64d   : > { %v2097_v52 = vmul.f32 %v5197_v19, %v2046_v0  ;;  %v2161_v37 = vmul.f32 %v2046_v0, %v4966_v39  ;;  %2004 = vmatmul.f32.gmra.mxu3 %v6484_v1  ;;  %v6489_v0 = vld [vmem:[#allocation78_spill] sm:$0xff] }
 0x64f   : > { %v5220_v36 = vadd.f32 %v2097_v52, %v4900_v25   ;;  %v2192_v23 = vadd.f32 %v2191_v12, %v2161_v37  ;;  %v1859_v25 = vpop.f32.mrf.mxu2 }
 0x650   : > { %v1957_v26 = vpop.f32.mrf.mxu3 }
 0x651   : > { %6485 = vst [vmem:[#allocation123_spill] sm:$0xff] %v5220_v36  ;;  %v1958_v53 = vadd.f32 %v1957_v26, %v1844_v9 }
 0x653   : > { %v2047_v5 = vsub.f32 %v1958_v53, %v4892_v60 }
 0x655   : > { %v2098_v33 = vmul.f32 %v5197_v19, %v2047_v5  ;;  %v2162_v48 = vmul.f32 %v2047_v5, %v4963_v55  ;;  %2007 = vmatmul.f32.gmra.mxu3 %v6487_v7  ;;  %v6491_v5 = vld [vmem:[#allocation80_spill] sm:$0xff] }
 0x657   : > { %v5228_v37 = vadd.f32 %v2098_v33, %v4892_v60   ;;  %v2193_v39 = vadd.f32 %v2192_v23, %v2162_v48  ;;  %v1862_v26 = vpop.f32.mrf.mxu2 }
 0x658   : > { %v1960_v36 = vpop.f32.mrf.mxu3 }
 0x659   : > { %6488 = vst [vmem:[#allocation124_spill] sm:$0xff] %v5228_v37  ;;  %v1961_v42 = vadd.f32 %v1960_v36, %v1847_v51 }
 0x65b   : > { %v2048_v12 = vsub.f32 %v1961_v42, %v4886_v4 }
 0x65d   : > { %v2099_v62 = vmul.f32 %v5197_v19, %v2048_v12  ;;  %v2163_v9 = vmul.f32 %v2048_v12, %v4960_v8  ;;  %2010 = vmatmul.f32.gmra.mxu3 %v6489_v0  ;;  %v6493_v12 = vld [vmem:[#allocation82_spill] sm:$0xff] }
 0x65f   : > { %v5235_v52 = vadd.f32 %v2099_v62, %v4886_v4   ;;  %v2194_v55 = vadd.f32 %v2193_v39, %v2163_v9  ;;  %v1865_v48 = vpop.f32.mrf.mxu2 }
 0x660   : > { %v1963_v53 = vpop.f32.mrf.mxu3 }
 0x661   : > { %6490 = vst [vmem:[#allocation125_spill] sm:$0xff] %v5235_v52  ;;  %v1964_v60 = vadd.f32 %v1963_v53, %v1850_v27  ;;  %v6495_v53 = vld [vmem:[#allocation84_spill] sm:$0xff] }
 0x663   : > { %v2049_v37 = vsub.f32 %v1964_v60, %v4874_v18 }
 0x665   : > { %v2100_v23 = vmul.f32 %v5197_v19, %v2049_v37  ;;  %v2164_v51 = vmul.f32 %v2049_v37, %v4957_v49  ;;  %2013 = vmatmul.f32.gmra.mxu3 %v6491_v5 }
 0x667   : > { %v5242_v39 = vadd.f32 %v2100_v23, %v4874_v18   ;;  %v2195_v33 = vadd.f32 %v2194_v55, %v2164_v51  ;;  %v1868_v0 = vpop.f32.mrf.mxu2 }
 0x668   : > { %v1966_v7 = vpop.f32.mrf.mxu3 }
 0x669   : > { %v6492_v8 = vmov %v5242_v39  ;;  %v1967_v4 = vadd.f32 %v1966_v7, %v1853_v38  ;;  %v6497_v7 = vld [vmem:[#allocation86_spill] sm:$0xff] }
 0x66b   : > { %v2050_v36 = vsub.f32 %v1967_v4, %v4867_v44 }
 0x66d   : > { %v2101_v42 = vmul.f32 %v5197_v19, %v2050_v36  ;;  %v2165_v27 = vmul.f32 %v2050_v36, %v4951_v59  ;;  %2016 = vmatmul.f32.gmra.mxu3 %v6493_v12 }
 0x66f   : > { %v5249_v62 = vadd.f32 %v2101_v42, %v4867_v44   ;;  %v2196_v49 = vadd.f32 %v2195_v33, %v2165_v27  ;;  %v1871_v37 = vpop.f32.mrf.mxu2 }
 0x670   : > { %v1969_v52 = vpop.f32.mrf.mxu3 }
 0x671   : > { %v6494_v9 = vmov %v5249_v62  ;;  %v1970_v18 = vadd.f32 %v1969_v52, %v1856_v34  ;;  %v6500_v52 = vld [vmem:[#allocation88_spill] sm:$0xff] }
 0x673   : > { %v2051_v39 = vsub.f32 %v1970_v18, %v4858_v54 }
 0x675   : > { %v2102_v55 = vmul.f32 %v5197_v19, %v2051_v39  ;;  %v2166_v38 = vmul.f32 %v2051_v39, %v4948_v32  ;;  %2019 = vmatmul.f32.gmra.mxu3 %v6495_v53 }
 0x677   : > { %v5256_v60 = vadd.f32 %v2102_v55, %v4858_v54   ;;  %v2197_v59 = vadd.f32 %v2196_v49, %v2166_v38  ;;  %v1874_v36 = vpop.f32.mrf.mxu2 }
 0x678   : > { %v1972_v51 = vpop.f32.mrf.mxu3 }
 0x679   : > { %v6496_v23 = vmov %v5256_v60  ;;  %v1973_v44 = vadd.f32 %v1972_v51, %v1859_v25  ;;  %v6499_v25 = vld [vmem:[#allocation113_spill] sm:$0xff] }
 0x67b   : > { %v2052_v5 = vsub.f32 %v1973_v44, %v4849_v13 }
 0x67d   : > { %v2103_v33 = vmul.f32 %v5197_v19, %v2052_v5  ;;  %v2167_v34 = vmul.f32 %v2052_v5, %v4945_v21  ;;  %2022 = vmatmul.f32.gmra.mxu3 %v6497_v7  ;;  %v6505_v7 = vld [vmem:[#allocation103_spill] sm:$0xff] }
 0x67f   : > { %v5263_v42 = vadd.f32 %v2103_v33, %v4849_v13   ;;  %v2198_v4 = vadd.f32 %v2197_v59, %v2167_v34  ;;  %v1877_v39 = vpop.f32.mrf.mxu2  ;;  %v6503_v59 = vld [vmem:[#allocation90_spill] sm:$0xff] }
 0x680   : > { %v1975_v27 = vpop.f32.mrf.mxu3 }
 0x681   : > { %v6498_v32 = vmov %v5263_v42  ;;  %v1976_v54 = vadd.f32 %v1975_v27, %v1862_v26  ;;  %v6501_v42 = vld [vmem:[#allocation104_spill] sm:$0xff] }
 0x682   : > { %v6502_v26 = vld [vmem:[#allocation112_spill] sm:$0xff] }
 0x683   : > { %v2053_v12 = vsub.f32 %v1976_v54, %v4836_v17 }
 0x685   : > { %v2104_v62 = vmul.f32 %v5197_v19, %v2053_v12  ;;  %v2168_v49 = vmul.f32 %v2053_v12, %v6499_v25  ;;  %2025 = vmatmul.f32.gmra.mxu3 %v6500_v52  ;;  %v6507_v12 = vld [vmem:[#allocation92_spill] sm:$0xff] }
 0x687   : > { %v5270_v18 = vadd.f32 %v2104_v62, %v4836_v17   ;;  %v2199_v21 = vadd.f32 %v2198_v4, %v2168_v49  ;;  %v1880_v33 = vpop.f32.mrf.mxu2 }
 0x688   : > { %v1978_v55 = vpop.f32.mrf.mxu3 }
 0x689   : > { %v1979_v13 = vadd.f32 %v1978_v55, %v1865_v48  ;;  %v6506_v48 = vld [vmem:[#allocation111_spill] sm:$0xff] }
 0x68b   : > { %v2054_v38 = vsub.f32 %v1979_v13, %v6501_v42 }
 0x68d   : > { %v2105_v53 = vmul.f32 %v5197_v19, %v2054_v38  ;;  %v2169_v60 = vmul.f32 %v2054_v38, %v6502_v26  ;;  %2028 = vmatmul.f32.gmra.mxu3 %v6503_v59 }
 0x68f   : > { %v5277_v44 = vadd.f32 %v2105_v53, %v6501_v42   ;;  %v2200_v51 = vadd.f32 %v2199_v21, %v2169_v60  ;;  %v1883_v55 = vpop.f32.mrf.mxu2  ;;  %v6511_v53 = vld [vmem:[#allocation94_spill] sm:$0xff] }
 0x690   : > { %v1981_v34 = vpop.f32.mrf.mxu3 }
 0x691   : > { %v6504_v5 = vmov %v5277_v44  ;;  %v1982_v17 = vadd.f32 %v1981_v34, %v1868_v0  ;;  %v6509_v44 = vld [vmem:[#allocation106_spill] sm:$0xff] }
 0x692   : > { %v6510_v0 = vld [vmem:[#allocation110_spill] sm:$0xff] }
 0x693   : > { %v2055_v4 = vsub.f32 %v1982_v17, %v6505_v7 }
 0x695   : > { %v2106_v27 = vmul.f32 %v5197_v19, %v2055_v4  ;;  %v2170_v54 = vmul.f32 %v2055_v4, %v6506_v48  ;;  %2031 = vmatmul.f32.gmra.mxu3 %v6507_v12  ;;  %v6514_v48 = vld [vmem:[#allocation96_spill] sm:$0xff] }
 0x697   : > { %v5284_v62 = vadd.f32 %v2106_v27, %v6505_v7   ;;  %v2201_v49 = vadd.f32 %v2200_v51, %v2170_v54  ;;  %v1886_v17 = vpop.f32.mrf.mxu2  ;;  %v6512_v7 = vld [vmem:[#allocation100_spill] sm:$0xff] }
 0x698   : > { %v1984_v52 = vpop.f32.mrf.mxu3 }
 0x699   : > { %v6508_v25 = vmov %v5284_v62  ;;  %v1985_v13 = vadd.f32 %v1984_v52, %v1871_v37  ;;  %v6513_v37 = vld [vmem:[#allocation109_spill] sm:$0xff] }
 0x69b   : > { %v2056_v21 = vsub.f32 %v1985_v13, %v6509_v44 }
 0x69d   : > { %v2107_v42 = vmul.f32 %v5197_v19, %v2056_v21  ;;  %v2171_v38 = vmul.f32 %v2056_v21, %v6510_v0  ;;  %2034 = vmatmul.f32.gmra.mxu3 %v6511_v53 }
 0x69f   : > { %v5291_v26 = vadd.f32 %v2107_v42, %v6509_v44   ;;  %v2202_v60 = vadd.f32 %v2201_v49, %v2171_v38  ;;  %v6516_v44 = vld [vmem:[#allocation99_spill] sm:$0xff]  ;;  %v1889_v49 = vpop.f32.mrf.mxu2  ;;  %v6517_v42 = vld [vmem:[#allocation108_spill] sm:$0xff] }
 0x6a0   : > { %v1987_v59 = vpop.f32.mrf.mxu3  ;;  %v6518_v38 = vld [vmem:[#allocation98_spill] sm:$0xff] }
 0x6a1   : > { %v1988_v34 = vadd.f32 %v1987_v59, %v1874_v36 }
 0x6a3   : > { %v2057_v51 = vsub.f32 %v1988_v34, %v6512_v7 }
 0x6a5   : > { %v2108_v4 = vmul.f32 %v5197_v19, %v2057_v51  ;;  %v2172_v27 = vmul.f32 %v2057_v51, %v6513_v37  ;;  %2037 = vmatmul.f32.gmra.mxu3 %v6514_v48 }
 0x6a7   : > { %v5298_v54 = vadd.f32 %v2108_v4, %v6512_v7   ;;  %v2203_v62 = vadd.f32 %v2202_v60, %v2172_v27  ;;  %v6520_v7 = vld [vmem:[#allocation105_spill] sm:$0xff]  ;;  %v1892_v37 = vpop.f32.mrf.mxu2 }
 0x6a8   : > { %v1990_v52 = vpop.f32.mrf.mxu3 }
 0x6a9   : > { %v6515_v12 = vmov %v5298_v54  ;;  %v1991_v13 = vadd.f32 %v1990_v52, %v1877_v39  ;;  %v6521_v39 = vld [vmem:[#allocation107_spill] sm:$0xff] }
 0x6ab   : > { %v2058_v21 = vsub.f32 %v1991_v13, %v6516_v44 }
 0x6ad   : > { %v2109_v36 = vmul.f32 %v5197_v19, %v2058_v21  ;;  %v2173_v0 = vmul.f32 %v2058_v21, %v6517_v42  ;;  %2040 = vmatmul.f32.gmra.mxu3 %v6518_v38 }
 0x6af   : > { %v5305_v48 = vadd.f32 %v2109_v36, %v6516_v44   ;;  %v2204_v53 = vadd.f32 %v2203_v62, %v2173_v0  ;;  %v1895_v42 = vpop.f32.mrf.mxu2 }
 0x6b0   : > { %v1993_v59 = vpop.f32.mrf.mxu3 }
 0x6b1   : > { %v6519_v20 = vmov %v5305_v48  ;;  %v1994_v34 = vadd.f32 %v1993_v59, %v1880_v33 }
 0x6b3   : > { %v2059_v51 = vsub.f32 %v1994_v34, %v6520_v7 }
 0x6b5   : > { %v2110_v60 = vmul.f32 %v5197_v19, %v2059_v51  ;;  %v2174_v4 = vmul.f32 %v2059_v51, %v6521_v39 }
 0x6b7   : > { %v5311_v27 = vadd.f32 %v2110_v60, %v6520_v7   ;;  %v2205_v54 = vadd.f32 %v2204_v53, %v2174_v4 }
 0x6b8   : > { %v1996_v52 = vpop.f32.mrf.mxu3 }
 0x6b9   : > { %v1997_v13 = vadd.f32 %v1996_v52, %v1883_v55 }
 0x6bb   : > { %v2060_v21 = vsub.f32 %v1997_v13, %v5115_v45 }
 0x6bd   : > { %v2111_v48 = vmul.f32 %v5197_v19, %v2060_v21  ;;  %v2175_v62 = vmul.f32 %v2060_v21, %v5163_v41  ;;  %v1898_v41 = vpop.f32.mrf.mxu2 }
 0x6bf   : > { %v5317_v33 = vadd.f32 %v2111_v48, %v5115_v45   ;;  %v2206_v44 = vadd.f32 %v2205_v54, %v2175_v62 }
 0x6c0   : > { %v1999_v36 = vpop.f32.mrf.mxu3 }
 0x6c1   : > { %v2000_v0 = vadd.f32 %v1999_v36, %v1886_v17 }
 0x6c3   : > { %v2061_v38 = vsub.f32 %v2000_v0, %v5107_v3 }
 0x6c5   : > { %v2112_v59 = vmul.f32 %v5197_v19, %v2061_v38  ;;  %v2176_v53 = vmul.f32 %v2061_v38, %v5160_v31 }
 0x6c7   : > { %v5323_v51 = vadd.f32 %v2112_v59, %v5107_v3   ;;  %v2207_v55 = vadd.f32 %v2206_v44, %v2176_v53  ;;  %v1901_v3 = vpop.f32.mrf.mxu2 }
 0x6c8   : > { %v2002_v34 = vpop.f32.mrf.mxu3 }
 0x6c9   : > { %v6522_v4 = vmov %v5323_v51  ;;  %v2003_v7 = vadd.f32 %v2002_v34, %v1889_v49 }
 0x6cb   : > { %v2062_v45 = vsub.f32 %v2003_v7, %v5098_v50 }
 0x6cd   : > { %v2113_v60 = vmul.f32 %v5197_v19, %v2062_v45  ;;  %v2177_v39 = vmul.f32 %v2062_v45, %v5157_v46 }
 0x6cf   : > { %v5329_v52 = vadd.f32 %v2113_v60, %v5098_v50   ;;  %v2208_v54 = vadd.f32 %v2207_v55, %v2177_v39 }
 0x6d0   : > { %v2005_v13 = vpop.f32.mrf.mxu3 }
 0x6d1   : > { %v6523_v17 = vmov %v5329_v52  ;;  %v2006_v21 = vadd.f32 %v2005_v13, %v1892_v37  ;;  %v1904_v37 = vpop.f32.mrf.mxu2 }
 0x6d3   : > { %v2063_v31 = vsub.f32 %v2006_v21, %v5090_v6 }
 0x6d5   : > { %v2114_v51 = vmul.f32 %v5197_v19, %v2063_v31  ;;  %v2178_v49 = vmul.f32 %v2063_v31, %v5153_v28 }
 0x6d7   : > { %v5335_v53 = vadd.f32 %v2114_v51, %v5090_v6   ;;  %v2209_v48 = vadd.f32 %v2208_v54, %v2178_v49 }
 0x6d8   : > { %v2008_v62 = vpop.f32.mrf.mxu3 }
 0x6d9   : > { %6524 = vst [vmem:[#allocation126_spill] sm:$0xff] %v5335_v53  ;;  %v6525_v14 = vmov %v5335_v53  ;;  %v2009_v44 = vadd.f32 %v2008_v62, %v1895_v42  ;;  %v1907_v59 = vpop.f32.mrf.mxu2 }
 0x6db   : > { %v2064_v46 = vsub.f32 %v2009_v44, %v5084_v57 }
 0x6dd   : > { %v2115_v50 = vmul.f32 %v5197_v19, %v2064_v46  ;;  %v2179_v52 = vmul.f32 %v2064_v46, %v5150_v16 }
 0x6df   : > { %v5341_v54 = vadd.f32 %v2115_v50, %v5084_v57   ;;  %v2210_v36 = vadd.f32 %v2209_v48, %v2179_v52 }
 0x6e0   : > { %v2011_v0 = vpop.f32.mrf.mxu3 }
 0x6e1   : > { %6526 = vst [vmem:[#allocation127_spill] sm:$0xff] %v5341_v54  ;;  %v6527_v13 = vmov %v5341_v54  ;;  %v2012_v38 = vadd.f32 %v2011_v0, %v1898_v41  ;;  %v1910_v41 = vpop.f32.mrf.mxu2 }
 0x6e3   : > { %v2065_v28 = vsub.f32 %v2012_v38, %v5076_v15 }
 0x6e5   : > { %v2116_v6 = vmul.f32 %v5197_v19, %v2065_v28 }
 0x6e7   : > { %v5346_v62 = vadd.f32 %v2116_v6, %v5076_v15  }
 0x6e8   : > { %v2014_v42 = vpop.f32.mrf.mxu3 }
 0x6e9   : > { %6528 = vst [vmem:[#allocation128_spill] sm:$0xff] %v5346_v62  ;;  %v6529_v21 = vmov %v5346_v62  ;;  %v2015_v53 = vadd.f32 %v2014_v42, %v1901_v3  ;;  %v1913_v51 = vpop.f32.mrf.mxu2 }
 0x6eb   : > { %v2066_v55 = vsub.f32 %v2015_v53, %v5067_v56 }
 0x6ed   : > { %v2117_v16 = vmul.f32 %v5197_v19, %v2066_v55 }
 0x6ef   : > { %v5351_v57 = vadd.f32 %v2117_v16, %v5067_v56  }
 0x6f0   : > { %v2017_v34 = vpop.f32.mrf.mxu3 }
 0x6f1   : > { %6530 = vst [vmem:[#allocation129_spill] sm:$0xff] %v5351_v57  ;;  %v6531_v31 = vmov %v5351_v57  ;;  %v2018_v7 = vadd.f32 %v2017_v34, %v1904_v37  ;;  %v1916_v50 = vpop.f32.mrf.mxu2 }
 0x6f3   : > { %v2067_v45 = vsub.f32 %v2018_v7, %v5059_v61 }
 0x6f5   : > { %v2118_v60 = vmul.f32 %v5197_v19, %v2067_v45 }
 0x6f7   : > { %v5356_v56 = vadd.f32 %v2118_v60, %v5059_v61  }
 0x6f8   : > { %v2020_v39 = vpop.f32.mrf.mxu3 }
 0x6f9   : > { %6532 = vst [vmem:[#allocation130_spill] sm:$0xff] %v5356_v56  ;;  %v6533_v15 = vmov %v5356_v56  ;;  %v2021_v54 = vadd.f32 %v2020_v39, %v1907_v59 }
 0x6fb   : > { %v2068_v3 = vsub.f32 %v2021_v54, %v5051_v47  ;;  %v2181_v54 = vmul.f32 %v2066_v55, %v5144_v2 }
 0x6fd   : > { %v2119_v49 = vmul.f32 %v5197_v19, %v2068_v3 }
 0x6ff   : > { %v5361_v61 = vadd.f32 %v2119_v49, %v5051_v47  }
 0x700   : > { %v2023_v48 = vpop.f32.mrf.mxu3 }
 0x701   : > { %6534 = vst [vmem:[#allocation131_spill] sm:$0xff] %v5361_v61  ;;  %v6535_v6 = vmov %v5361_v61  ;;  %v2024_v62 = vadd.f32 %v2023_v48, %v1910_v41  ;;  %v1919_v61 = vpop.f32.mrf.mxu2 }
 0x703   : > { %v2069_v44 = vsub.f32 %v2024_v62, %v5041_v30 }
 0x705   : > { %v2120_v46 = vmul.f32 %v5197_v19, %v2069_v44 }
 0x707   : > { %v5366_v57 = vadd.f32 %v2120_v46, %v5041_v30  }
 0x708   : > { %v2026_v56 = vpop.f32.mrf.mxu3 }
 0x709   : > { %6536 = vst [vmem:[#allocation132_spill] sm:$0xff] %v5366_v57  ;;  %v6537_v16 = vmov %v5366_v57  ;;  %v2027_v52 = vadd.f32 %v2026_v56, %v1913_v51  ;;  %v1922_v41 = vpop.f32.mrf.mxu2 }
 0x70b   : > { %v2070_v37 = vsub.f32 %v2027_v52, %v5029_v43 }
 0x70d   : > { %v2121_v0 = vmul.f32 %v5197_v19, %v2070_v37 }
 0x70f   : > { %v5371_v7 = vadd.f32 %v2121_v0, %v5029_v43   ;;  %v2180_v43 = vmul.f32 %v2065_v28, %v5147_v63  ;;  %v2184_v63 = vmul.f32 %v2069_v44, %v5134_v24  ;;  %v6549_v44 = vld [vmem:[#allocation118_spill] sm:$0xff] }
 0x710   : > { %v2029_v47 = vpop.f32.mrf.mxu3 }
 0x711   : > { %6538 = vst [vmem:[#allocation133_spill] sm:$0xff] %v5371_v7  ;;  %v6539_v1 = vmov %v5371_v7  ;;  %v2030_v38 = vadd.f32 %v2029_v47, %v1916_v50  ;;  %v2211_v49 = vadd.f32 %v2210_v36, %v2180_v43  ;;  %v1925_v62 = vpop.f32.mrf.mxu2  ;;  %v2183_v50 = vmul.f32 %v2068_v3, %v5137_v40  ;;  %v6548_v40 = vld [vmem:[#allocation119_spill] sm:$0xff] }
 0x712   : > { %v2185_v36 = vmul.f32 %v2070_v37, %v5131_v22  ;;  %v6552_v37 = vld [vmem:[#allocation117_spill] sm:$0xff] }
 0x713   : > { %v2071_v42 = vsub.f32 %v2030_v38, %v5022_v11  ;;  %v2212_v46 = vadd.f32 %v2211_v49, %v2181_v54 }
 0x715   : > { %v2122_v59 = vmul.f32 %v5197_v19, %v2071_v42 }
 0x717   : > { %v5376_v53 = vadd.f32 %v2122_v59, %v5022_v11   ;;  %v2182_v11 = vmul.f32 %v2067_v45, %v5140_v58  ;;  %v6546_v45 = vld [vmem:[#allocation120_spill] sm:$0xff] }
 0x718   : > { %v2032_v57 = vpop.f32.mrf.mxu3  ;;  %v2186_v47 = vmul.f32 %v2071_v42, %v6546_v45  ;;  %v6579_v45 = vmov %v6508_v25 }
 0x719   : > { %6540 = vst [vmem:[#allocation134_spill] sm:$0xff] %v5376_v53  ;;  %v6541_v30 = vmov %v5376_v53  ;;  %v2033_v34 = vadd.f32 %v2032_v57, %v1919_v61  ;;  %v2213_v52 = vadd.f32 %v2212_v46, %v2182_v11  ;;  %v6547_v61 = vld [vmem:[#allocation114_spill] sm:$0xff]  ;;  %v1928_v57 = vpop.f32.mrf.mxu2 }
 0x71b   : > { %v2072_v60 = vsub.f32 %v2033_v34, %v5011_v35  ;;  %v2214_v2 = vadd.f32 %v2213_v52, %v2183_v50 }
 0x71d   : > { %v2123_v39 = vmul.f32 %v5197_v19, %v2072_v60  ;;  %v2215_v58 = vadd.f32 %v2214_v2, %v2184_v63  ;;  %v2187_v3 = vmul.f32 %v2072_v60, %v6548_v40  ;;  %v6584_v40 = vmov %v6494_v9 }
 0x71f   : > { %v5382_v59 = vadd.f32 %v2123_v39, %v5011_v35   ;;  %v6553_v39 = vld [vmem:[#allocation115_spill] sm:$0xff] }
 0x720   : > { %v2035_v7 = vpop.f32.mrf.mxu3 }
 0x721   : > { %6542 = vst [vmem:[#allocation135_spill] sm:$0xff] %v5382_v59  ;;  %v6543_v10 = vmov %v5382_v59  ;;  %v2036_v51 = vadd.f32 %v2035_v7, %v1922_v41  ;;  %v2216_v59 = vadd.f32 %v2215_v58, %v2185_v36  ;;  %v6588_v36 = vld [vmem:[#allocation123_spill] sm:$0xff] }
 0x723   : > { %v2073_v48 = vsub.f32 %v2036_v51, %v5004_v29  ;;  %v2217_v24 = vadd.f32 %v2216_v59, %v2186_v47  ;;  %v6554_v51 = vld [vmem:[#allocation116_spill] sm:$0xff]  ;;  %v6562_v59 = vmov %v6543_v10  ;;  %v6577_v47 = vmov %v6515_v12 }
 0x725   : > { %v2124_v56 = vmul.f32 %v5197_v19, %v2073_v48  ;;  %v2218_v22 = vadd.f32 %v2217_v24, %v2187_v3 }
 0x727   : > { %v5391_v0 = vadd.f32 %v2124_v56, %v5004_v29   ;;  %v2188_v29 = vmul.f32 %v2073_v48, %v6549_v44  ;;  %v6580_v44 = vmov %v6504_v5 }
 0x728   : > { %v2038_v35 = vpop.f32.mrf.mxu3 }
 0x729   : > { %6544 = vst [vmem:[#allocation136_spill] sm:$0xff] %v5391_v0  ;;  %v6545_v28 = vmov %v5391_v0  ;;  %v2039_v55 = vadd.f32 %v2038_v35, %v1925_v62  ;;  %v2219_v42 = vadd.f32 %v2218_v22, %v2188_v29 }
 0x72b   : > { %v2074_v38 = vsub.f32 %v2039_v55, %v6547_v61 }
 0x72d   : > { %v2125_v53 = vmul.f32 %v5197_v19, %v2074_v38  ;;  %v2189_v34 = vmul.f32 %v2074_v38, %v6552_v37  ;;  %v6586_v38 = vld [vmem:[#allocation125_spill] sm:$0xff]  ;;  %v6587_v37 = vld [vmem:[#allocation124_spill] sm:$0xff] }
 0x72f   : > { %v5400_v60 = vadd.f32 %v2125_v53, %v6547_v61   ;;  %v2220_v7 = vadd.f32 %v2219_v42, %v2189_v34  ;;  %v6566_v61 = vmov %v6535_v6  ;;  %v6571_v53 = vmov %v6525_v14  ;;  %v6590_v34 = vld [vmem:[#allocation121_spill] sm:$0xff] }
 0x730   : > { %v2041_v0 = vpop.f32.mrf.mxu3  ;;  %v6582_v42 = vmov %v6498_v32 }
 0x731   : > { %6550 = vst [vmem:[#allocation137_spill] sm:$0xff] %v5400_v60  ;;  %v6551_v11 = vmov %v5400_v60  ;;  %v2042_v41 = vadd.f32 %v2041_v0, %v1928_v57  ;;  %v6561_v0 = vmov %v6545_v28  ;;  %v6565_v57 = vmov %v6537_v16 }
 0x733   : > { %v2075_v43 = vsub.f32 %v2042_v41, %v6553_v39  ;;  %v6583_v41 = vmov %v6496_v23 }
 0x735   : > { %v2126_v54 = vmul.f32 %v5197_v19, %v2075_v43  ;;  %v2190_v49 = vmul.f32 %v2075_v43, %v6554_v51  ;;  %v6573_v51 = vmov %v6522_v4  ;;  %v6581_v43 = vmov %v5270_v18 }
 0x737   : > { %v5407_v63 = vadd.f32 %v2126_v54, %v6553_v39   ;;  %v2221_v48 = vadd.f32 %v2220_v7, %v2190_v49  ;;  %v6564_v7 = vmov %v6539_v1  ;;  %v6570_v54 = vmov %v6527_v13 }
 0x738   : > { %v6575_v49 = vmov %v5311_v27  ;;  %v6585_v39 = vmov %v6492_v8 }
 0x739   : > { %6555 = vst [vmem:[#allocation138_spill] sm:$0xff] %v5407_v63  ;;  %v6556_v2 = vmov %v5407_v63  ;;  %v2222_v62 = vrot.slane %v2221_v48, 4 }
 0x73a   : > { %v6559_v63 = vmov %v6556_v2 }
 0x73b   : > { %v2223_v46 = vadd.f32 %v2222_v62, %v2221_v48  ;;  %v6569_v62 = vmov %v6529_v21  ;;  %v6576_v48 = vmov %v6519_v20 }
 0x73d   : > { %v2224_v60 = vrot.slane %v2223_v46, 2 }
 0x73f   : > { %v2225_v50 = vadd.f32 %v2224_v60, %v2223_v46  ;;  %v6560_v60 = vmov %v6551_v11  ;;  %v6578_v46 = vmov %v5291_v26 }
 0x741   : > { %v2226_v56 = vrot.slane %v2225_v50, 1 }
 0x743   : > { %v2227_v52 = vadd.f32 %v2226_v56, %v2225_v50  ;;  %v6567_v56 = vmov %v6533_v15  ;;  %v6574_v50 = vmov %v5317_v33 }
 0x745   : > { %v2228_v35 = vsub.f32 0.0, %v2227_v52  ;;  %v6572_v52 = vmov %v6523_v17 }
 0x747   : > { %v2229_v55 = vsel %vm112_vm0, %v2228_v35, 0.0  ;;  %v6589_v35 = vld [vmem:[#allocation122_spill] sm:$0xff] }
 0x748   : > { %2231 = vmax.xlane.f32.xlu0 %v2229_v55  ;;  %v6568_v55 = vmov %v6531_v31 }
 0x7bb   : > { %v2232_v58 = vpop.xlane.xlu0 %2231 }
 0x7bc   : > { %2446 = vpush %v2232_v58  ;;  %v6563_v58 = vmov %v6541_v30 }
 0x7ed   : > { %s2447_s14 = spop %2446 }
 0x7ee   : > { %p149_p1 = scmp.ge.f32.partialorder %s2447_s14, -1.0 }
 0x7f0   : > { %p5413_p2 = pnand %p149_p1, %p148_p0 }
 0x7f1   :  { %v6592_v19 = vld [vmem:[#allocation2_spill] sm:$0xff] (%p5413_p2)  ;;  %v6593_v3 = vld [vmem:[#allocation121_spill] sm:$0xff] (%p5413_p2)  ;;  %v6595_v22 = vld [vmem:[#allocation122_spill] sm:$0xff] (%p5413_p2) }
 0x7f2   :  { %153 = sbr.rel (!%p5413_p2) target bundleno = 99 (0x63), region = 35  ;;  %v2234_v24 = vadd.f32 (%p5413_p2), %v6593_v3, %v6592_v19  ;;  %v6594_v29 = vld [vmem:[#allocation3_spill] sm:$0xff] (%p5413_p2)  ;;  %v6596_v11 = vld [vmem:[#allocation4_spill] sm:$0xff] (%p5413_p2)  ;;  %v6597_v28 = vld [vmem:[#allocation123_spill] sm:$0xff] (%p5413_p2) }
 0x7f3   :  { %v2235_v2 = vadd.f32 (%p5413_p2), %v6595_v22, %v6594_v29  ;;  %v2236_v10 = vadd.f32 (%p5413_p2), %v6597_v28, %v6596_v11  ;;  %v6598_v30 = vld [vmem:[#allocation5_spill] sm:$0xff] (%p5413_p2)  ;;  %v6599_v1 = vld [vmem:[#allocation124_spill] sm:$0xff] (%p5413_p2)  ;;  %v6601_v15 = vld [vmem:[#allocation125_spill] sm:$0xff] (%p5413_p2) }
 0x7f4   :  { %v2237_v16 = vadd.f32 (%p5413_p2), %v6599_v1, %v6598_v30  ;;  %v6600_v6 = vld [vmem:[#allocation6_spill] sm:$0xff] (%p5413_p2)  ;;  %v6602_v31 = vld [vmem:[#allocation7_spill] sm:$0xff] (%p5413_p2)  ;;  %v2266_v13 = vsub.f32 (%p5413_p2), 0.0, %v2234_v24  ;;  %v6603_v45 = vld [vmem:[#allocation9_spill] sm:$0xff] (%p5413_p2) }
 0x7f5   :  { %v2238_v34 = vadd.f32 (%p5413_p2), %v6601_v15, %v6600_v6  ;;  %v2239_v21 = vadd.f32 (%p5413_p2), %v6492_v8, %v6602_v31  ;;  %v2267_v14 = vsub.f32 (%p5413_p2), 0.0, %v2235_v2  ;;  %v2268_v63 = vsub.f32 (%p5413_p2), 0.0, %v2236_v10  ;;  %v6604_v38 = vld [vmem:[#allocation10_spill] sm:$0xff] (%p5413_p2)  ;;  %v6605_v30 = vld [vmem:[#allocation11_spill] sm:$0xff] (%p5413_p2)  ;;  %v6606_v8 = vld [vmem:[#allocation12_spill] sm:$0xff] (%p5413_p2) }
 0x7f6   :  { %v2240_v47 = vadd.f32 (%p5413_p2), %v6494_v9, %v6603_v45  ;;  %v2269_v61 = vsub.f32 (%p5413_p2), 0.0, %v2237_v16  ;;  %v2241_v59 = vadd.f32 (%p5413_p2), %v6496_v23, %v6604_v38  ;;  %2298 = vst [vmem:[%s5680_s2] sm:$0xff] (%p5413_p2), %v2266_v13  ;;  %v2242_v15 = vadd.f32 (%p5413_p2), %v6498_v32, %v6605_v30  ;;  %v6607_v31 = vld [vmem:[#allocation13_spill] sm:$0xff] (%p5413_p2)  ;;  %v6608_v6 = vld [vmem:[#allocation14_spill] sm:$0xff] (%p5413_p2)  ;;  %v6610_v28 = vld [vmem:[#allocation16_spill] sm:$0xff] (%p5413_p2) }
 0x7f7   :  { %v2270_v1 = vsub.f32 0.0, %v2238_v34  ;;  %2299 = vst [vmem:[%s5680_s2 + $0x8] sm:$0xff] %v2267_v14  ;;  %v2271_v10 = vsub.f32 0.0, %v2239_v21  ;;  %v2243_v9 = vadd.f32 %v5270_v18, %v6606_v8  ;;  %v2244_v13 = vadd.f32 %v6504_v5, %v6607_v31  ;;  %v6609_v21 = vld [vmem:[#allocation15_spill] sm:$0xff]  ;;  %v6611_v53 = vld [vmem:[#allocation17_spill] sm:$0xff]  ;;  %v6612_v44 = vld [vmem:[#allocation18_spill] sm:$0xff] }
 0x7f8   :  { %2300 = vst [vmem:[%s5680_s2 + $0x10] sm:$0xff] %v2268_v63  ;;  %v2272_v23 = vsub.f32 0.0, %v2240_v47  ;;  %v2273_v32 = vsub.f32 0.0, %v2241_v59  ;;  %v2245_v14 = vadd.f32 %v6508_v25, %v6608_v6  ;;  %v2274_v18 = vsub.f32 0.0, %v2242_v15  ;;  %v6613_v0 = vld [vmem:[#allocation19_spill] sm:$0xff]  ;;  %v6614_v41 = vld [vmem:[#allocation20_spill] sm:$0xff] }
 0x7f9   :  { %2301 = vst [vmem:[%s5680_s2 + $0x18] sm:$0xff] %v2269_v61  ;;  %v2246_v16 = vadd.f32 %v5291_v26, %v6609_v21  ;;  %v2275_v5 = vsub.f32 0.0, %v2243_v9  ;;  %v2247_v40 = vadd.f32 %v6515_v12, %v6610_v28  ;;  %v2276_v25 = vsub.f32 0.0, %v2244_v13  ;;  %v6615_v39 = vld [vmem:[#allocation21_spill] sm:$0xff]  ;;  %v6616_v7 = vld [vmem:[#allocation22_spill] sm:$0xff]  ;;  %v6617_v54 = vld [vmem:[#allocation126_spill] sm:$0xff] }
 0x7fa   :  { %2302 = vst [vmem:[%s5680_s2 + $0x20] sm:$0xff] %v2270_v1  ;;  %v2248_v57 = vadd.f32 %v6519_v20, %v6611_v53  ;;  %v2277_v26 = vsub.f32 0.0, %v2245_v14  ;;  %v2249_v11 = vadd.f32 %v5311_v27, %v6612_v44  ;;  %v2250_v37 = vadd.f32 %v5317_v33, %v6613_v0  ;;  %v6618_v49 = vld [vmem:[#allocation23_spill] sm:$0xff]  ;;  %v6619_v2 = vld [vmem:[#allocation127_spill] sm:$0xff]  ;;  %v6620_v62 = vld [vmem:[#allocation24_spill] sm:$0xff] }
 0x7fb   :  { %2303 = vst [vmem:[%s5680_s2 + $0x28] sm:$0xff] %v2271_v10  ;;  %v2278_v12 = vsub.f32 0.0, %v2246_v16  ;;  %v2279_v20 = vsub.f32 0.0, %v2247_v40  ;;  %v2251_v42 = vadd.f32 %v6522_v4, %v6614_v41  ;;  %v2252_v43 = vadd.f32 %v6523_v17, %v6615_v39  ;;  %v6621_v46 = vld [vmem:[#allocation128_spill] sm:$0xff]  ;;  %v6622_v56 = vld [vmem:[#allocation25_spill] sm:$0xff]  ;;  %v6623_v52 = vld [vmem:[#allocation129_spill] sm:$0xff] }
 0x7fc   :  { %2304 = vst [vmem:[%s5680_s2 + $0x30] sm:$0xff] %v2272_v23  ;;  %v2280_v27 = vsub.f32 0.0, %v2248_v57  ;;  %v2281_v33 = vsub.f32 0.0, %v2249_v11  ;;  %v2253_v51 = vadd.f32 %v6617_v54, %v6616_v7  ;;  %v2282_v4 = vsub.f32 0.0, %v2250_v37  ;;  %v6624_v55 = vld [vmem:[#allocation26_spill] sm:$0xff]  ;;  %v6625_v58 = vld [vmem:[#allocation130_spill] sm:$0xff] }
 0x7fd   :  { %2305 = vst [vmem:[%s5680_s2 + $0x38] sm:$0xff] %v2273_v32  ;;  %v2254_v48 = vadd.f32 %v6619_v2, %v6618_v49  ;;  %v2283_v17 = vsub.f32 0.0, %v2251_v42  ;;  %v2255_v60 = vadd.f32 %v6621_v46, %v6620_v62  ;;  %v2284_v50 = vsub.f32 0.0, %v2252_v43  ;;  %v6626_v24 = vld [vmem:[#allocation27_spill] sm:$0xff]  ;;  %v6627_v29 = vld [vmem:[#allocation131_spill] sm:$0xff]  ;;  %v6628_v63 = vld [vmem:[#allocation28_spill] sm:$0xff] }
 0x7fe   :  { %2306 = vst [vmem:[%s5680_s2 + $0x40] sm:$0xff] %v2274_v18  ;;  %v2256_v35 = vadd.f32 %v6623_v52, %v6622_v56  ;;  %v2285_v36 = vsub.f32 0.0, %v2253_v51  ;;  %v2257_v19 = vadd.f32 %v6625_v58, %v6624_v55  ;;  %v2258_v22 = vadd.f32 %v6627_v29, %v6626_v24  ;;  %v6629_v45 = vld [vmem:[#allocation132_spill] sm:$0xff]  ;;  %v6630_v38 = vld [vmem:[#allocation29_spill] sm:$0xff]  ;;  %v6631_v59 = vld [vmem:[#allocation133_spill] sm:$0xff] }
 0x7ff   :  { %2307 = vst [vmem:[%s5680_s2 + $0x48] sm:$0xff] %v2275_v5  ;;  %v2286_v3 = vsub.f32 0.0, %v2254_v48  ;;  %v2287_v34 = vsub.f32 0.0, %v2255_v60  ;;  %v2259_v47 = vadd.f32 %v6629_v45, %v6628_v63  ;;  %v2260_v1 = vadd.f32 %v6631_v59, %v6630_v38  ;;  %v6632_v15 = vld [vmem:[#allocation30_spill] sm:$0xff]  ;;  %v6633_v10 = vld [vmem:[#allocation134_spill] sm:$0xff]  ;;  %v6634_v23 = vld [vmem:[#allocation31_spill] sm:$0xff] }
 0x800   :  { %2308 = vst [vmem:[%s5680_s2 + $0x50] sm:$0xff] %v2276_v25  ;;  %v2288_v61 = vsub.f32 0.0, %v2256_v35  ;;  %v2289_v30 = vsub.f32 0.0, %v2257_v19  ;;  %v2261_v8 = vadd.f32 %v6633_v10, %v6632_v15  ;;  %v2290_v9 = vsub.f32 0.0, %v2258_v22  ;;  %v6635_v31 = vld [vmem:[#allocation135_spill] sm:$0xff]  ;;  %v6636_v6 = vld [vmem:[#allocation32_spill] sm:$0xff] }
 0x801   :  { %2309 = vst [vmem:[%s5680_s2 + $0x58] sm:$0xff] %v2277_v26  ;;  %v2262_v13 = vadd.f32 %v6635_v31, %v6634_v23  ;;  %v2291_v32 = vsub.f32 0.0, %v2259_v47  ;;  %v6637_v14 = vld [vmem:[#allocation136_spill] sm:$0xff]  ;;  %v2292_v21 = vsub.f32 0.0, %v2260_v1  ;;  %v6638_v16 = vld [vmem:[#allocation33_spill] sm:$0xff]  ;;  %v6639_v5 = vld [vmem:[#allocation137_spill] sm:$0xff] }
 0x802   :  { %2310 = vst [vmem:[%s5680_s2 + $0x60] sm:$0xff] %v2278_v12  ;;  %v2263_v18 = vadd.f32 %v6637_v14, %v6636_v6  ;;  %v2264_v28 = vadd.f32 %v6639_v5, %v6638_v16  ;;  %v2293_v40 = vsub.f32 0.0, %v2261_v8  ;;  %v6640_v25 = vld [vmem:[#allocation34_spill] sm:$0xff]  ;;  %v6641_v53 = vld [vmem:[#allocation138_spill] sm:$0xff] }
 0x803   :  { %2311 = vst [vmem:[%s5680_s2 + $0x68] sm:$0xff] %v2279_v20  ;;  %v2265_v57 = vadd.f32 %v6641_v53, %v6640_v25  ;;  %v2294_v26 = vsub.f32 0.0, %v2262_v13 }
 0x804   :  { %2312 = vst [vmem:[%s5680_s2 + $0x70] sm:$0xff] %v2280_v27  ;;  %v2295_v44 = vsub.f32 0.0, %v2263_v18  ;;  %v2296_v11 = vsub.f32 0.0, %v2264_v28 }
 0x805   :  { %2313 = vst [vmem:[%s5680_s2 + $0x78] sm:$0xff] %v2281_v33  ;;  %v2297_v12 = vsub.f32 0.0, %v2265_v57 }
 0x806   :  { %2314 = vst [vmem:[%s5680_s2 + $0x80] sm:$0xff] %v2282_v4 }
 0x807   :  { %2315 = vst [vmem:[%s5680_s2 + $0x88] sm:$0xff] %v2283_v17 }
 0x808   :  { %2316 = vst [vmem:[%s5680_s2 + $0x90] sm:$0xff] %v2284_v50 }
 0x809   :  { %2317 = vst [vmem:[%s5680_s2 + $0x98] sm:$0xff] %v2285_v36 }
 0x80a   :  { %2318 = vst [vmem:[%s5680_s2 + $0xa0] sm:$0xff] %v2286_v3 }
 0x80b   :  { %2319 = vst [vmem:[%s5680_s2 + $0xa8] sm:$0xff] %v2287_v34 }
 0x80c   :  { %2320 = vst [vmem:[%s5680_s2 + $0xb0] sm:$0xff] %v2288_v61 }
 0x80d   :  { %2321 = vst [vmem:[%s5680_s2 + $0xb8] sm:$0xff] %v2289_v30 }
 0x80e   :  { %2322 = vst [vmem:[%s5680_s2 + $0xc0] sm:$0xff] %v2290_v9 }
 0x80f   :  { %2323 = vst [vmem:[%s5680_s2 + $0xc8] sm:$0xff] %v2291_v32 }
 0x810   :  { %2324 = vst [vmem:[%s5680_s2 + $0xd0] sm:$0xff] %v2292_v21 }
 0x811   :  { %2325 = vst [vmem:[%s5680_s2 + $0xd8] sm:$0xff] %v2293_v40 }
 0x812   :  { %2326 = vst [vmem:[%s5680_s2 + $0xe0] sm:$0xff] %v2294_v26 }
 0x813   :  { %2327 = vst [vmem:[%s5680_s2 + $0xe8] sm:$0xff] %v2295_v44 }
 0x814   :  { %2328 = vst [vmem:[%s5680_s2 + $0xf0] sm:$0xff] %v2296_v11 }
 0x815   :  { %2329 = vst [vmem:[%s5680_s2 + $0xf8] sm:$0xff] %v2297_v12 }

</bundles_post_ra>
